<compile_context>
chip_gen: v7x
topology: tpu7x:2x2x1
jax: 0.10.0
libtpu: 0.0.40
codegen_flags: <defaults>
</compile_context>

<pallas_src>
import jax
import jax.numpy as jnp
from jax.experimental import pallas as pl
from jax.experimental.pallas import tpu as pltpu


def _conv1x1_kernel(w_ref, x_ref, o_ref):
    # w_ref: [C_out_blk, C_in]   (PyTorch Conv2d weight layout, untransposed)
    # x_ref: [C_in, M]           (channels x pixels for one image)
    # o_ref: [C_out_blk, M]
    # Cast the (tiny) activation tile to the weight dtype so a bf16 weight
    # drives a single-pass bf16 MXU matmul; no-op when weights are f32.
    x = x_ref[...].astype(w_ref.dtype)
    o_ref[...] = jnp.dot(
        w_ref[...], x, preferred_element_type=jnp.float32
    ).astype(o_ref.dtype)


def prepare_conv_weight(weight, *, dtype=jnp.bfloat16):
    """Cast + reshape the PyTorch Conv2d weight ONCE at parameter-init time.

    weight: [C_out, C_in, 1, 1]  ->  [C_out, C_in] in `dtype` (bf16 by default,
    halving the dominant weight HBM traffic; pass jnp.float32 for exact f32).
    """
    c_out, c_in = weight.shape[0], weight.shape[1]
    return jnp.asarray(weight).reshape(c_out, c_in).astype(dtype)


def conv2d_1x1(x_nchw, w_mat, *, cout_splits=1):
    """1x1 conv, no bias.

    x_nchw : [N, C_in, H, W]   float32
    w_mat  : [C_out, C_in]     prepared via prepare_conv_weight (bf16 or f32)
    cout_splits : keep at 1 on single-TC chips (v5e/v6e). Use 2 only on
                  2-TensorCore parts (v7x); that path uses CORE_PARALLEL so
                  each core streams half the weight through its own DMA path.
    returns: [N, C_out, H, W] float32 (NCHW, same as the PyTorch module)
    """
    n, c_in, h, w = x_nchw.shape
    c_out, c_in_w = w_mat.shape
    assert c_in_w == c_in, "weight / activation channel mismatch"
    m = h * w

    assert c_out % cout_splits == 0, "cout_splits must divide C_out"
    cout_blk = c_out // cout_splits
    assert cout_blk % 8 == 0 or cout_blk == c_out

    # NCHW -> [N, C_in, H*W]: pure reshape, zero data movement, no transpose.
    x3 = x_nchw.reshape(n, c_in, m)

    flops = 2 * n * m * c_in * c_out
    bytes_accessed = (
        w_mat.size * w_mat.dtype.itemsize
        + x3.size * x3.dtype.itemsize
        + n * c_out * m * x_nchw.dtype.itemsize
    )

    if cout_splits == 1:
        # Single block per image: no pointless pipelining on single-TC chips.
        semantics = ("arbitrary", "arbitrary")
    else:
        # v7x-only: real per-core sharding of the C_out axis (and its weight DMA).
        semantics = (pltpu.ARBITRARY, pltpu.CORE_PARALLEL)

    out3 = pl.pallas_call(
        _conv1x1_kernel,
        out_shape=jax.ShapeDtypeStruct((n, c_out, m), x_nchw.dtype),
        grid=(n, cout_splits),
        in_specs=[
            # Weight streamed as-is (no transpose); same block across the N axis
            # so the pipeline does not re-fetch it per image.
            pl.BlockSpec((cout_blk, c_in), lambda b, i: (i, 0)),
            # Per-image activation slab; leading N dim squeezed out of the kernel.
            pl.BlockSpec((None, c_in, m), lambda b, i: (b, 0, 0)),
        ],
        out_specs=pl.BlockSpec((None, cout_blk, m), lambda b, i: (b, i, 0)),
        compiler_params=pltpu.CompilerParams(dimension_semantics=semantics),
        cost_estimate=pl.CostEstimate(
            flops=flops, transcendentals=0, bytes_accessed=bytes_accessed
        ),
    )(w_mat, x3)

    # [N, C_out, H*W] -> NCHW: pure reshape.
    return out3.reshape(n, c_out, h, w)


if __name__ == "__main__":
    key = jax.random.PRNGKey(0)
    kx, kw = jax.random.split(key)

    # Shapes implied by the module's forward: x622 is [1, 304, 7, 7].
    N, C_IN, H, W = 1, 304, 7, 7
    C_OUT = 1824

    x = jax.random.normal(kx, (N, C_IN, H, W), dtype=jnp.float32)
    # Deterministic synthetic weights, same shape as Conv2d(304, 1824, 1).weight.
    weight = jax.random.normal(kw, (C_OUT, C_IN, 1, 1), dtype=jnp.float32) * 0.05

    # High-precision plain-JAX reference for the module's f32 forward.
    ref = jnp.einsum(
        "oc,nchw->nohw",
        weight.reshape(C_OUT, C_IN),
        x,
        precision=jax.lax.Precision.HIGHEST,
    )

    # Default / fastest path: bf16 weights cast once at "init", f32 accumulate.
    w_bf16 = prepare_conv_weight(weight, dtype=jnp.bfloat16)
    y = conv2d_1x1(x, w_bf16)
    jax.block_until_ready(y)
    assert y.shape == (N, C_OUT, H, W)
    assert jnp.allclose(y, ref, atol=1e-1, rtol=5e-2), float(
        jnp.max(jnp.abs(y - ref))
    )

    # Exact-f32-weight path (module-exact parameter fidelity), same kernel.
    w_f32 = prepare_conv_weight(weight, dtype=jnp.float32)
    y32 = conv2d_1x1(x, w_f32)
    jax.block_until_ready(y32)
    assert y32.shape == (N, C_OUT, H, W)
    assert jnp.allclose(y32, ref, atol=5e-2, rtol=5e-2), float(
        jnp.max(jnp.abs(y32 - ref))
    )

    print("KERNEL_OK")
</pallas_src>

<mosaic_0001>
module attributes {stable_mosaic.version = 11 : i64} {
  func.func @_conv1x1_kernel(%arg0: i32, %arg1: i32, %arg2: memref<1824x304xbf16, #tpu.memory_space<vmem>>, %arg3: memref<1x304x49xf32, #tpu.memory_space<vmem>>, %arg4: memref<1x1824x49xf32, #tpu.memory_space<vmem>>) attributes {dimension_semantics = [#tpu.dimension_semantics<arbitrary>, #tpu.dimension_semantics<arbitrary>], iteration_bounds = array<i64: 1, 1>, scalar_prefetch = 0 : i64, scratch_operands = 0 : i64, tpu.core_type = #tpu.core_type<tc>, window_params = [{transform_indices = @transform_0, window_bounds = array<i64: 1824, 304>}, {transform_indices = @transform_1, window_bounds = array<i64: 1, 304, 49>}, {transform_indices = @transform_2, window_bounds = array<i64: 1, 1824, 49>}]} {
    %c0 = arith.constant 0 : index
    %c0_0 = arith.constant 0 : index
    %c0_1 = arith.constant 0 : index
    %0 = vector.load %arg3[%c0, %c0_0, %c0_1] : memref<1x304x49xf32, #tpu.memory_space<vmem>>, vector<1x304x49xf32>
    %1 = vector.shape_cast %0 : vector<1x304x49xf32> to vector<304x49xf32>
    %2 = arith.truncf %1 : vector<304x49xf32> to vector<304x49xbf16>
    %c0_2 = arith.constant 0 : index
    %c0_3 = arith.constant 0 : index
    %3 = vector.load %arg2[%c0_2, %c0_3] : memref<1824x304xbf16, #tpu.memory_space<vmem>>, vector<1824x304xbf16>
    %cst = arith.constant dense<0.000000e+00> : vector<1824x49xf32>
    %4 = tpu.matmul %3, %2, %cst {dimension_numbers = #tpu.dot_dimension_numbers<[1], [0], [0], [1], [0, 0, 1, 1], [], []>} : vector<1824x304xbf16>, vector<304x49xbf16>, vector<1824x49xf32> -> vector<1824x49xf32>
    %c0_4 = arith.constant 0 : index
    %c0_5 = arith.constant 0 : index
    %c0_6 = arith.constant 0 : index
    %5 = vector.load %arg4[%c0_4, %c0_5, %c0_6] : memref<1x1824x49xf32, #tpu.memory_space<vmem>>, vector<1x1824x49xf32>
    %6 = vector.shape_cast %5 : vector<1x1824x49xf32> to vector<1824x49xf32>
    %7 = vector.shape_cast %4 : vector<1824x49xf32> to vector<1x1824x49xf32>
    tpu.vector_store %arg4[%c0_4, %c0_5, %c0_6], %7 {strides = array<i32>} : memref<1x1824x49xf32, #tpu.memory_space<vmem>>, vector<1x1824x49xf32>,
    return
  }
  func.func @transform_0(%arg0: i32, %arg1: i32) -> (i32, i32) {
    %c0_i32 = arith.constant 0 : i32
    %c0_i32_0 = arith.constant 0 : i32
    return %arg1, %c0_i32 : i32, i32
  }
  func.func @transform_1(%arg0: i32, %arg1: i32) -> (i32, i32, i32) {
    %c0_i32 = arith.constant 0 : i32
    %c0_i32_0 = arith.constant 0 : i32
    %c0_i32_1 = arith.constant 0 : i32
    return %arg0, %c0_i32, %c0_i32_0 : i32, i32, i32
  }
  func.func @transform_2(%arg0: i32, %arg1: i32) -> (i32, i32, i32) {
    %c0_i32 = arith.constant 0 : i32
    %c0_i32_0 = arith.constant 0 : i32
    return %arg0, %arg1, %c0_i32 : i32, i32, i32
  }
}

</mosaic_0001>

<bundles_post_ra>
// kernel: tpu_custom_call.1
= control target key start
LH: loop header
LB: loop body
LE: loop exit
PB: predicated region body
PF: predicated region fallthrough
CT: control target
= control target key end

     0   :  { %v5997_v0 = vmov 0   ;;  %vm2235_vm0 = vcmask 392192   ;;  %vm4468_vm1 = vcmask 400384   ;;  %s8799_s1 = inlined_call_operand.vmem [shape: f32[1,304,49], index: 1, kind: input, shape index: {}]   ;;  %s8800_s0 = inlined_call_operand.vmem [shape: bf16[1824,304], index: 0, kind: input, shape index: {}]   ;;  %s8801_s2 = inlined_call_operand.vmem [shape: f32[1,1824,49], index: 2, kind: output, shape index: {}]  }
   0x1   :  { %2578 = vmatprep.subr.bf16.mxu0 %v5997_v0  ;;  %5508 = vmatprep.subr.bf16.mxu1 %v5997_v0  ;;  %v12_v1 = vld [vmem:[%s8799_s1] sm:$0xff]  ;;  %v13_v2 = vld [vmem:[%s8799_s1 + $0x8] sm:$0xff]  ;;  %v14_v3 = vld [vmem:[%s8799_s1 + $0x10] sm:$0xff] }
   0x2   :  { %v50_v4 = vpack.c.bf16 %v13_v2, %v12_v1  ;;  %v15_v5 = vld [vmem:[%s8799_s1 + $0x18] sm:$0xff]  ;;  %v16_v7 = vld [vmem:[%s8799_s1 + $0x20] sm:$0xff]  ;;  %v17_v8 = vld [vmem:[%s8799_s1 + $0x28] sm:$0xff] }
   0x3   :  { %v51_v6 = vpack.c.bf16 %v15_v5, %v14_v3  ;;  %v52_v9 = vpack.c.bf16 %v17_v8, %v16_v7  ;;  %v18_v10 = vld [vmem:[%s8799_s1 + $0x30] sm:$0xff]  ;;  %v19_v11 = vld [vmem:[%s8799_s1 + $0x38] sm:$0xff]  ;;  %v20_v13 = vld [vmem:[%s8799_s1 + $0x40] sm:$0xff] }
   0x4   :  { %2579 = vmatpush1.bf16.msra.mxu0 %v50_v4  ;;  %5524 = vmatpush1.bf16.msra.mxu1 %v50_v4  ;;  %v53_v12 = vpack.c.bf16 %v19_v11, %v18_v10  ;;  %v5543_v14 = vld [vmem:[%s8800_s0 + $0x4] ss:$12 sps:$4 sm:$0xff]   ;;  %v21_v15 = vld [vmem:[%s8799_s1 + $0x48] sm:$0xff]  ;;  %v5546_v16 = vld [vmem:[%s8800_s0 + $0x814] ss:$12 sps:$4 sm:$0xff]  }
   0x5   :  { %2580 = vmatprep.subr.bf16.mxu0 %v5997_v0  ;;  %5509 = vmatprep.subr.bf16.mxu1 %v5997_v0  ;;  %v54_v17 = vpack.c.bf16 %v21_v15, %v20_v13  ;;  %v22_v18 = vld [vmem:[%s8799_s1 + $0x50] sm:$0xff]  ;;  %v23_v19 = vld [vmem:[%s8799_s1 + $0x58] sm:$0xff]  ;;  %v24_v21 = vld [vmem:[%s8799_s1 + $0x60] sm:$0xff] }
   0x6   :  { %2610 = vmatprep.mubr.bf16.mxu0 %v5543_v14  ;;  %3298 = vmatprep.mubr.bf16.mxu1 %v5546_v16  ;;  %v55_v20 = vpack.c.bf16 %v23_v19, %v22_v18  ;;  %v25_v22 = vld [vmem:[%s8799_s1 + $0x68] sm:$0xff]  ;;  %v26_v24 = vld [vmem:[%s8799_s1 + $0x70] sm:$0xff]  ;;  %v27_v25 = vld [vmem:[%s8799_s1 + $0x78] sm:$0xff] }
   0x7   :  { %v56_v23 = vpack.c.bf16 %v25_v22, %v24_v21  ;;  %v57_v26 = vpack.c.bf16 %v27_v25, %v26_v24  ;;  %v28_v27 = vld [vmem:[%s8799_s1 + $0x80] sm:$0xff]  ;;  %v29_v28 = vld [vmem:[%s8799_s1 + $0x88] sm:$0xff]  ;;  %v30_v30 = vld [vmem:[%s8799_s1 + $0x90] sm:$0xff] }
   0x8   :  { %2581 = vmatpush1.bf16.msra.mxu0 %v51_v6  ;;  %5525 = vmatpush1.bf16.msra.mxu1 %v51_v6  ;;  %v58_v29 = vpack.c.bf16 %v29_v28, %v28_v27  ;;  %v31_v31 = vld [vmem:[%s8799_s1 + $0x98] sm:$0xff]  ;;  %v32_v33 = vld [vmem:[%s8799_s1 + $0xa0] sm:$0xff]  ;;  %v33_v34 = vld [vmem:[%s8799_s1 + $0xa8] sm:$0xff] }
   0x9   :  { %2582 = vmatprep.subr.bf16.mxu0 %v5997_v0  ;;  %5510 = vmatprep.subr.bf16.mxu1 %v5997_v0  ;;  %v59_v32 = vpack.c.bf16 %v31_v31, %v30_v30  ;;  %v60_v35 = vpack.c.bf16 %v33_v34, %v32_v33  ;;  %v34_v36 = vld [vmem:[%s8799_s1 + $0xb0] sm:$0xff]  ;;  %v35_v37 = vld [vmem:[%s8799_s1 + $0xb8] sm:$0xff]  ;;  %v36_v39 = vld [vmem:[%s8799_s1 + $0xc0] sm:$0xff] }
   0xa   :  { %v61_v38 = vpack.c.bf16 %v35_v37, %v34_v36  ;;  %v37_v40 = vld [vmem:[%s8799_s1 + $0xc8] sm:$0xff]  ;;  %v38_v42 = vld [vmem:[%s8799_s1 + $0xd0] sm:$0xff]  ;;  %v39_v43 = vld [vmem:[%s8799_s1 + $0xd8] sm:$0xff] }
   0xb   :  { %v62_v41 = vpack.c.bf16 %v37_v40, %v36_v39  ;;  %v63_v44 = vpack.c.bf16 %v39_v43, %v38_v42  ;;  %v40_v45 = vld [vmem:[%s8799_s1 + $0xe0] sm:$0xff]  ;;  %v41_v46 = vld [vmem:[%s8799_s1 + $0xe8] sm:$0xff]  ;;  %v42_v47 = vld [vmem:[%s8799_s1 + $0xf0] sm:$0xff] }
   0xc   :  { %2583 = vmatpush1.bf16.msra.mxu0 %v52_v9  ;;  %5526 = vmatpush1.bf16.msra.mxu1 %v52_v9  ;;  %v43_v48 = vld [vmem:[%s8799_s1 + $0xf8] sm:$0xff]  ;;  %v64_v49 = vpack.c.bf16 %v41_v46, %v40_v45  ;;  %v44_v50 = vld [vmem:[%s8799_s1 + $0x100] sm:$0xff]  ;;  %v45_v51 = vld [vmem:[%s8799_s1 + $0x108] sm:$0xff] }
   0xd   :  { %2584 = vmatprep.subr.bf16.mxu0 %v5997_v0  ;;  %5511 = vmatprep.subr.bf16.mxu1 %v5997_v0  ;;  %v65_v52 = vpack.c.bf16 %v43_v48, %v42_v47  ;;  %v5541_v53 = vld [vmem:[%s8800_s0] ss:$12 sps:$4 sm:$0xff]   ;;  %v5544_v54 = vld [vmem:[%s8800_s0 + $0x810] ss:$12 sps:$4 sm:$0xff]   ;;  %v66_v55 = vpack.c.bf16 %v45_v51, %v44_v50  ;;  %v5551_v61 = vld [vmem:[%s8800_s0 + $0x18] ss:$12 sps:$4 sm:$0xff]  }
   0xe   :  { %v46_v56 = vld [vmem:[%s8799_s1 + $0x110] sm:$0xff]  ;;  %v47_v57 = vld [vmem:[%s8799_s1 + $0x118] sm:$0xff]  ;;  %v5558_v2 = vld [vmem:[%s8800_s0 + $0x840] ss:$12 sps:$4 sm:$0xff]  }
   0xf   :  { %v5547_v58 = vld [vmem:[%s8800_s0 + $0x1c] ss:$12 sps:$4 sm:$0xff]   ;;  %v5549_v59 = vld [vmem:[%s8800_s0 + $0x82c] ss:$12 sps:$4 sm:$0xff]   ;;  %v67_v60 = vpack.c.bf16 %v47_v57, %v46_v56  ;;  %v5553_v63 = vld [vmem:[%s8800_s0 + $0x34] ss:$12 sps:$4 sm:$0xff]  }
  0x10   :  { %2585 = vmatpush1.bf16.msra.mxu0 %v53_v12  ;;  %5527 = vmatpush1.bf16.msra.mxu1 %v53_v12  ;;  %v5552_v62 = vld [vmem:[%s8800_s0 + $0x828] ss:$12 sps:$4 sm:$0xff]   ;;  %v5557_v1 = vld [vmem:[%s8800_s0 + $0x30] ss:$12 sps:$4 sm:$0xff]   ;;  %v5559_v3 = vld [vmem:[%s8800_s0 + $0x4c] ss:$12 sps:$4 sm:$0xff]  }
  0x11   :  { %2586 = vmatprep.subr.bf16.mxu0 %v5997_v0  ;;  %5512 = vmatprep.subr.bf16.mxu1 %v5997_v0  ;;  %v5561_v4 = vld [vmem:[%s8800_s0 + $0x85c] ss:$12 sps:$4 sm:$0xff]   ;;  %v5564_v6 = vld [vmem:[%s8800_s0 + $0x858] ss:$12 sps:$4 sm:$0xff]   ;;  %v5567_v8 = vld [vmem:[%s8800_s0 + $0x874] ss:$12 sps:$4 sm:$0xff]  }
  0x12   :  { %v5563_v5 = vld [vmem:[%s8800_s0 + $0x48] ss:$12 sps:$4 sm:$0xff]   ;;  %v5565_v7 = vld [vmem:[%s8800_s0 + $0x64] ss:$12 sps:$4 sm:$0xff]   ;;  %v5569_v12 = vld [vmem:[%s8800_s0 + $0x60] ss:$12 sps:$4 sm:$0xff]  }
  0x13   :  { %v48_v9 = vld [vmem:[%s8799_s1 + $0x120] sm:$0xff]  ;;  %v49_v10 = vld [vmem:[%s8799_s1 + $0x128] sm:$0xff]  ;;  %v5570_v13 = vld [vmem:[%s8800_s0 + $0x870] ss:$12 sps:$4 sm:$0xff]  }
  0x14   :  { %2587 = vmatpush1.bf16.msra.mxu0 %v54_v17  ;;  %5528 = vmatpush1.bf16.msra.mxu1 %v54_v17  ;;  %v68_v11 = vpack.c.bf16 %v49_v10, %v48_v9  ;;  %v5571_v14 = vld [vmem:[%s8800_s0 + $0x7c] ss:$12 sps:$4 sm:$0xff]   ;;  %v5573_v15 = vld [vmem:[%s8800_s0 + $0x88c] ss:$12 sps:$4 sm:$0xff]   ;;  %v5577_v18 = vld [vmem:[%s8800_s0 + $0x94] ss:$12 sps:$4 sm:$0xff]  }
  0x15   :  { %2588 = vmatprep.subr.bf16.mxu0 %v5997_v0  ;;  %5513 = vmatprep.subr.bf16.mxu1 %v5997_v0  ;;  %v5575_v16 = vld [vmem:[%s8800_s0 + $0x78] ss:$12 sps:$4 sm:$0xff]   ;;  %v5576_v17 = vld [vmem:[%s8800_s0 + $0x888] ss:$12 sps:$4 sm:$0xff]   ;;  %v5582_v21 = vld [vmem:[%s8800_s0 + $0x8a0] ss:$12 sps:$4 sm:$0xff]  }
  0x16   :  { %v5579_v19 = vld [vmem:[%s8800_s0 + $0x8a4] ss:$12 sps:$4 sm:$0xff]   ;;  %v5583_v22 = vld [vmem:[%s8800_s0 + $0xac] ss:$12 sps:$4 sm:$0xff]   ;;  %v5587_v24 = vld [vmem:[%s8800_s0 + $0xa8] ss:$12 sps:$4 sm:$0xff]  }
  0x17   :  { %v5588_v25 = vld [vmem:[%s8800_s0 + $0x8b8] ss:$12 sps:$4 sm:$0xff]   ;;  %v5591_v27 = vld [vmem:[%s8800_s0 + $0x8d4] ss:$12 sps:$4 sm:$0xff]   ;;  %v5595_v30 = vld [vmem:[%s8800_s0 + $0xdc] ss:$12 sps:$4 sm:$0xff]  }
  0x18   :  { %2589 = vmatpush1.bf16.msra.mxu0 %v55_v20  ;;  %5529 = vmatpush1.bf16.msra.mxu1 %v55_v20  ;;  %v5581_v20 = vld [vmem:[%s8800_s0 + $0x90] ss:$12 sps:$4 sm:$0xff]   ;;  %v5593_v28 = vld [vmem:[%s8800_s0 + $0xc0] ss:$12 sps:$4 sm:$0xff]   ;;  %v5600_v33 = vld [vmem:[%s8800_s0 + $0x8e8] ss:$12 sps:$4 sm:$0xff]  }
  0x19   :  { %2590 = vmatprep.subr.bf16.mxu0 %v5997_v0  ;;  %5514 = vmatprep.subr.bf16.mxu1 %v5997_v0  ;;  %v5597_v31 = vld [vmem:[%s8800_s0 + $0x8ec] ss:$12 sps:$4 sm:$0xff]   ;;  %v5601_v34 = vld [vmem:[%s8800_s0 + $0xf4] ss:$12 sps:$4 sm:$0xff]   ;;  %v5605_v36 = vld [vmem:[%s8800_s0 + $0xf0] ss:$12 sps:$4 sm:$0xff]  }
  0x1a   :  { %v5606_v37 = vld [vmem:[%s8800_s0 + $0x900] ss:$12 sps:$4 sm:$0xff]   ;;  %v5609_v39 = vld [vmem:[%s8800_s0 + $0x91c] ss:$12 sps:$4 sm:$0xff]   ;;  %v5613_v42 = vld [vmem:[%s8800_s0 + $0x124] ss:$12 sps:$4 sm:$0xff]  }
  0x1b   :  { %v5611_v40 = vld [vmem:[%s8800_s0 + $0x108] ss:$12 sps:$4 sm:$0xff]   ;;  %v5618_v45 = vld [vmem:[%s8800_s0 + $0x930] ss:$12 sps:$4 sm:$0xff]   ;;  %v5621_v47 = vld [vmem:[%s8800_s0 + $0x94c] ss:$12 sps:$4 sm:$0xff]  }
  0x1c   :  { %2591 = vmatpush1.bf16.msra.mxu0 %v56_v23  ;;  %5530 = vmatpush1.bf16.msra.mxu1 %v56_v23  ;;  %v5585_v23 = vld [vmem:[%s8800_s0 + $0x8bc] ss:$12 sps:$4 sm:$0xff]   ;;  %v5615_v43 = vld [vmem:[%s8800_s0 + $0x934] ss:$12 sps:$4 sm:$0xff]   ;;  %v5623_v48 = vld [vmem:[%s8800_s0 + $0x138] ss:$12 sps:$4 sm:$0xff]  }
  0x1d   :  { %2592 = vmatprep.subr.bf16.mxu0 %v5997_v0  ;;  %5515 = vmatprep.subr.bf16.mxu1 %v5997_v0  ;;  %v5619_v46 = vld [vmem:[%s8800_s0 + $0x13c] ss:$12 sps:$4 sm:$0xff]   ;;  %v5625_v50 = vld [vmem:[%s8800_s0 + $0x154] ss:$12 sps:$4 sm:$0xff]   ;;  %v5627_v51 = vld [vmem:[%s8800_s0 + $0x964] ss:$12 sps:$4 sm:$0xff]  }
  0x1e   :  { %v5635_v56 = vld [vmem:[%s8800_s0 + $0x168] ss:$12 sps:$4 sm:$0xff]   ;;  %v5636_v57 = vld [vmem:[%s8800_s0 + $0x978] ss:$12 sps:$4 sm:$0xff]  }
  0x1f   :  { %v5660_v9 = vld [vmem:[%s8800_s0 + $0x9d8] ss:$12 sps:$4 sm:$0xff]  }
  0x20   :  { %2593 = vmatpush1.bf16.msra.mxu0 %v57_v26  ;;  %5531 = vmatpush1.bf16.msra.mxu1 %v57_v26  ;;  %v5589_v26 = vld [vmem:[%s8800_s0 + $0xc4] ss:$12 sps:$4 sm:$0xff]  }
  0x21   :  { %2594 = vmatprep.subr.bf16.mxu0 %v5997_v0  ;;  %5516 = vmatprep.subr.bf16.mxu1 %v5997_v0  ;;  %v5661_v10 = vld [vmem:[%s8800_s0 + $0x1e4] ss:$12 sps:$4 sm:$0xff]  }
  0x24   :  { %2595 = vmatpush1.bf16.msra.mxu0 %v58_v29  ;;  %5532 = vmatpush1.bf16.msra.mxu1 %v58_v29  ;;  %v5594_v29 = vld [vmem:[%s8800_s0 + $0x8d0] ss:$12 sps:$4 sm:$0xff]  }
  0x25   :  { %2596 = vmatprep.subr.bf16.mxu0 %v5997_v0  ;;  %5517 = vmatprep.subr.bf16.mxu1 %v5997_v0 }
  0x28   :  { %2597 = vmatpush1.bf16.msra.mxu0 %v59_v32  ;;  %5533 = vmatpush1.bf16.msra.mxu1 %v59_v32  ;;  %v5599_v32 = vld [vmem:[%s8800_s0 + $0xd8] ss:$12 sps:$4 sm:$0xff]  }
  0x29   :  { %2598 = vmatprep.subr.bf16.mxu0 %v5997_v0  ;;  %5518 = vmatprep.subr.bf16.mxu1 %v5997_v0 }
  0x2c   :  { %2599 = vmatpush1.bf16.msra.mxu0 %v60_v35  ;;  %5534 = vmatpush1.bf16.msra.mxu1 %v60_v35  ;;  %v5603_v35 = vld [vmem:[%s8800_s0 + $0x904] ss:$12 sps:$4 sm:$0xff]  }
  0x2d   :  { %2600 = vmatprep.subr.bf16.mxu0 %v5997_v0  ;;  %5519 = vmatprep.subr.bf16.mxu1 %v5997_v0 }
  0x30   :  { %2601 = vmatpush1.bf16.msra.mxu0 %v61_v38  ;;  %5535 = vmatpush1.bf16.msra.mxu1 %v61_v38  ;;  %v5607_v38 = vld [vmem:[%s8800_s0 + $0x10c] ss:$12 sps:$4 sm:$0xff]  }
  0x31   :  { %2602 = vmatprep.subr.bf16.mxu0 %v5997_v0  ;;  %5520 = vmatprep.subr.bf16.mxu1 %v5997_v0 }
  0x34   :  { %2603 = vmatpush1.bf16.msra.mxu0 %v62_v41  ;;  %5536 = vmatpush1.bf16.msra.mxu1 %v62_v41  ;;  %v5612_v41 = vld [vmem:[%s8800_s0 + $0x918] ss:$12 sps:$4 sm:$0xff]  }
  0x35   :  { %2604 = vmatprep.subr.bf16.mxu0 %v5997_v0  ;;  %5521 = vmatprep.subr.bf16.mxu1 %v5997_v0 }
  0x38   :  { %2605 = vmatpush1.bf16.msra.mxu0 %v63_v44  ;;  %5537 = vmatpush1.bf16.msra.mxu1 %v63_v44  ;;  %v5617_v44 = vld [vmem:[%s8800_s0 + $0x120] ss:$12 sps:$4 sm:$0xff]  }
  0x39   :  { %2606 = vmatprep.subr.bf16.mxu0 %v5997_v0  ;;  %5522 = vmatprep.subr.bf16.mxu1 %v5997_v0 }
  0x3c   :  { %2607 = vmatpush1.bf16.msra.mxu0 %v64_v49  ;;  %5538 = vmatpush1.bf16.msra.mxu1 %v64_v49  ;;  %v5624_v49 = vld [vmem:[%s8800_s0 + $0x948] ss:$12 sps:$4 sm:$0xff]  }
  0x3d   :  { %2608 = vmatprep.subr.bf16.mxu0 %v5997_v0  ;;  %5523 = vmatprep.subr.bf16.mxu1 %v5997_v0  ;;  %v5555_v0 = vld [vmem:[%s8800_s0 + $0x844] ss:$12 sps:$4 sm:$0xff]  }
  0x40   :  { %2609 = vmatpush1.bf16.msra.mxu0 %v65_v52  ;;  %5539 = vmatpush1.bf16.msra.mxu1 %v65_v52  ;;  %v5629_v52 = vld [vmem:[%s8800_s0 + $0x150] ss:$12 sps:$4 sm:$0xff]  }
  0x41   :  { %5274 = vmatprep.subr.bf16.mxu1 %v66_v55 }
  0x43   :  { %2611 = vmatmul.mubr.bf16.vlgmr.msra.gmra.mrb[0].mxu0 %v5541_v53  ;;  %3299 = vmatmul.mubr.bf16.vlgmr.msra.gmra.mrb[0].mxu1 %v5544_v54  ;;  %v5630_v53 = vld [vmem:[%s8800_s0 + $0x960] ss:$12 sps:$4 sm:$0xff]  }
  0x44   :  { %2618 = vmatprep.mubr.bf16.mxu0 %v5547_v58  ;;  %3306 = vmatprep.mubr.bf16.mxu1 %v5549_v59  ;;  %v5631_v54 = vld [vmem:[%s8800_s0 + $0x16c] ss:$12 sps:$4 sm:$0xff]   ;;  %v5637_v58 = vld [vmem:[%s8800_s0 + $0x184] ss:$12 sps:$4 sm:$0xff]   ;;  %v5639_v59 = vld [vmem:[%s8800_s0 + $0x994] ss:$12 sps:$4 sm:$0xff]  }
  0x45   :  { %5275 = vmatpush3.bf16.msra.mxu1 %v66_v55  ;;  %v5633_v55 = vld [vmem:[%s8800_s0 + $0x97c] ss:$12 sps:$4 sm:$0xff]  }
  0x46   :  { %5276 = vmatprep.subr.bf16.mxu1 %v67_v60 }
  0x49   :  { %5277 = vmatpush3.bf16.msra.mxu1 %v67_v60  ;;  %v5641_v60 = vld [vmem:[%s8800_s0 + $0x180] ss:$12 sps:$4 sm:$0xff]  }
  0x4a   :  { %5278 = vmatprep.subr.bf16.mxu1 %v68_v11 }
  0x4b   :  { %2619 = vmatmul.mubr.bf16.gmra.mrb[4].mxu0 %v5551_v61  ;;  %3307 = vmatmul.mubr.bf16.gmra.mrb[4].mxu1 %v5552_v62  ;;  %v5642_v61 = vld [vmem:[%s8800_s0 + $0x990] ss:$12 sps:$4 sm:$0xff]  }
  0x4c   :  { %2626 = vmatprep.mubr.bf16.mxu0 %v5553_v63  ;;  %3314 = vmatprep.mubr.bf16.mxu1 %v5555_v0  ;;  %v5643_v62 = vld [vmem:[%s8800_s0 + $0x19c] ss:$12 sps:$4 sm:$0xff]   ;;  %v5645_v63 = vld [vmem:[%s8800_s0 + $0x9ac] ss:$12 sps:$4 sm:$0xff]  }
  0x4d   :  { %5279 = vmatpush3.bf16.msra.mxu1 %v68_v11  ;;  %v5647_v0 = vld [vmem:[%s8800_s0 + $0x198] ss:$12 sps:$4 sm:$0xff]   ;;  %v5663_v11 = vld [vmem:[%s8800_s0 + $0x9f4] ss:$12 sps:$4 sm:$0xff]  }
  0x53   :  { %2627 = vmatmul.mubr.bf16.gmra.mrb[8].mxu0 %v5557_v1  ;;  %3315 = vmatmul.mubr.bf16.gmra.mrb[8].mxu1 %v5558_v2  ;;  %v5648_v1 = vld [vmem:[%s8800_s0 + $0x9a8] ss:$12 sps:$4 sm:$0xff]  }
  0x54   :  { %2634 = vmatprep.mubr.bf16.mxu0 %v5559_v3  ;;  %3322 = vmatprep.mubr.bf16.mxu1 %v5561_v4  ;;  %v5649_v2 = vld [vmem:[%s8800_s0 + $0x1b4] ss:$12 sps:$4 sm:$0xff]   ;;  %v5651_v3 = vld [vmem:[%s8800_s0 + $0x9c4] ss:$12 sps:$4 sm:$0xff]  }
  0x55   :  { %v5653_v4 = vld [vmem:[%s8800_s0 + $0x1b0] ss:$12 sps:$4 sm:$0xff]  }
  0x5b   :  { %2635 = vmatmul.mubr.bf16.gmra.mrb[12].mxu0 %v5563_v5  ;;  %3323 = vmatmul.mubr.bf16.gmra.mrb[12].mxu1 %v5564_v6  ;;  %v5654_v5 = vld [vmem:[%s8800_s0 + $0x9c0] ss:$12 sps:$4 sm:$0xff]  }
  0x5c   :  { %2642 = vmatprep.mubr.bf16.mxu0 %v5565_v7  ;;  %3330 = vmatprep.mubr.bf16.mxu1 %v5567_v8  ;;  %v5655_v6 = vld [vmem:[%s8800_s0 + $0x1cc] ss:$12 sps:$4 sm:$0xff]   ;;  %v5657_v7 = vld [vmem:[%s8800_s0 + $0x9dc] ss:$12 sps:$4 sm:$0xff]  }
  0x5d   :  { %v5659_v8 = vld [vmem:[%s8800_s0 + $0x1c8] ss:$12 sps:$4 sm:$0xff]  }
  0x63   :  { %2643 = vmatmul.mubr.bf16.gmra.mrb[16].mxu0 %v5569_v12  ;;  %3331 = vmatmul.mubr.bf16.gmra.mrb[16].mxu1 %v5570_v13  ;;  %v5665_v12 = vld [vmem:[%s8800_s0 + $0x1e0] ss:$12 sps:$4 sm:$0xff]   ;;  %v5666_v13 = vld [vmem:[%s8800_s0 + $0x9f0] ss:$12 sps:$4 sm:$0xff]  }
  0x64   :  { %2650 = vmatprep.mubr.bf16.mxu0 %v5571_v14  ;;  %3338 = vmatprep.mubr.bf16.mxu1 %v5573_v15  ;;  %v5667_v14 = vld [vmem:[%s8800_s0 + $0x1fc] ss:$12 sps:$4 sm:$0xff]   ;;  %v5669_v15 = vld [vmem:[%s8800_s0 + $0xa0c] ss:$12 sps:$4 sm:$0xff]  }
  0x6b   :  { %2651 = vmatmul.mubr.bf16.gmra.mrb[20].mxu0 %v5575_v16  ;;  %3339 = vmatmul.mubr.bf16.gmra.mrb[20].mxu1 %v5576_v17  ;;  %v5671_v16 = vld [vmem:[%s8800_s0 + $0x1f8] ss:$12 sps:$4 sm:$0xff]   ;;  %v5672_v17 = vld [vmem:[%s8800_s0 + $0xa08] ss:$12 sps:$4 sm:$0xff]  }
  0x6c   :  { %2658 = vmatprep.mubr.bf16.mxu0 %v5577_v18  ;;  %3346 = vmatprep.mubr.bf16.mxu1 %v5579_v19  ;;  %v5673_v18 = vld [vmem:[%s8800_s0 + $0x214] ss:$12 sps:$4 sm:$0xff]   ;;  %v5675_v19 = vld [vmem:[%s8800_s0 + $0xa24] ss:$12 sps:$4 sm:$0xff]  }
  0x73   :  { %2659 = vmatmul.mubr.bf16.gmra.mrb[24].mxu0 %v5581_v20  ;;  %3347 = vmatmul.mubr.bf16.gmra.mrb[24].mxu1 %v5582_v21  ;;  %v5677_v20 = vld [vmem:[%s8800_s0 + $0x210] ss:$12 sps:$4 sm:$0xff]   ;;  %v5678_v21 = vld [vmem:[%s8800_s0 + $0xa20] ss:$12 sps:$4 sm:$0xff]  }
  0x74   :  { %2666 = vmatprep.mubr.bf16.mxu0 %v5583_v22  ;;  %3354 = vmatprep.mubr.bf16.mxu1 %v5585_v23  ;;  %v5679_v22 = vld [vmem:[%s8800_s0 + $0x22c] ss:$12 sps:$4 sm:$0xff]   ;;  %v5681_v23 = vld [vmem:[%s8800_s0 + $0xa3c] ss:$12 sps:$4 sm:$0xff]  }
  0x7b   :  { %2667 = vmatmul.mubr.bf16.gmra.mrb[28].mxu0 %v5587_v24  ;;  %3355 = vmatmul.mubr.bf16.gmra.mrb[28].mxu1 %v5588_v25  ;;  %v5683_v24 = vld [vmem:[%s8800_s0 + $0x228] ss:$12 sps:$4 sm:$0xff]   ;;  %v5684_v25 = vld [vmem:[%s8800_s0 + $0xa38] ss:$12 sps:$4 sm:$0xff]  }
  0x7c   :  { %2674 = vmatprep.mubr.bf16.mxu0 %v5589_v26  ;;  %3362 = vmatprep.mubr.bf16.mxu1 %v5591_v27  ;;  %v5685_v26 = vld [vmem:[%s8800_s0 + $0x244] ss:$12 sps:$4 sm:$0xff]   ;;  %v5687_v27 = vld [vmem:[%s8800_s0 + $0xa54] ss:$12 sps:$4 sm:$0xff]  }
  0x83   :  { %2675 = vmatmul.mubr.bf16.gmra.mrb[32].mxu0 %v5593_v28  ;;  %3363 = vmatmul.mubr.bf16.gmra.mrb[32].mxu1 %v5594_v29  ;;  %v5689_v28 = vld [vmem:[%s8800_s0 + $0x240] ss:$12 sps:$4 sm:$0xff]   ;;  %v5690_v29 = vld [vmem:[%s8800_s0 + $0xa50] ss:$12 sps:$4 sm:$0xff]  }
  0x84   :  { %2682 = vmatprep.mubr.bf16.mxu0 %v5595_v30  ;;  %3370 = vmatprep.mubr.bf16.mxu1 %v5597_v31  ;;  %v5691_v30 = vld [vmem:[%s8800_s0 + $0x25c] ss:$12 sps:$4 sm:$0xff]   ;;  %v5693_v31 = vld [vmem:[%s8800_s0 + $0xa6c] ss:$12 sps:$4 sm:$0xff]  }
  0x8b   :  { %2683 = vmatmul.mubr.bf16.gmra.mrb[36].mxu0 %v5599_v32  ;;  %3371 = vmatmul.mubr.bf16.gmra.mrb[36].mxu1 %v5600_v33  ;;  %v5695_v32 = vld [vmem:[%s8800_s0 + $0x258] ss:$12 sps:$4 sm:$0xff]   ;;  %v5696_v33 = vld [vmem:[%s8800_s0 + $0xa68] ss:$12 sps:$4 sm:$0xff]  }
  0x8c   :  { %2690 = vmatprep.mubr.bf16.mxu0 %v5601_v34  ;;  %3378 = vmatprep.mubr.bf16.mxu1 %v5603_v35  ;;  %v5697_v34 = vld [vmem:[%s8800_s0 + $0x274] ss:$12 sps:$4 sm:$0xff]   ;;  %v5699_v35 = vld [vmem:[%s8800_s0 + $0xa84] ss:$12 sps:$4 sm:$0xff]  }
  0x93   :  { %2691 = vmatmul.mubr.bf16.gmra.mrb[40].mxu0 %v5605_v36  ;;  %3379 = vmatmul.mubr.bf16.gmra.mrb[40].mxu1 %v5606_v37  ;;  %v5701_v36 = vld [vmem:[%s8800_s0 + $0x270] ss:$12 sps:$4 sm:$0xff]   ;;  %v5702_v37 = vld [vmem:[%s8800_s0 + $0xa80] ss:$12 sps:$4 sm:$0xff]  }
  0x94   :  { %2698 = vmatprep.mubr.bf16.mxu0 %v5607_v38  ;;  %3386 = vmatprep.mubr.bf16.mxu1 %v5609_v39  ;;  %v5703_v38 = vld [vmem:[%s8800_s0 + $0x28c] ss:$12 sps:$4 sm:$0xff]   ;;  %v5705_v39 = vld [vmem:[%s8800_s0 + $0xa9c] ss:$12 sps:$4 sm:$0xff]  }
  0x9b   :  { %2699 = vmatmul.mubr.bf16.gmra.mrb[44].mxu0 %v5611_v40  ;;  %3387 = vmatmul.mubr.bf16.gmra.mrb[44].mxu1 %v5612_v41 }
  0x9c   :  { %2706 = vmatprep.mubr.bf16.mxu0 %v5613_v42  ;;  %3394 = vmatprep.mubr.bf16.mxu1 %v5615_v43  ;;  %v5707_v43 = vld [vmem:[%s8800_s0 + $0x288] ss:$12 sps:$4 sm:$0xff]  }
  0xa3   :  { %2707 = vmatmul.mubr.bf16.gmra.mrb[48].mxu0 %v5617_v44  ;;  %3395 = vmatmul.mubr.bf16.gmra.mrb[48].mxu1 %v5618_v45  ;;  %v5708_v45 = vld [vmem:[%s8800_s0 + $0xa98] ss:$12 sps:$4 sm:$0xff]  }
  0xa4   :  { %2714 = vmatprep.mubr.bf16.mxu0 %v5619_v46  ;;  %3402 = vmatprep.mubr.bf16.mxu1 %v5621_v47 }
  0xab   :  { %2715 = vmatmul.mubr.bf16.gmra.mrb[52].mxu0 %v5623_v48  ;;  %3403 = vmatmul.mubr.bf16.gmra.mrb[52].mxu1 %v5624_v49  ;;  %v5709_v48 = vld [vmem:[%s8800_s0 + $0x2a4] ss:$12 sps:$4 sm:$0xff]   ;;  %v5711_v49 = vld [vmem:[%s8800_s0 + $0x8] ss:$12 sps:$4 sm:$0xff]  }
  0xac   :  { %2722 = vmatprep.mubr.bf16.mxu0 %v5625_v50  ;;  %3410 = vmatprep.mubr.bf16.mxu1 %v5627_v51 }
  0xb3   :  { %2723 = vmatmul.mubr.bf16.gmra.mrb[56].mxu0 %v5629_v52  ;;  %3411 = vmatmul.mubr.bf16.gmra.mrb[56].mxu1 %v5630_v53 }
  0xb4   :  { %2730 = vmatprep.mubr.bf16.mxu0 %v5631_v54  ;;  %3418 = vmatprep.mubr.bf16.mxu1 %v5633_v55  ;;  %v5712_v55 = vld [vmem:[%s8800_s0 + $0x2a0] ss:$12 sps:$4 sm:$0xff]  }
  0xbb   :  { %2731 = vmatmul.mubr.bf16.gmra.mrb[60].mxu0 %v5635_v56  ;;  %3419 = vmatmul.mubr.bf16.gmra.mrb[60].mxu1 %v5636_v57  ;;  %v5713_v57 = vld [vmem:[%s8800_s0 + $0x20] ss:$12 sps:$4 sm:$0xff]  }
  0xbc   :  { %2738 = vmatprep.mubr.bf16.mxu0 %v5637_v58  ;;  %3426 = vmatprep.mubr.bf16.mxu1 %v5639_v59 }
  0xc3   :  { %2739 = vmatmul.mubr.bf16.gmra.mrb[64].mxu0 %v5641_v60  ;;  %3427 = vmatmul.mubr.bf16.gmra.mrb[64].mxu1 %v5642_v61  ;;  %v5714_v60 = vld [vmem:[%s8800_s0 + $0x2bc] ss:$12 sps:$4 sm:$0xff]   ;;  %v5716_v61 = vld [vmem:[%s8800_s0 + $0x38] ss:$12 sps:$4 sm:$0xff]  }
  0xc4   :  { %2746 = vmatprep.mubr.bf16.mxu0 %v5643_v62  ;;  %3434 = vmatprep.mubr.bf16.mxu1 %v5645_v63 }
  0xcb   :  { %2747 = vmatmul.mubr.bf16.gmra.mrb[68].mxu0 %v5647_v0  ;;  %3435 = vmatmul.mubr.bf16.gmra.mrb[68].mxu1 %v5648_v1 }
  0xcc   :  { %2754 = vmatprep.mubr.bf16.mxu0 %v5649_v2  ;;  %3442 = vmatprep.mubr.bf16.mxu1 %v5651_v3  ;;  %v5717_v3 = vld [vmem:[%s8800_s0 + $0x2b8] ss:$12 sps:$4 sm:$0xff]  }
  0xd3   :  { %2755 = vmatmul.mubr.bf16.gmra.mrb[72].mxu0 %v5653_v4  ;;  %3443 = vmatmul.mubr.bf16.gmra.mrb[72].mxu1 %v5654_v5  ;;  %v5718_v5 = vld [vmem:[%s8800_s0 + $0x50] ss:$12 sps:$4 sm:$0xff]  }
  0xd4   :  { %2762 = vmatprep.mubr.bf16.mxu0 %v5655_v6  ;;  %3450 = vmatprep.mubr.bf16.mxu1 %v5657_v7 }
  0xdb   :  { %2763 = vmatmul.mubr.bf16.gmra.mrb[76].mxu0 %v5659_v8  ;;  %3451 = vmatmul.mubr.bf16.gmra.mrb[76].mxu1 %v5660_v9  ;;  %v5719_v8 = vld [vmem:[%s8800_s0 + $0x2d4] ss:$12 sps:$4 sm:$0xff]  }
  0xdc   :  { %2770 = vmatprep.mubr.bf16.mxu0 %v5661_v10  ;;  %3458 = vmatprep.mubr.bf16.mxu1 %v5663_v11  ;;  %v5721_v9 = vld [vmem:[%s8800_s0 + $0x68] ss:$12 sps:$4 sm:$0xff]  }
  0xe3   :  { %2771 = vmatmul.mubr.bf16.gmra.mrb[80].mxu0 %v5665_v12  ;;  %3459 = vmatmul.mubr.bf16.gmra.mrb[80].mxu1 %v5666_v13 }
  0xe4   :  { %2778 = vmatprep.mubr.bf16.mxu0 %v5667_v14  ;;  %3466 = vmatprep.mubr.bf16.mxu1 %v5669_v15  ;;  %v5722_v15 = vld [vmem:[%s8800_s0 + $0x2d0] ss:$12 sps:$4 sm:$0xff]  }
  0xeb   :  { %2779 = vmatmul.mubr.bf16.gmra.mrb[84].mxu0 %v5671_v16  ;;  %3467 = vmatmul.mubr.bf16.gmra.mrb[84].mxu1 %v5672_v17  ;;  %v5723_v17 = vld [vmem:[%s8800_s0 + $0x80] ss:$12 sps:$4 sm:$0xff]  }
  0xec   :  { %2786 = vmatprep.mubr.bf16.mxu0 %v5673_v18  ;;  %3474 = vmatprep.mubr.bf16.mxu1 %v5675_v19 }
  0xf3   :  { %2787 = vmatmul.mubr.bf16.gmra.mrb[88].mxu0 %v5677_v20  ;;  %3475 = vmatmul.mubr.bf16.gmra.mrb[88].mxu1 %v5678_v21  ;;  %v5724_v20 = vld [vmem:[%s8800_s0 + $0x2ec] ss:$12 sps:$4 sm:$0xff]  }
  0xf4   :  { %2794 = vmatprep.mubr.bf16.mxu0 %v5679_v22  ;;  %3482 = vmatprep.mubr.bf16.mxu1 %v5681_v23  ;;  %v5726_v21 = vld [vmem:[%s8800_s0 + $0x98] ss:$12 sps:$4 sm:$0xff]  }
  0xfb   :  { %2795 = vmatmul.mubr.bf16.gmra.mrb[92].mxu0 %v5683_v24  ;;  %3483 = vmatmul.mubr.bf16.gmra.mrb[92].mxu1 %v5684_v25 }
  0xfc   :  { %2802 = vmatprep.mubr.bf16.mxu0 %v5685_v26  ;;  %3490 = vmatprep.mubr.bf16.mxu1 %v5687_v27  ;;  %v5727_v27 = vld [vmem:[%s8800_s0 + $0x2e8] ss:$12 sps:$4 sm:$0xff]  }
 0x103   :  { %2803 = vmatmul.mubr.bf16.gmra.mrb[96].mxu0 %v5689_v28  ;;  %3491 = vmatmul.mubr.bf16.gmra.mrb[96].mxu1 %v5690_v29  ;;  %v5728_v29 = vld [vmem:[%s8800_s0 + $0xb0] ss:$12 sps:$4 sm:$0xff]  }
 0x104   :  { %2810 = vmatprep.mubr.bf16.mxu0 %v5691_v30  ;;  %3498 = vmatprep.mubr.bf16.mxu1 %v5693_v31 }
 0x10b   :  { %2811 = vmatmul.mubr.bf16.gmra.mrb[100].mxu0 %v5695_v32  ;;  %3499 = vmatmul.mubr.bf16.gmra.mrb[100].mxu1 %v5696_v33  ;;  %v5729_v32 = vld [vmem:[%s8800_s0 + $0x304] ss:$12 sps:$4 sm:$0xff]   ;;  %v5731_v33 = vld [vmem:[%s8800_s0 + $0xc8] ss:$12 sps:$4 sm:$0xff]  }
 0x10c   :  { %2818 = vmatprep.mubr.bf16.mxu0 %v5697_v34  ;;  %3506 = vmatprep.mubr.bf16.mxu1 %v5699_v35 }
 0x113   :  { %2819 = vmatmul.mubr.bf16.gmra.mrb[104].mxu0 %v5701_v36  ;;  %3507 = vmatmul.mubr.bf16.gmra.mrb[104].mxu1 %v5702_v37 }
 0x114   :  { %2826 = vmatprep.mubr.bf16.mxu0 %v5703_v38  ;;  %3514 = vmatprep.mubr.bf16.mxu1 %v5705_v39  ;;  %v5732_v39 = vld [vmem:[%s8800_s0 + $0x300] ss:$12 sps:$4 sm:$0xff]  }
 0x116   :  { %v6489_v40 = vpop.f32.mrb[0].mxu0  ;;  %v6491_v41 = vpop.f32.mrb[0].mxu1 }
 0x117   :  { %8802 = vst [vmem:[#allocation2_spill] sm:$0xff] %v6491_v41  ;;  %v2614_v42 = vpop.f32.mrb[1].mxu0  ;;  %v3302_v44 = vpop.f32.mrb[1].mxu1 }
 0x118   :  { %v6499_v46 = vpop.f32.mrb[2].mxu0  ;;  %v6501_v47 = vpop.f32.mrb[2].mxu1 }
 0x119   :  { %8803 = vst [vmem:[#allocation3_spill] sm:$0xff] %v6501_v47  ;;  %v2617_v50 = vpop.f32.mrb[3].mxu0  ;;  %v3305_v51 = vpop.f32.mrb[3].mxu1 }
 0x11b   :  { %2827 = vmatmul.mubr.bf16.gmra.mrb[108].mxu0 %v5707_v43  ;;  %3515 = vmatmul.mubr.bf16.gmra.mrb[108].mxu1 %v5708_v45  ;;  %v5733_v43 = vld [vmem:[%s8800_s0 + $0xe0] ss:$12 sps:$4 sm:$0xff]  }
 0x11c   :  { %2834 = vmatprep.mubr.bf16.mxu0 %v5709_v48  ;;  %5280 = vmatprep.mubr.msk.bf16.mxu1 %vm2235_vm0, %v5711_v49  ;;  %v5734_v48 = vld [vmem:[%s8800_s0 + $0x31c] ss:$12 sps:$4 sm:$0xff]   ;;  %v5736_v49 = vld [vmem:[%s8800_s0 + $0xf8] ss:$12 sps:$4 sm:$0xff]  }
 0x11e   :  { %v6510_v52 = vpop.f32.mrb[4].mxu0  ;;  %v6512_v53 = vpop.f32.mrb[4].mxu1 }
 0x11f   :  { %8804 = vst [vmem:[#allocation4_spill] sm:$0xff] %v6512_v53  ;;  %v2622_v54 = vpop.f32.mrb[5].mxu0  ;;  %v3310_v56 = vpop.f32.mrb[5].mxu1  ;;  %v5842_v53 = vld [vmem:[%s8800_s0 + $0x510] ss:$12 sps:$4 sm:$0xff]  }
 0x120   :  { %v6520_v58 = vpop.f32.mrb[6].mxu0  ;;  %v6522_v59 = vpop.f32.mrb[6].mxu1 }
 0x121   :  { %8805 = vst [vmem:[#allocation5_spill] sm:$0xff] %v6522_v59  ;;  %v2625_v62 = vpop.f32.mrb[7].mxu0  ;;  %v3313_v63 = vpop.f32.mrb[7].mxu1  ;;  %v5837_v59 = vld [vmem:[%s8800_s0 + $0x4f8] ss:$12 sps:$4 sm:$0xff]  }
 0x123   :  { %2835 = vmatmul.mubr.bf16.gmra.mrb[112].mxu0 %v5712_v55  ;;  %5281 = vmatmul.mubr.msk.bf16.vlgmr.msra.gmra.mrb[112].mxu1 %vm2235_vm0, %v5713_v57  ;;  %v5737_v57 = vld [vmem:[%s8800_s0 + $0x318] ss:$12 sps:$4 sm:$0xff]  }
 0x124   :  { %2842 = vmatprep.mubr.bf16.mxu0 %v5714_v60  ;;  %5284 = vmatprep.mubr.msk.bf16.mxu1 %vm2235_vm0, %v5716_v61  ;;  %v5738_v61 = vld [vmem:[%s8800_s0 + $0x110] ss:$12 sps:$4 sm:$0xff]  }
 0x126   :  { %v6532_v0 = vpop.f32.mrb[8].mxu0  ;;  %v6534_v1 = vpop.f32.mrb[8].mxu1 }
 0x127   :  { %8806 = vst [vmem:[#allocation6_spill] sm:$0xff] %v6534_v1  ;;  %v2630_v2 = vpop.f32.mrb[9].mxu0  ;;  %v3318_v4 = vpop.f32.mrb[9].mxu1 }
 0x128   :  { %v6542_v6 = vpop.f32.mrb[10].mxu0  ;;  %v6544_v7 = vpop.f32.mrb[10].mxu1  ;;  %v5739_v2 = vld [vmem:[%s8800_s0 + $0x334] ss:$12 sps:$4 sm:$0xff]  }
 0x129   :  { %8807 = vst [vmem:[#allocation7_spill] sm:$0xff] %v6544_v7  ;;  %v2633_v10 = vpop.f32.mrb[11].mxu0  ;;  %v3321_v11 = vpop.f32.mrb[11].mxu1 }
 0x12a   :  { %v5742_v11 = vld [vmem:[%s8800_s0 + $0x330] ss:$12 sps:$4 sm:$0xff]  }
 0x12b   :  { %2843 = vmatmul.mubr.bf16.gmra.mrb[116].mxu0 %v5717_v3  ;;  %5285 = vmatmul.mubr.msk.bf16.gmra.mrb[116].mxu1 %vm2235_vm0, %v5718_v5  ;;  %v5741_v3 = vld [vmem:[%s8800_s0 + $0x128] ss:$12 sps:$4 sm:$0xff]  }
 0x12c   :  { %2850 = vmatprep.mubr.bf16.mxu0 %v5719_v8  ;;  %5288 = vmatprep.mubr.msk.bf16.mxu1 %vm2235_vm0, %v5721_v9 }
 0x12e   :  { %v6554_v12 = vpop.f32.mrb[12].mxu0  ;;  %v6556_v13 = vpop.f32.mrb[12].mxu1 }
 0x12f   :  { %8808 = vst [vmem:[#allocation8_spill] sm:$0xff] %v6556_v13  ;;  %v2638_v14 = vpop.f32.mrb[13].mxu0  ;;  %v3326_v16 = vpop.f32.mrb[13].mxu1  ;;  %v5832_v13 = vld [vmem:[%s8800_s0 + $0x4e0] ss:$12 sps:$4 sm:$0xff]  }
 0x130   :  { %v6564_v18 = vpop.f32.mrb[14].mxu0  ;;  %v6566_v19 = vpop.f32.mrb[14].mxu1 }
 0x131   :  { %8809 = vst [vmem:[#allocation9_spill] sm:$0xff] %v6566_v19  ;;  %v2641_v22 = vpop.f32.mrb[15].mxu0  ;;  %v3329_v23 = vpop.f32.mrb[15].mxu1  ;;  %v5827_v19 = vld [vmem:[%s8800_s0 + $0x4c8] ss:$12 sps:$4 sm:$0xff]  }
 0x133   :  { %2851 = vmatmul.mubr.bf16.gmra.mrb[120].mxu0 %v5722_v15  ;;  %5289 = vmatmul.mubr.msk.bf16.gmra.mrb[120].mxu1 %vm2235_vm0, %v5723_v17  ;;  %v5743_v15 = vld [vmem:[%s8800_s0 + $0x140] ss:$12 sps:$4 sm:$0xff]  }
 0x134   :  { %2858 = vmatprep.mubr.bf16.mxu0 %v5724_v20  ;;  %5292 = vmatprep.mubr.msk.bf16.mxu1 %vm2235_vm0, %v5726_v21  ;;  %v5744_v20 = vld [vmem:[%s8800_s0 + $0x34c] ss:$12 sps:$4 sm:$0xff]  }
 0x135   :  { %v5746_v21 = vld [vmem:[%s8800_s0 + $0x158] ss:$12 sps:$4 sm:$0xff]  }
 0x136   :  { %v6576_v24 = vpop.f32.mrb[16].mxu0  ;;  %v6578_v25 = vpop.f32.mrb[16].mxu1 }
 0x137   :  { %8810 = vst [vmem:[#allocation10_spill] sm:$0xff] %v6578_v25  ;;  %v2646_v26 = vpop.f32.mrb[17].mxu0  ;;  %v3334_v28 = vpop.f32.mrb[17].mxu1 }
 0x138   :  { %v6586_v30 = vpop.f32.mrb[18].mxu0  ;;  %v6588_v31 = vpop.f32.mrb[18].mxu1 }
 0x139   :  { %8811 = vst [vmem:[#allocation11_spill] sm:$0xff] %v6588_v31  ;;  %v2649_v34 = vpop.f32.mrb[19].mxu0  ;;  %v3337_v35 = vpop.f32.mrb[19].mxu1 }
 0x13b   :  { %2859 = vmatmul.mubr.bf16.gmra.mrb[124].mxu0 %v5727_v27  ;;  %5293 = vmatmul.mubr.msk.bf16.gmra.mrb[124].mxu1 %vm2235_vm0, %v5728_v29  ;;  %v5747_v29 = vld [vmem:[%s8800_s0 + $0x348] ss:$12 sps:$4 sm:$0xff]  }
 0x13c   :  { %2866 = vmatprep.mubr.bf16.mxu0 %v5729_v32  ;;  %5296 = vmatprep.mubr.msk.bf16.mxu1 %vm2235_vm0, %v5731_v33  ;;  %v5748_v33 = vld [vmem:[%s8800_s0 + $0x170] ss:$12 sps:$4 sm:$0xff]  }
 0x13e   :  { %v6598_v36 = vpop.f32.mrb[20].mxu0  ;;  %v6600_v37 = vpop.f32.mrb[20].mxu1 }
 0x13f   :  { %8812 = vst [vmem:[#allocation12_spill] sm:$0xff] %v6600_v37  ;;  %v2654_v38 = vpop.f32.mrb[21].mxu0  ;;  %v3342_v42 = vpop.f32.mrb[21].mxu1  ;;  %v5822_v37 = vld [vmem:[%s8800_s0 + $0x4b0] ss:$12 sps:$4 sm:$0xff]  }
 0x140   :  { %v6608_v44 = vpop.f32.mrb[22].mxu0  ;;  %v6610_v45 = vpop.f32.mrb[22].mxu1  ;;  %v5749_v38 = vld [vmem:[%s8800_s0 + $0x364] ss:$12 sps:$4 sm:$0xff]  }
 0x141   :  { %8813 = vst [vmem:[#allocation13_spill] sm:$0xff] %v6610_v45  ;;  %v2657_v50 = vpop.f32.mrb[23].mxu0  ;;  %v3345_v51 = vpop.f32.mrb[23].mxu1  ;;  %v5817_v45 = vld [vmem:[%s8800_s0 + $0x498] ss:$12 sps:$4 sm:$0xff]  }
 0x142   :  { %v5752_v51 = vld [vmem:[%s8800_s0 + $0x360] ss:$12 sps:$4 sm:$0xff]  }
 0x143   :  { %2867 = vmatmul.mubr.bf16.gmra.mrb[128].mxu0 %v5732_v39  ;;  %5297 = vmatmul.mubr.msk.bf16.gmra.mrb[128].mxu1 %vm2235_vm0, %v5733_v43  ;;  %v5751_v39 = vld [vmem:[%s8800_s0 + $0x188] ss:$12 sps:$4 sm:$0xff]  }
 0x144   :  { %2874 = vmatprep.mubr.bf16.mxu0 %v5734_v48  ;;  %5300 = vmatprep.mubr.msk.bf16.mxu1 %vm2235_vm0, %v5736_v49 }
 0x146   :  { %v6620_v54 = vpop.f32.mrb[24].mxu0  ;;  %v6622_v55 = vpop.f32.mrb[24].mxu1 }
 0x147   :  { %8814 = vst [vmem:[#allocation14_spill] sm:$0xff] %v6622_v55  ;;  %v2662_v56 = vpop.f32.mrb[25].mxu0  ;;  %v3350_v60 = vpop.f32.mrb[25].mxu1 }
 0x148   :  { %v6630_v62 = vpop.f32.mrb[26].mxu0  ;;  %v6632_v63 = vpop.f32.mrb[26].mxu1 }
 0x149   :  { %8815 = vst [vmem:[#allocation15_spill] sm:$0xff] %v6632_v63  ;;  %v2665_v4 = vpop.f32.mrb[27].mxu0  ;;  %v3353_v5 = vpop.f32.mrb[27].mxu1 }
 0x14b   :  { %2875 = vmatmul.mubr.bf16.gmra.mrb[132].mxu0 %v5737_v57  ;;  %5301 = vmatmul.mubr.msk.bf16.gmra.mrb[132].mxu1 %vm2235_vm0, %v5738_v61  ;;  %v5753_v57 = vld [vmem:[%s8800_s0 + $0x1a0] ss:$12 sps:$4 sm:$0xff]  }
 0x14c   :  { %2882 = vmatprep.mubr.bf16.mxu0 %v5739_v2  ;;  %5304 = vmatprep.mubr.msk.bf16.mxu1 %vm2235_vm0, %v5741_v3  ;;  %v5754_v2 = vld [vmem:[%s8800_s0 + $0x37c] ss:$12 sps:$4 sm:$0xff]   ;;  %v5756_v3 = vld [vmem:[%s8800_s0 + $0x1b8] ss:$12 sps:$4 sm:$0xff]  }
 0x14e   :  { %v6642_v8 = vpop.f32.mrb[28].mxu0  ;;  %v6644_v9 = vpop.f32.mrb[28].mxu1 }
 0x14f   :  { %8816 = vst [vmem:[#allocation16_spill] sm:$0xff] %v6644_v9  ;;  %v2670_v10 = vpop.f32.mrb[29].mxu0  ;;  %v3358_v14 = vpop.f32.mrb[29].mxu1  ;;  %v5812_v9 = vld [vmem:[%s8800_s0 + $0x480] ss:$12 sps:$4 sm:$0xff]  }
 0x150   :  { %v6652_v16 = vpop.f32.mrb[30].mxu0  ;;  %v6654_v17 = vpop.f32.mrb[30].mxu1 }
 0x151   :  { %8817 = vst [vmem:[#allocation17_spill] sm:$0xff] %v6654_v17  ;;  %v2673_v22 = vpop.f32.mrb[31].mxu0  ;;  %v3361_v23 = vpop.f32.mrb[31].mxu1  ;;  %v5807_v17 = vld [vmem:[%s8800_s0 + $0x468] ss:$12 sps:$4 sm:$0xff]  }
 0x153   :  { %2883 = vmatmul.mubr.bf16.gmra.mrb[136].mxu0 %v5742_v11  ;;  %5305 = vmatmul.mubr.msk.bf16.gmra.mrb[136].mxu1 %vm2235_vm0, %v5743_v15  ;;  %v5757_v15 = vld [vmem:[%s8800_s0 + $0x378] ss:$12 sps:$4 sm:$0xff]  }
 0x154   :  { %2890 = vmatprep.mubr.bf16.mxu0 %v5744_v20  ;;  %5308 = vmatprep.mubr.msk.bf16.mxu1 %vm2235_vm0, %v5746_v21  ;;  %v5758_v21 = vld [vmem:[%s8800_s0 + $0x1d0] ss:$12 sps:$4 sm:$0xff]  }
 0x156   :  { %v6664_v26 = vpop.f32.mrb[32].mxu0  ;;  %v6666_v27 = vpop.f32.mrb[32].mxu1 }
 0x157   :  { %8818 = vst [vmem:[#allocation18_spill] sm:$0xff] %v6666_v27  ;;  %v2678_v28 = vpop.f32.mrb[33].mxu0  ;;  %v3366_v32 = vpop.f32.mrb[33].mxu1 }
 0x158   :  { %v6674_v34 = vpop.f32.mrb[34].mxu0  ;;  %v6676_v35 = vpop.f32.mrb[34].mxu1  ;;  %v5759_v28 = vld [vmem:[%s8800_s0 + $0x394] ss:$12 sps:$4 sm:$0xff]  }
 0x159   :  { %8819 = vst [vmem:[#allocation19_spill] sm:$0xff] %v6676_v35  ;;  %v2681_v42 = vpop.f32.mrb[35].mxu0  ;;  %v3369_v43 = vpop.f32.mrb[35].mxu1 }
 0x15a   :  { %v5762_v43 = vld [vmem:[%s8800_s0 + $0x390] ss:$12 sps:$4 sm:$0xff]  }
 0x15b   :  { %2891 = vmatmul.mubr.bf16.gmra.mrb[140].mxu0 %v5747_v29  ;;  %5309 = vmatmul.mubr.msk.bf16.gmra.mrb[140].mxu1 %vm2235_vm0, %v5748_v33  ;;  %v5761_v29 = vld [vmem:[%s8800_s0 + $0x1e8] ss:$12 sps:$4 sm:$0xff]  }
 0x15c   :  { %2898 = vmatprep.mubr.bf16.mxu0 %v5749_v38  ;;  %5312 = vmatprep.mubr.msk.bf16.mxu1 %vm2235_vm0, %v5751_v39 }
 0x15e   :  { %v6686_v48 = vpop.f32.mrb[36].mxu0  ;;  %v6688_v49 = vpop.f32.mrb[36].mxu1 }
 0x15f   :  { %8820 = vst [vmem:[#allocation20_spill] sm:$0xff] %v6688_v49  ;;  %v2686_v50 = vpop.f32.mrb[37].mxu0  ;;  %v3374_v56 = vpop.f32.mrb[37].mxu1  ;;  %v5802_v49 = vld [vmem:[%s8800_s0 + $0x450] ss:$12 sps:$4 sm:$0xff]  }
 0x160   :  { %v6696_v60 = vpop.f32.mrb[38].mxu0  ;;  %v6698_v61 = vpop.f32.mrb[38].mxu1 }
 0x161   :  { %8821 = vst [vmem:[#allocation21_spill] sm:$0xff] %v6698_v61  ;;  %v2689_v4 = vpop.f32.mrb[39].mxu0  ;;  %v3377_v5 = vpop.f32.mrb[39].mxu1  ;;  %v5797_v61 = vld [vmem:[%s8800_s0 + $0x438] ss:$12 sps:$4 sm:$0xff]  }
 0x163   :  { %2899 = vmatmul.mubr.bf16.gmra.mrb[144].mxu0 %v5752_v51  ;;  %5313 = vmatmul.mubr.msk.bf16.gmra.mrb[144].mxu1 %vm2235_vm0, %v5753_v57  ;;  %v5763_v51 = vld [vmem:[%s8800_s0 + $0x200] ss:$12 sps:$4 sm:$0xff]  }
 0x164   :  { %2906 = vmatprep.mubr.bf16.mxu0 %v5754_v2  ;;  %5316 = vmatprep.mubr.msk.bf16.mxu1 %vm2235_vm0, %v5756_v3  ;;  %v5764_v2 = vld [vmem:[%s8800_s0 + $0x3ac] ss:$12 sps:$4 sm:$0xff]  }
 0x165   :  { %v5766_v3 = vld [vmem:[%s8800_s0 + $0x218] ss:$12 sps:$4 sm:$0xff]  }
 0x166   :  { %v6708_v10 = vpop.f32.mrb[40].mxu0  ;;  %v6710_v11 = vpop.f32.mrb[40].mxu1 }
 0x167   :  { %8822 = vst [vmem:[#allocation22_spill] sm:$0xff] %v6710_v11  ;;  %v2694_v14 = vpop.f32.mrb[41].mxu0  ;;  %v3382_v20 = vpop.f32.mrb[41].mxu1 }
 0x168   :  { %v6718_v22 = vpop.f32.mrb[42].mxu0  ;;  %v6720_v23 = vpop.f32.mrb[42].mxu1 }
 0x169   :  { %8823 = vst [vmem:[#allocation23_spill] sm:$0xff] %v6720_v23  ;;  %v2697_v32 = vpop.f32.mrb[43].mxu0  ;;  %v3385_v33 = vpop.f32.mrb[43].mxu1 }
 0x16b   :  { %2907 = vmatmul.mubr.bf16.gmra.mrb[148].mxu0 %v5757_v15  ;;  %5317 = vmatmul.mubr.msk.bf16.gmra.mrb[148].mxu1 %vm2235_vm0, %v5758_v21  ;;  %v5767_v21 = vld [vmem:[%s8800_s0 + $0x3a8] ss:$12 sps:$4 sm:$0xff]  }
 0x16c   :  { %2914 = vmatprep.mubr.bf16.mxu0 %v5759_v28  ;;  %5320 = vmatprep.mubr.msk.bf16.mxu1 %vm2235_vm0, %v5761_v29  ;;  %v5768_v29 = vld [vmem:[%s8800_s0 + $0x230] ss:$12 sps:$4 sm:$0xff]  }
 0x16e   :  { %v6730_v38 = vpop.f32.mrb[44].mxu0  ;;  %v6732_v39 = vpop.f32.mrb[44].mxu1 }
 0x16f   :  { %8824 = vst [vmem:[#allocation24_spill] sm:$0xff] %v6732_v39  ;;  %v2702_v42 = vpop.f32.mrb[45].mxu0  ;;  %v3390_v50 = vpop.f32.mrb[45].mxu1  ;;  %v5792_v39 = vld [vmem:[%s8800_s0 + $0x420] ss:$12 sps:$4 sm:$0xff]  }
 0x170   :  { %v6740_v56 = vpop.f32.mrb[46].mxu0  ;;  %v6742_v57 = vpop.f32.mrb[46].mxu1  ;;  %v5769_v42 = vld [vmem:[%s8800_s0 + $0x3c4] ss:$12 sps:$4 sm:$0xff]  }
 0x171   :  { %8825 = vst [vmem:[#allocation25_spill] sm:$0xff] %v6742_v57  ;;  %v2705_v4 = vpop.f32.mrb[47].mxu0  ;;  %v3393_v5 = vpop.f32.mrb[47].mxu1  ;;  %v5787_v57 = vld [vmem:[%s8800_s0 + $0x408] ss:$12 sps:$4 sm:$0xff]  }
 0x172   :  { %v5772_v5 = vld [vmem:[%s8800_s0 + $0x3c0] ss:$12 sps:$4 sm:$0xff]  }
 0x173   :  { %2915 = vmatmul.mubr.bf16.gmra.mrb[152].mxu0 %v5762_v43  ;;  %5321 = vmatmul.mubr.msk.bf16.gmra.mrb[152].mxu1 %vm2235_vm0, %v5763_v51  ;;  %v5771_v43 = vld [vmem:[%s8800_s0 + $0x248] ss:$12 sps:$4 sm:$0xff]  }
 0x174   :  { %2922 = vmatprep.mubr.bf16.mxu0 %v5764_v2  ;;  %5324 = vmatprep.mubr.msk.bf16.mxu1 %vm2235_vm0, %v5766_v3 }
 0x176   :  { %v6752_v14 = vpop.f32.mrb[48].mxu0  ;;  %v6754_v15 = vpop.f32.mrb[48].mxu1 }
 0x177   :  { %8826 = vst [vmem:[#allocation26_spill] sm:$0xff] %v6754_v15  ;;  %v2710_v20 = vpop.f32.mrb[49].mxu0  ;;  %v3398_v28 = vpop.f32.mrb[49].mxu1 }
 0x178   :  { %v6762_v32 = vpop.f32.mrb[50].mxu0  ;;  %v6764_v33 = vpop.f32.mrb[50].mxu1  ;;  %v5773_v28 = vld [vmem:[%s8800_s0 + $0x260] ss:$12 sps:$4 sm:$0xff]  }
 0x179   :  { %8827 = vst [vmem:[#allocation27_spill] sm:$0xff] %v6764_v33  ;;  %v2713_v50 = vpop.f32.mrb[51].mxu0  ;;  %v3401_v51 = vpop.f32.mrb[51].mxu1 }
 0x17b   :  { %2923 = vmatmul.mubr.bf16.gmra.mrb[156].mxu0 %v5767_v21  ;;  %5325 = vmatmul.mubr.msk.bf16.gmra.mrb[156].mxu1 %vm2235_vm0, %v5768_v29 }
 0x17c   :  { %2930 = vmatprep.mubr.bf16.mxu0 %v5769_v42  ;;  %5328 = vmatprep.mubr.msk.bf16.mxu1 %vm2235_vm0, %v5771_v43  ;;  %v5774_v42 = vld [vmem:[%s8800_s0 + $0x3dc] ss:$12 sps:$4 sm:$0xff]   ;;  %v5776_v43 = vld [vmem:[%s8800_s0 + $0x278] ss:$12 sps:$4 sm:$0xff]  }
 0x17e   :  { %v6774_v2 = vpop.f32.mrb[52].mxu0  ;;  %v6776_v3 = vpop.f32.mrb[52].mxu1 }
 0x17f   :  { %8828 = vst [vmem:[#allocation28_spill] sm:$0xff] %v6776_v3  ;;  %v2718_v4 = vpop.f32.mrb[53].mxu0  ;;  %v3406_v20 = vpop.f32.mrb[53].mxu1  ;;  %v5782_v3 = vld [vmem:[%s8800_s0 + $0x3f0] ss:$12 sps:$4 sm:$0xff]  }
 0x180   :  { %v6784_v21 = vpop.f32.mrb[54].mxu0  ;;  %v6786_v29 = vpop.f32.mrb[54].mxu1 }
 0x181   :  { %8829 = vst [vmem:[#allocation29_spill] sm:$0xff] %v6786_v29  ;;  %v2721_v50 = vpop.f32.mrb[55].mxu0  ;;  %v3409_v51 = vpop.f32.mrb[55].mxu1  ;;  %v5777_v29 = vld [vmem:[%s8800_s0 + $0x3d8] ss:$12 sps:$4 sm:$0xff]  }
 0x182   :  { %v5778_v50 = vld [vmem:[%s8800_s0 + $0x290] ss:$12 sps:$4 sm:$0xff]  }
 0x183   :  { %2931 = vmatmul.mubr.bf16.gmra.mrb[160].mxu0 %v5772_v5  ;;  %5329 = vmatmul.mubr.msk.bf16.gmra.mrb[160].mxu1 %vm2235_vm0, %v5773_v28 }
 0x184   :  { %2938 = vmatprep.mubr.bf16.mxu0 %v5774_v42  ;;  %5332 = vmatprep.mubr.msk.bf16.mxu1 %vm2235_vm0, %v5776_v43  ;;  %v5779_v42 = vld [vmem:[%s8800_s0 + $0x3f4] ss:$12 sps:$4 sm:$0xff]  }
 0x186   :  { %v6796_v4 = vpop.f32.mrb[56].mxu0  ;;  %v6798_v20 = vpop.f32.mrb[56].mxu1 }
 0x187   :  { %8830 = vst [vmem:[#allocation30_spill] sm:$0xff] %v6798_v20  ;;  %v2726_v33 = vpop.f32.mrb[57].mxu0  ;;  %v3414_v15 = vpop.f32.mrb[57].mxu1 }
 0x188   :  { %v6806_v5 = vpop.f32.mrb[58].mxu0  ;;  %v6808_v28 = vpop.f32.mrb[58].mxu1  ;;  %v5781_v33 = vld [vmem:[%s8800_s0 + $0x2a8] ss:$12 sps:$4 sm:$0xff]  }
 0x189   :  { %8831 = vst [vmem:[#allocation31_spill] sm:$0xff] %v6808_v28  ;;  %v2729_v43 = vpop.f32.mrb[59].mxu0  ;;  %v3417_v51 = vpop.f32.mrb[59].mxu1 }
 0x18a   :  { %v5783_v43 = vld [vmem:[%s8800_s0 + $0x2c0] ss:$12 sps:$4 sm:$0xff]  }
 0x18b   :  { %2939 = vmatmul.mubr.bf16.gmra.mrb[164].mxu0 %v5777_v29  ;;  %5333 = vmatmul.mubr.msk.bf16.gmra.mrb[164].mxu1 %vm2235_vm0, %v5778_v50 }
 0x18c   :  { %2946 = vmatprep.mubr.bf16.mxu0 %v5779_v42  ;;  %5336 = vmatprep.mubr.msk.bf16.mxu1 %vm2235_vm0, %v5781_v33  ;;  %v5784_v42 = vld [vmem:[%s8800_s0 + $0x40c] ss:$12 sps:$4 sm:$0xff]  }
 0x18e   :  { %v6818_v15 = vpop.f32.mrb[60].mxu0  ;;  %v6820_v20 = vpop.f32.mrb[60].mxu1 }
 0x18f   :  { %8832 = vst [vmem:[#allocation32_spill] sm:$0xff] %v6820_v20  ;;  %v2734_v28 = vpop.f32.mrb[61].mxu0  ;;  %v3422_v23 = vpop.f32.mrb[61].mxu1 }
 0x190   :  { %v6828_v29 = vpop.f32.mrb[62].mxu0  ;;  %v6830_v50 = vpop.f32.mrb[62].mxu1  ;;  %v5786_v28 = vld [vmem:[%s8800_s0 + $0x2d8] ss:$12 sps:$4 sm:$0xff]  }
 0x191   :  { %8833 = vst [vmem:[#allocation33_spill] sm:$0xff] %v6830_v50  ;;  %v2737_v33 = vpop.f32.mrb[63].mxu0  ;;  %v3425_v51 = vpop.f32.mrb[63].mxu1 }
 0x192   :  { %v5788_v33 = vld [vmem:[%s8800_s0 + $0x2f0] ss:$12 sps:$4 sm:$0xff]  }
 0x193   :  { %2947 = vmatmul.mubr.bf16.gmra.mrb[168].mxu0 %v5782_v3  ;;  %5337 = vmatmul.mubr.msk.bf16.gmra.mrb[168].mxu1 %vm2235_vm0, %v5783_v43 }
 0x194   :  { %2954 = vmatprep.mubr.bf16.mxu0 %v5784_v42  ;;  %5340 = vmatprep.mubr.msk.bf16.mxu1 %vm2235_vm0, %v5786_v28  ;;  %v5789_v42 = vld [vmem:[%s8800_s0 + $0x424] ss:$12 sps:$4 sm:$0xff]  }
 0x196   :  { %v6840_v23 = vpop.f32.mrb[64].mxu0  ;;  %v6842_v20 = vpop.f32.mrb[64].mxu1 }
 0x197   :  { %8834 = vst [vmem:[#allocation34_spill] sm:$0xff] %v6842_v20  ;;  %v2742_v50 = vpop.f32.mrb[65].mxu0  ;;  %v3430_v11 = vpop.f32.mrb[65].mxu1 }
 0x198   :  { %v6850_v3 = vpop.f32.mrb[66].mxu0  ;;  %v6852_v43 = vpop.f32.mrb[66].mxu1  ;;  %v5791_v50 = vld [vmem:[%s8800_s0 + $0x308] ss:$12 sps:$4 sm:$0xff]  }
 0x199   :  { %8835 = vst [vmem:[#allocation35_spill] sm:$0xff] %v6852_v43  ;;  %v2745_v28 = vpop.f32.mrb[67].mxu0  ;;  %v3433_v51 = vpop.f32.mrb[67].mxu1 }
 0x19a   :  { %v5793_v28 = vld [vmem:[%s8800_s0 + $0x320] ss:$12 sps:$4 sm:$0xff]  }
 0x19b   :  { %2955 = vmatmul.mubr.bf16.gmra.mrb[172].mxu0 %v5787_v57  ;;  %5341 = vmatmul.mubr.msk.bf16.gmra.mrb[172].mxu1 %vm2235_vm0, %v5788_v33 }
 0x19c   :  { %2962 = vmatprep.mubr.bf16.mxu0 %v5789_v42  ;;  %5344 = vmatprep.mubr.msk.bf16.mxu1 %vm2235_vm0, %v5791_v50  ;;  %v5794_v42 = vld [vmem:[%s8800_s0 + $0x43c] ss:$12 sps:$4 sm:$0xff]  }
 0x19e   :  { %v6862_v11 = vpop.f32.mrb[68].mxu0  ;;  %v6864_v20 = vpop.f32.mrb[68].mxu1 }
 0x19f   :  { %8836 = vst [vmem:[#allocation36_spill] sm:$0xff] %v6864_v20  ;;  %v2750_v43 = vpop.f32.mrb[69].mxu0  ;;  %v3438_v35 = vpop.f32.mrb[69].mxu1 }
 0x1a0   :  { %v6872_v57 = vpop.f32.mrb[70].mxu0  ;;  %v6874_v33 = vpop.f32.mrb[70].mxu1  ;;  %v5796_v43 = vld [vmem:[%s8800_s0 + $0x338] ss:$12 sps:$4 sm:$0xff]  }
 0x1a1   :  { %8837 = vst [vmem:[#allocation37_spill] sm:$0xff] %v6874_v33  ;;  %v2753_v50 = vpop.f32.mrb[71].mxu0  ;;  %v3441_v51 = vpop.f32.mrb[71].mxu1 }
 0x1a2   :  { %v5798_v50 = vld [vmem:[%s8800_s0 + $0x350] ss:$12 sps:$4 sm:$0xff]  }
 0x1a3   :  { %2963 = vmatmul.mubr.bf16.gmra.mrb[176].mxu0 %v5792_v39  ;;  %5345 = vmatmul.mubr.msk.bf16.gmra.mrb[176].mxu1 %vm2235_vm0, %v5793_v28 }
 0x1a4   :  { %2970 = vmatprep.mubr.bf16.mxu0 %v5794_v42  ;;  %5348 = vmatprep.mubr.msk.bf16.mxu1 %vm2235_vm0, %v5796_v43  ;;  %v5799_v42 = vld [vmem:[%s8800_s0 + $0x454] ss:$12 sps:$4 sm:$0xff]  }
 0x1a6   :  { %v6884_v35 = vpop.f32.mrb[72].mxu0  ;;  %v6886_v20 = vpop.f32.mrb[72].mxu1 }
 0x1a7   :  { %8838 = vst [vmem:[#allocation38_spill] sm:$0xff] %v6886_v20  ;;  %v2758_v33 = vpop.f32.mrb[73].mxu0  ;;  %v3446_v27 = vpop.f32.mrb[73].mxu1 }
 0x1a8   :  { %v6894_v39 = vpop.f32.mrb[74].mxu0  ;;  %v6896_v28 = vpop.f32.mrb[74].mxu1  ;;  %v5801_v33 = vld [vmem:[%s8800_s0 + $0x368] ss:$12 sps:$4 sm:$0xff]  }
 0x1a9   :  { %8839 = vst [vmem:[#allocation39_spill] sm:$0xff] %v6896_v28  ;;  %v2761_v43 = vpop.f32.mrb[75].mxu0  ;;  %v3449_v51 = vpop.f32.mrb[75].mxu1 }
 0x1aa   :  { %v5803_v43 = vld [vmem:[%s8800_s0 + $0x380] ss:$12 sps:$4 sm:$0xff]  }
 0x1ab   :  { %2971 = vmatmul.mubr.bf16.gmra.mrb[180].mxu0 %v5797_v61  ;;  %5349 = vmatmul.mubr.msk.bf16.gmra.mrb[180].mxu1 %vm2235_vm0, %v5798_v50 }
 0x1ac   :  { %2978 = vmatprep.mubr.bf16.mxu0 %v5799_v42  ;;  %5352 = vmatprep.mubr.msk.bf16.mxu1 %vm2235_vm0, %v5801_v33  ;;  %v5804_v42 = vld [vmem:[%s8800_s0 + $0x46c] ss:$12 sps:$4 sm:$0xff]  }
 0x1ae   :  { %v6906_v27 = vpop.f32.mrb[76].mxu0  ;;  %v6908_v20 = vpop.f32.mrb[76].mxu1 }
 0x1af   :  { %8840 = vst [vmem:[#allocation40_spill] sm:$0xff] %v6908_v20  ;;  %v2766_v28 = vpop.f32.mrb[77].mxu0  ;;  %v3454_v63 = vpop.f32.mrb[77].mxu1 }
 0x1b0   :  { %v6916_v61 = vpop.f32.mrb[78].mxu0  ;;  %v6918_v50 = vpop.f32.mrb[78].mxu1  ;;  %v5806_v28 = vld [vmem:[%s8800_s0 + $0x398] ss:$12 sps:$4 sm:$0xff]  }
 0x1b1   :  { %8841 = vst [vmem:[#allocation41_spill] sm:$0xff] %v6918_v50  ;;  %v2769_v33 = vpop.f32.mrb[79].mxu0  ;;  %v3457_v51 = vpop.f32.mrb[79].mxu1 }
 0x1b2   :  { %v5808_v33 = vld [vmem:[%s8800_s0 + $0x3b0] ss:$12 sps:$4 sm:$0xff]  }
 0x1b3   :  { %2979 = vmatmul.mubr.bf16.gmra.mrb[184].mxu0 %v5802_v49  ;;  %5353 = vmatmul.mubr.msk.bf16.gmra.mrb[184].mxu1 %vm2235_vm0, %v5803_v43 }
 0x1b4   :  { %2986 = vmatprep.mubr.bf16.mxu0 %v5804_v42  ;;  %5356 = vmatprep.mubr.msk.bf16.mxu1 %vm2235_vm0, %v5806_v28  ;;  %v5809_v42 = vld [vmem:[%s8800_s0 + $0x484] ss:$12 sps:$4 sm:$0xff]  }
 0x1b6   :  { %v6928_v63 = vpop.f32.mrb[80].mxu0  ;;  %v6930_v20 = vpop.f32.mrb[80].mxu1 }
 0x1b7   :  { %8842 = vst [vmem:[#allocation42_spill] sm:$0xff] %v6930_v20  ;;  %v2774_v50 = vpop.f32.mrb[81].mxu0  ;;  %v3462_v55 = vpop.f32.mrb[81].mxu1 }
 0x1b8   :  { %v6938_v49 = vpop.f32.mrb[82].mxu0  ;;  %v6940_v43 = vpop.f32.mrb[82].mxu1  ;;  %v5811_v50 = vld [vmem:[%s8800_s0 + $0x3c8] ss:$12 sps:$4 sm:$0xff]  }
 0x1b9   :  { %8843 = vst [vmem:[#allocation43_spill] sm:$0xff] %v6940_v43  ;;  %v2777_v28 = vpop.f32.mrb[83].mxu0  ;;  %v3465_v51 = vpop.f32.mrb[83].mxu1 }
 0x1ba   :  { %v5813_v28 = vld [vmem:[%s8800_s0 + $0x3e0] ss:$12 sps:$4 sm:$0xff]  }
 0x1bb   :  { %2987 = vmatmul.mubr.bf16.gmra.mrb[188].mxu0 %v5807_v17  ;;  %5357 = vmatmul.mubr.msk.bf16.gmra.mrb[188].mxu1 %vm2235_vm0, %v5808_v33 }
 0x1bc   :  { %2994 = vmatprep.mubr.bf16.mxu0 %v5809_v42  ;;  %5360 = vmatprep.mubr.msk.bf16.mxu1 %vm2235_vm0, %v5811_v50  ;;  %v5814_v42 = vld [vmem:[%s8800_s0 + $0x49c] ss:$12 sps:$4 sm:$0xff]  }
 0x1be   :  { %v6950_v55 = vpop.f32.mrb[84].mxu0  ;;  %v6952_v20 = vpop.f32.mrb[84].mxu1 }
 0x1bf   :  { %8844 = vst [vmem:[#allocation44_spill] sm:$0xff] %v6952_v20  ;;  %v2782_v43 = vpop.f32.mrb[85].mxu0  ;;  %v3470_v31 = vpop.f32.mrb[85].mxu1 }
 0x1c0   :  { %v6960_v17 = vpop.f32.mrb[86].mxu0  ;;  %v6962_v33 = vpop.f32.mrb[86].mxu1  ;;  %v5816_v43 = vld [vmem:[%s8800_s0 + $0x3f8] ss:$12 sps:$4 sm:$0xff]  }
 0x1c1   :  { %8845 = vst [vmem:[#allocation45_spill] sm:$0xff] %v6962_v33  ;;  %v2785_v50 = vpop.f32.mrb[87].mxu0  ;;  %v3473_v51 = vpop.f32.mrb[87].mxu1 }
 0x1c2   :  { %v5818_v50 = vld [vmem:[%s8800_s0 + $0x410] ss:$12 sps:$4 sm:$0xff]  }
 0x1c3   :  { %2995 = vmatmul.mubr.bf16.gmra.mrb[192].mxu0 %v5812_v9  ;;  %5361 = vmatmul.mubr.msk.bf16.gmra.mrb[192].mxu1 %vm2235_vm0, %v5813_v28 }
 0x1c4   :  { %3002 = vmatprep.mubr.bf16.mxu0 %v5814_v42  ;;  %5364 = vmatprep.mubr.msk.bf16.mxu1 %vm2235_vm0, %v5816_v43  ;;  %v5819_v42 = vld [vmem:[%s8800_s0 + $0x4b4] ss:$12 sps:$4 sm:$0xff]  }
 0x1c6   :  { %v6972_v31 = vpop.f32.mrb[88].mxu0  ;;  %v6974_v20 = vpop.f32.mrb[88].mxu1 }
 0x1c7   :  { %8846 = vst [vmem:[#allocation46_spill] sm:$0xff] %v6974_v20  ;;  %v2790_v33 = vpop.f32.mrb[89].mxu0  ;;  %v3478_v25 = vpop.f32.mrb[89].mxu1 }
 0x1c8   :  { %v6982_v9 = vpop.f32.mrb[90].mxu0  ;;  %v6984_v28 = vpop.f32.mrb[90].mxu1  ;;  %v5821_v33 = vld [vmem:[%s8800_s0 + $0x428] ss:$12 sps:$4 sm:$0xff]  }
 0x1c9   :  { %8847 = vst [vmem:[#allocation47_spill] sm:$0xff] %v6984_v28  ;;  %v2793_v43 = vpop.f32.mrb[91].mxu0  ;;  %v3481_v51 = vpop.f32.mrb[91].mxu1 }
 0x1ca   :  { %v5823_v43 = vld [vmem:[%s8800_s0 + $0x440] ss:$12 sps:$4 sm:$0xff]  }
 0x1cb   :  { %3003 = vmatmul.mubr.bf16.gmra.mrb[196].mxu0 %v5817_v45  ;;  %5365 = vmatmul.mubr.msk.bf16.gmra.mrb[196].mxu1 %vm2235_vm0, %v5818_v50 }
 0x1cc   :  { %3010 = vmatprep.mubr.bf16.mxu0 %v5819_v42  ;;  %5368 = vmatprep.mubr.msk.bf16.mxu1 %vm2235_vm0, %v5821_v33  ;;  %v5824_v42 = vld [vmem:[%s8800_s0 + $0x4cc] ss:$12 sps:$4 sm:$0xff]  }
 0x1ce   :  { %v6994_v25 = vpop.f32.mrb[92].mxu0  ;;  %v6996_v20 = vpop.f32.mrb[92].mxu1 }
 0x1cf   :  { %8848 = vst [vmem:[#allocation48_spill] sm:$0xff] %v6996_v20  ;;  %v2798_v28 = vpop.f32.mrb[93].mxu0  ;;  %v3486_v7 = vpop.f32.mrb[93].mxu1 }
 0x1d0   :  { %v7004_v45 = vpop.f32.mrb[94].mxu0  ;;  %v7006_v50 = vpop.f32.mrb[94].mxu1  ;;  %v5826_v28 = vld [vmem:[%s8800_s0 + $0x458] ss:$12 sps:$4 sm:$0xff]  }
 0x1d1   :  { %8849 = vst [vmem:[#allocation49_spill] sm:$0xff] %v7006_v50  ;;  %v2801_v33 = vpop.f32.mrb[95].mxu0  ;;  %v3489_v51 = vpop.f32.mrb[95].mxu1 }
 0x1d2   :  { %v5828_v33 = vld [vmem:[%s8800_s0 + $0x470] ss:$12 sps:$4 sm:$0xff]  }
 0x1d3   :  { %3011 = vmatmul.mubr.bf16.gmra.mrb[200].mxu0 %v5822_v37  ;;  %5369 = vmatmul.mubr.msk.bf16.gmra.mrb[200].mxu1 %vm2235_vm0, %v5823_v43 }
 0x1d4   :  { %3018 = vmatprep.mubr.bf16.mxu0 %v5824_v42  ;;  %5372 = vmatprep.mubr.msk.bf16.mxu1 %vm2235_vm0, %v5826_v28  ;;  %v5829_v42 = vld [vmem:[%s8800_s0 + $0x4e4] ss:$12 sps:$4 sm:$0xff]  }
 0x1d6   :  { %v7016_v7 = vpop.f32.mrb[96].mxu0  ;;  %v7018_v20 = vpop.f32.mrb[96].mxu1 }
 0x1d7   :  { %8850 = vst [vmem:[#allocation50_spill] sm:$0xff] %v7018_v20  ;;  %v2806_v50 = vpop.f32.mrb[97].mxu0  ;;  %v3494_v1 = vpop.f32.mrb[97].mxu1 }
 0x1d8   :  { %v7026_v37 = vpop.f32.mrb[98].mxu0  ;;  %v7028_v43 = vpop.f32.mrb[98].mxu1  ;;  %v5831_v50 = vld [vmem:[%s8800_s0 + $0x488] ss:$12 sps:$4 sm:$0xff]  }
 0x1d9   :  { %8851 = vst [vmem:[#allocation51_spill] sm:$0xff] %v7028_v43  ;;  %v2809_v28 = vpop.f32.mrb[99].mxu0  ;;  %v3497_v51 = vpop.f32.mrb[99].mxu1 }
 0x1da   :  { %v5833_v28 = vld [vmem:[%s8800_s0 + $0x4a0] ss:$12 sps:$4 sm:$0xff]  }
 0x1db   :  { %3019 = vmatmul.mubr.bf16.gmra.mrb[204].mxu0 %v5827_v19  ;;  %5373 = vmatmul.mubr.msk.bf16.gmra.mrb[204].mxu1 %vm2235_vm0, %v5828_v33 }
 0x1dc   :  { %3026 = vmatprep.mubr.bf16.mxu0 %v5829_v42  ;;  %5376 = vmatprep.mubr.msk.bf16.mxu1 %vm2235_vm0, %v5831_v50  ;;  %v5834_v42 = vld [vmem:[%s8800_s0 + $0x4fc] ss:$12 sps:$4 sm:$0xff]  }
 0x1de   :  { %v7038_v1 = vpop.f32.mrb[100].mxu0  ;;  %v7040_v20 = vpop.f32.mrb[100].mxu1 }
 0x1df   :  { %8852 = vst [vmem:[#allocation52_spill] sm:$0xff] %v7040_v20  ;;  %v2814_v43 = vpop.f32.mrb[101].mxu0  ;;  %v3502_v47 = vpop.f32.mrb[101].mxu1 }
 0x1e0   :  { %v7048_v19 = vpop.f32.mrb[102].mxu0  ;;  %v7050_v33 = vpop.f32.mrb[102].mxu1  ;;  %v5836_v43 = vld [vmem:[%s8800_s0 + $0x4b8] ss:$12 sps:$4 sm:$0xff]  }
 0x1e1   :  { %8853 = vst [vmem:[#allocation53_spill] sm:$0xff] %v7050_v33  ;;  %v2817_v50 = vpop.f32.mrb[103].mxu0  ;;  %v3505_v51 = vpop.f32.mrb[103].mxu1 }
 0x1e2   :  { %v5838_v50 = vld [vmem:[%s8800_s0 + $0x4d0] ss:$12 sps:$4 sm:$0xff]  }
 0x1e3   :  { %3027 = vmatmul.mubr.bf16.gmra.mrb[208].mxu0 %v5832_v13  ;;  %5377 = vmatmul.mubr.msk.bf16.gmra.mrb[208].mxu1 %vm2235_vm0, %v5833_v28 }
 0x1e4   :  { %3034 = vmatprep.mubr.bf16.mxu0 %v5834_v42  ;;  %5380 = vmatprep.mubr.msk.bf16.mxu1 %vm2235_vm0, %v5836_v43  ;;  %v5839_v42 = vld [vmem:[%s8800_s0 + $0x514] ss:$12 sps:$4 sm:$0xff]  }
 0x1e6   :  { %v7060_v47 = vpop.f32.mrb[104].mxu0  ;;  %v7062_v20 = vpop.f32.mrb[104].mxu1 }
 0x1e7   :  { %8854 = vst [vmem:[#allocation54_spill] sm:$0xff] %v7060_v47  ;;  %8855 = vst [vmem:[#allocation55_spill] sm:$0xff] %v7062_v20  ;;  %v2822_v33 = vpop.f32.mrb[105].mxu0  ;;  %v3510_v41 = vpop.f32.mrb[105].mxu1 }
 0x1e8   :  { %v7070_v13 = vpop.f32.mrb[106].mxu0  ;;  %v7072_v28 = vpop.f32.mrb[106].mxu1  ;;  %v5841_v33 = vld [vmem:[%s8800_s0 + $0x4e8] ss:$12 sps:$4 sm:$0xff]  }
 0x1e9   :  { %8856 = vst [vmem:[#allocation56_spill] sm:$0xff] %v7070_v13  ;;  %8857 = vst [vmem:[#allocation57_spill] sm:$0xff] %v7072_v28  ;;  %v2825_v43 = vpop.f32.mrb[107].mxu0  ;;  %v3513_v51 = vpop.f32.mrb[107].mxu1 }
 0x1ea   :  { %v5843_v43 = vld [vmem:[%s8800_s0 + $0x500] ss:$12 sps:$4 sm:$0xff]  }
 0x1eb   :  { %3035 = vmatmul.mubr.bf16.gmra.mrb[212].mxu0 %v5837_v59  ;;  %5381 = vmatmul.mubr.msk.bf16.gmra.mrb[212].mxu1 %vm2235_vm0, %v5838_v50 }
 0x1ec   :  { %3042 = vmatprep.mubr.bf16.mxu0 %v5839_v42  ;;  %5384 = vmatprep.mubr.msk.bf16.mxu1 %vm2235_vm0, %v5841_v33  ;;  %v5844_v42 = vld [vmem:[%s8800_s0 + $0x52c] ss:$12 sps:$4 sm:$0xff]  }
 0x1ee   :  { %v7082_v41 = vpop.f32.mrb[108].mxu0  ;;  %v7084_v20 = vpop.f32.mrb[108].mxu1 }
 0x1ef   :  { %8858 = vst [vmem:[#allocation58_spill] sm:$0xff] %v7082_v41  ;;  %8859 = vst [vmem:[#allocation59_spill] sm:$0xff] %v7084_v20  ;;  %v2830_v28 = vpop.f32.mrb[109].mxu0  ;;  %v3518_v13 = vpop.f32.mrb[109].mxu1  ;;  %v5847_v41 = vld [vmem:[%s8800_s0 + $0x528] ss:$12 sps:$4 sm:$0xff]  }
 0x1f0   :  { %v7092_v59 = vpop.f32.mrb[110].mxu0  ;;  %v7094_v50 = vpop.f32.mrb[110].mxu1  ;;  %v5846_v28 = vld [vmem:[%s8800_s0 + $0x518] ss:$12 sps:$4 sm:$0xff]  }
 0x1f1   :  { %8860 = vst [vmem:[#allocation60_spill] sm:$0xff] %v7092_v59  ;;  %8861 = vst [vmem:[#allocation61_spill] sm:$0xff] %v7094_v50  ;;  %v2833_v33 = vpop.f32.mrb[111].mxu0  ;;  %v3521_v51 = vpop.f32.mrb[111].mxu1 }
 0x1f2   :  { %v5849_v33 = vld [vmem:[%s8800_s0 + $0x544] ss:$12 sps:$4 sm:$0xff]  }
 0x1f3   :  { %3043 = vmatmul.mubr.bf16.gmra.mrb[216].mxu0 %v5842_v53  ;;  %5385 = vmatmul.mubr.msk.bf16.gmra.mrb[216].mxu1 %vm2235_vm0, %v5843_v43  ;;  %v5848_v53 = vld [vmem:[%s8800_s0 + $0x530] ss:$12 sps:$4 sm:$0xff]  }
 0x1f4   :  { %3050 = vmatprep.mubr.bf16.mxu0 %v5844_v42  ;;  %5388 = vmatprep.mubr.msk.bf16.mxu1 %vm2235_vm0, %v5846_v28 }
 0x1f6   :  { %v7104_v13 = vpop.f32.mrb[112].mxu0  ;;  %v5282_v20 = vpop.f32.mrb[112].mxu1 }
 0x1f7   :  { %v3566_v50 = vadd.f32 %v5282_v20, %v6510_v52  ;;  %v2838_v59 = vpop.f32.mrb[113].mxu0  ;;  %v3557_v47 = vpop.f32.mrb[113].mxu1  ;;  %v5851_v52 = vld [vmem:[%s8800_s0 + $0x548] ss:$12 sps:$4 sm:$0xff]  }
 0x1f8   :  { %v3558_v43 = vadd.f32 %v3557_v47, %v6489_v40  ;;  %v7114_v42 = vpop.f32.mrb[114].mxu0  ;;  %v5283_v28 = vpop.f32.mrb[114].mxu1 }
 0x1f9   :  { %4471 = vst.msk [vmem:[%s8801_s2 + $0x10] sm:$0xff] %vm4468_vm1, %v3566_v50  ;;  %v3569_v20 = vadd.f32 %v5283_v28, %v6520_v58  ;;  %v2841_v59 = vpop.f32.mrb[115].mxu0  ;;  %v3560_v40 = vpop.f32.mrb[115].mxu1 }
 0x1fa   :  { %4469 = vst.msk [vmem:[%s8801_s2] sm:$0xff] %vm4468_vm1, %v3558_v43  ;;  %v3561_v47 = vadd.f32 %v3560_v40, %v6499_v46 }
 0x1fb   :  { %4472 = vst.msk [vmem:[%s8801_s2 + $0x18] sm:$0xff] %vm4468_vm1, %v3569_v20  ;;  %3051 = vmatmul.mubr.bf16.gmra.mrb[220].mxu0 %v5847_v41  ;;  %5389 = vmatmul.mubr.msk.bf16.gmra.mrb[220].mxu1 %vm2235_vm0, %v5848_v53  ;;  %v5852_v41 = vld [vmem:[%s8800_s0 + $0x540] ss:$12 sps:$4 sm:$0xff]   ;;  %v5854_v20 = vld [vmem:[%s8800_s0 + $0x55c] ss:$12 sps:$4 sm:$0xff]  }
 0x1fc   :  { %4470 = vst.msk [vmem:[%s8801_s2 + $0x8] sm:$0xff] %vm4468_vm1, %v3561_v47  ;;  %3058 = vmatprep.mubr.bf16.mxu0 %v5849_v33  ;;  %5392 = vmatprep.mubr.msk.bf16.mxu1 %vm2235_vm0, %v5851_v52  ;;  %v5853_v53 = vld [vmem:[%s8800_s0 + $0x560] ss:$12 sps:$4 sm:$0xff]  }
 0x1fe   :  { %v7142_v58 = vpop.f32.mrb[116].mxu0  ;;  %v5286_v50 = vpop.f32.mrb[116].mxu1 }
 0x1ff   :  { %v3582_v46 = vadd.f32 %v5286_v50, %v6554_v12  ;;  %v2846_v51 = vpop.f32.mrb[117].mxu0  ;;  %v3573_v43 = vpop.f32.mrb[117].mxu1  ;;  %v5856_v12 = vld [vmem:[%s8800_s0 + $0x578] ss:$12 sps:$4 sm:$0xff]  }
 0x200   :  { %v3574_v28 = vadd.f32 %v3573_v43, %v6532_v0  ;;  %v7152_v33 = vpop.f32.mrb[118].mxu0  ;;  %v5287_v52 = vpop.f32.mrb[118].mxu1  ;;  %v5857_v43 = vld [vmem:[%s8800_s0 + $0x558] ss:$12 sps:$4 sm:$0xff]  }
 0x201   :  { %4475 = vst.msk [vmem:[%s8801_s2 + $0x30] sm:$0xff] %vm4468_vm1, %v3582_v46  ;;  %v3585_v59 = vadd.f32 %v5287_v52, %v6564_v18  ;;  %v2849_v40 = vpop.f32.mrb[119].mxu0  ;;  %v3576_v0 = vpop.f32.mrb[119].mxu1 }
 0x202   :  { %4473 = vst.msk [vmem:[%s8801_s2 + $0x20] sm:$0xff] %vm4468_vm1, %v3574_v28  ;;  %v3577_v47 = vadd.f32 %v3576_v0, %v6542_v6 }
 0x203   :  { %4476 = vst.msk [vmem:[%s8801_s2 + $0x38] sm:$0xff] %vm4468_vm1, %v3585_v59  ;;  %3059 = vmatmul.mubr.bf16.gmra.mrb[224].mxu0 %v5852_v41  ;;  %5393 = vmatmul.mubr.msk.bf16.gmra.mrb[224].mxu1 %vm2235_vm0, %v5853_v53  ;;  %v5858_v41 = vld [vmem:[%s8800_s0 + $0x590] ss:$12 sps:$4 sm:$0xff]  }
 0x204   :  { %4474 = vst.msk [vmem:[%s8801_s2 + $0x28] sm:$0xff] %vm4468_vm1, %v3577_v47  ;;  %3066 = vmatprep.mubr.bf16.mxu0 %v5854_v20  ;;  %5396 = vmatprep.mubr.msk.bf16.mxu1 %vm2235_vm0, %v5856_v12  ;;  %v5859_v20 = vld [vmem:[%s8800_s0 + $0x574] ss:$12 sps:$4 sm:$0xff]  }
 0x206   :  { %v7180_v18 = vpop.f32.mrb[120].mxu0  ;;  %v5290_v50 = vpop.f32.mrb[120].mxu1 }
 0x207   :  { %v3598_v6 = vadd.f32 %v5290_v50, %v6598_v36  ;;  %v2854_v46 = vpop.f32.mrb[121].mxu0  ;;  %v3589_v51 = vpop.f32.mrb[121].mxu1  ;;  %v5861_v36 = vld [vmem:[%s8800_s0 + $0x5a8] ss:$12 sps:$4 sm:$0xff]  }
 0x208   :  { %v3590_v53 = vadd.f32 %v3589_v51, %v6576_v24  ;;  %v7190_v28 = vpop.f32.mrb[122].mxu0  ;;  %v5291_v52 = vpop.f32.mrb[122].mxu1  ;;  %v5863_v46 = vld [vmem:[%s8800_s0 + $0x5c0] ss:$12 sps:$4 sm:$0xff]  }
 0x209   :  { %4479 = vst.msk [vmem:[%s8801_s2 + $0x50] sm:$0xff] %vm4468_vm1, %v3598_v6  ;;  %v3601_v12 = vadd.f32 %v5291_v52, %v6608_v44  ;;  %v2857_v59 = vpop.f32.mrb[123].mxu0  ;;  %v3592_v24 = vpop.f32.mrb[123].mxu1  ;;  %v5862_v6 = vld [vmem:[%s8800_s0 + $0x570] ss:$12 sps:$4 sm:$0xff]  }
 0x20a   :  { %4477 = vst.msk [vmem:[%s8801_s2 + $0x40] sm:$0xff] %vm4468_vm1, %v3590_v53  ;;  %v3593_v40 = vadd.f32 %v3592_v24, %v6586_v30  ;;  %v5864_v53 = vld [vmem:[%s8800_s0 + $0x58c] ss:$12 sps:$4 sm:$0xff]  }
 0x20b   :  { %4480 = vst.msk [vmem:[%s8801_s2 + $0x58] sm:$0xff] %vm4468_vm1, %v3601_v12  ;;  %3067 = vmatmul.mubr.bf16.gmra.mrb[228].mxu0 %v5857_v43  ;;  %5397 = vmatmul.mubr.msk.bf16.gmra.mrb[228].mxu1 %vm2235_vm0, %v5858_v41 }
 0x20c   :  { %4478 = vst.msk [vmem:[%s8801_s2 + $0x48] sm:$0xff] %vm4468_vm1, %v3593_v40  ;;  %3074 = vmatprep.mubr.bf16.mxu0 %v5859_v20  ;;  %5400 = vmatprep.mubr.msk.bf16.mxu1 %vm2235_vm0, %v5861_v36  ;;  %v5867_v40 = vld [vmem:[%s8800_s0 + $0x588] ss:$12 sps:$4 sm:$0xff]  }
 0x20e   :  { %v7218_v44 = vpop.f32.mrb[124].mxu0  ;;  %v5294_v0 = vpop.f32.mrb[124].mxu1 }
 0x20f   :  { %v3614_v30 = vadd.f32 %v5294_v0, %v6642_v8  ;;  %v2862_v47 = vpop.f32.mrb[125].mxu0  ;;  %v3605_v50 = vpop.f32.mrb[125].mxu1  ;;  %v5866_v8 = vld [vmem:[%s8800_s0 + $0x5d8] ss:$12 sps:$4 sm:$0xff]   ;;  %v5868_v0 = vld [vmem:[%s8800_s0 + $0x5f0] ss:$12 sps:$4 sm:$0xff]  }
 0x210   :  { %v3606_v51 = vadd.f32 %v3605_v50, %v6620_v54  ;;  %v7228_v43 = vpop.f32.mrb[126].mxu0  ;;  %v5295_v41 = vpop.f32.mrb[126].mxu1 }
 0x211   :  { %4483 = vst.msk [vmem:[%s8801_s2 + $0x70] sm:$0xff] %vm4468_vm1, %v3614_v30  ;;  %v3617_v52 = vadd.f32 %v5295_v41, %v6652_v16  ;;  %v2865_v20 = vpop.f32.mrb[127].mxu0  ;;  %v3608_v54 = vpop.f32.mrb[127].mxu1 }
 0x212   :  { %4481 = vst.msk [vmem:[%s8801_s2 + $0x60] sm:$0xff] %vm4468_vm1, %v3606_v51  ;;  %v3609_v36 = vadd.f32 %v3608_v54, %v6630_v62  ;;  %v5872_v20 = vld [vmem:[%s8800_s0 + $0x5a0] ss:$12 sps:$4 sm:$0xff]  }
 0x213   :  { %4484 = vst.msk [vmem:[%s8801_s2 + $0x78] sm:$0xff] %vm4468_vm1, %v3617_v52  ;;  %3075 = vmatmul.mubr.bf16.gmra.mrb[232].mxu0 %v5862_v6  ;;  %5401 = vmatmul.mubr.msk.bf16.gmra.mrb[232].mxu1 %vm2235_vm0, %v5863_v46  ;;  %v5869_v6 = vld [vmem:[%s8800_s0 + $0x5a4] ss:$12 sps:$4 sm:$0xff]   ;;  %v5873_v54 = vld [vmem:[%s8800_s0 + $0x620] ss:$12 sps:$4 sm:$0xff]  }
 0x214   :  { %4482 = vst.msk [vmem:[%s8801_s2 + $0x68] sm:$0xff] %vm4468_vm1, %v3609_v36  ;;  %3082 = vmatprep.mubr.bf16.mxu0 %v5864_v53  ;;  %5404 = vmatprep.mubr.msk.bf16.mxu1 %vm2235_vm0, %v5866_v8 }
 0x216   :  { %v7256_v16 = vpop.f32.mrb[128].mxu0  ;;  %v5298_v12 = vpop.f32.mrb[128].mxu1 }
 0x217   :  { %v3630_v62 = vadd.f32 %v5298_v12, %v6686_v48  ;;  %v2870_v59 = vpop.f32.mrb[129].mxu0  ;;  %v3621_v24 = vpop.f32.mrb[129].mxu1  ;;  %v5871_v48 = vld [vmem:[%s8800_s0 + $0x608] ss:$12 sps:$4 sm:$0xff]  }
 0x218   :  { %v3622_v30 = vadd.f32 %v3621_v24, %v6664_v26  ;;  %v7266_v47 = vpop.f32.mrb[130].mxu0  ;;  %v5299_v50 = vpop.f32.mrb[130].mxu1  ;;  %v5874_v59 = vld [vmem:[%s8800_s0 + $0x5bc] ss:$12 sps:$4 sm:$0xff]  }
 0x219   :  { %4487 = vst.msk [vmem:[%s8801_s2 + $0x90] sm:$0xff] %vm4468_vm1, %v3630_v62  ;;  %v3633_v46 = vadd.f32 %v5299_v50, %v6696_v60  ;;  %v2873_v51 = vpop.f32.mrb[131].mxu0  ;;  %v3624_v26 = vpop.f32.mrb[131].mxu1 }
 0x21a   :  { %4485 = vst.msk [vmem:[%s8801_s2 + $0x80] sm:$0xff] %vm4468_vm1, %v3622_v30  ;;  %v3625_v41 = vadd.f32 %v3624_v26, %v6674_v34 }
 0x21b   :  { %4488 = vst.msk [vmem:[%s8801_s2 + $0x98] sm:$0xff] %vm4468_vm1, %v3633_v46  ;;  %3083 = vmatmul.mubr.bf16.gmra.mrb[236].mxu0 %v5867_v40  ;;  %5405 = vmatmul.mubr.msk.bf16.gmra.mrb[236].mxu1 %vm2235_vm0, %v5868_v0  ;;  %v5878_v46 = vld [vmem:[%s8800_s0 + $0x650] ss:$12 sps:$4 sm:$0xff]  }
 0x21c   :  { %4486 = vst.msk [vmem:[%s8801_s2 + $0x88] sm:$0xff] %vm4468_vm1, %v3625_v41  ;;  %3090 = vmatprep.mubr.bf16.mxu0 %v5869_v6  ;;  %5408 = vmatprep.mubr.msk.bf16.mxu1 %vm2235_vm0, %v5871_v48  ;;  %v5877_v48 = vld [vmem:[%s8800_s0 + $0x5b8] ss:$12 sps:$4 sm:$0xff]  }
 0x21e   :  { %v7294_v60 = vpop.f32.mrb[132].mxu0  ;;  %v5302_v53 = vpop.f32.mrb[132].mxu1 }
 0x21f   :  { %v3646_v34 = vadd.f32 %v5302_v53, %v6730_v38  ;;  %v2878_v8 = vpop.f32.mrb[133].mxu0  ;;  %v3637_v52 = vpop.f32.mrb[133].mxu1  ;;  %v5876_v38 = vld [vmem:[%s8800_s0 + $0x638] ss:$12 sps:$4 sm:$0xff]   ;;  %v5879_v53 = vld [vmem:[%s8800_s0 + $0x5d4] ss:$12 sps:$4 sm:$0xff]  }
 0x220   :  { %v3638_v36 = vadd.f32 %v3637_v52, %v6708_v10  ;;  %v7304_v12 = vpop.f32.mrb[134].mxu0  ;;  %v5303_v62 = vpop.f32.mrb[134].mxu1 }
 0x221   :  { %4491 = vst.msk [vmem:[%s8801_s2 + $0xb0] sm:$0xff] %vm4468_vm1, %v3646_v34  ;;  %v3649_v24 = vadd.f32 %v5303_v62, %v6740_v56  ;;  %v2881_v40 = vpop.f32.mrb[135].mxu0  ;;  %v3640_v10 = vpop.f32.mrb[135].mxu1  ;;  %v5882_v62 = vld [vmem:[%s8800_s0 + $0x5d0] ss:$12 sps:$4 sm:$0xff]  }
 0x222   :  { %4489 = vst.msk [vmem:[%s8801_s2 + $0xa0] sm:$0xff] %vm4468_vm1, %v3638_v36  ;;  %v3641_v0 = vadd.f32 %v3640_v10, %v6718_v22  ;;  %v5884_v10 = vld [vmem:[%s8800_s0 + $0x5ec] ss:$12 sps:$4 sm:$0xff]  }
 0x223   :  { %4492 = vst.msk [vmem:[%s8801_s2 + $0xb8] sm:$0xff] %vm4468_vm1, %v3649_v24  ;;  %3091 = vmatmul.mubr.bf16.gmra.mrb[240].mxu0 %v5872_v20  ;;  %5409 = vmatmul.mubr.msk.bf16.gmra.mrb[240].mxu1 %vm2235_vm0, %v5873_v54 }
 0x224   :  { %4490 = vst.msk [vmem:[%s8801_s2 + $0xa8] sm:$0xff] %vm4468_vm1, %v3641_v0  ;;  %3098 = vmatprep.mubr.bf16.mxu0 %v5874_v59  ;;  %5412 = vmatprep.mubr.msk.bf16.mxu1 %vm2235_vm0, %v5876_v38  ;;  %v5883_v59 = vld [vmem:[%s8800_s0 + $0x680] ss:$12 sps:$4 sm:$0xff]  }
 0x226   :  { %v7332_v56 = vpop.f32.mrb[136].mxu0  ;;  %v5306_v30 = vpop.f32.mrb[136].mxu1 }
 0x227   :  { %v3662_v22 = vadd.f32 %v5306_v30, %v6774_v2  ;;  %v2886_v50 = vpop.f32.mrb[137].mxu0  ;;  %v3653_v6 = vpop.f32.mrb[137].mxu1  ;;  %v5881_v2 = vld [vmem:[%s8800_s0 + $0x668] ss:$12 sps:$4 sm:$0xff]  }
 0x228   :  { %v3654_v51 = vadd.f32 %v3653_v6, %v6752_v14  ;;  %v7342_v26 = vpop.f32.mrb[138].mxu0  ;;  %v5307_v41 = vpop.f32.mrb[138].mxu1 }
 0x229   :  { %4495 = vst.msk [vmem:[%s8801_s2 + $0xd0] sm:$0xff] %vm4468_vm1, %v3662_v22  ;;  %v3665_v34 = vadd.f32 %v5307_v41, %v6784_v21  ;;  %v2889_v8 = vpop.f32.mrb[139].mxu0  ;;  %v3656_v14 = vpop.f32.mrb[139].mxu1 }
 0x22a   :  { %4493 = vst.msk [vmem:[%s8801_s2 + $0xc0] sm:$0xff] %vm4468_vm1, %v3654_v51  ;;  %v3657_v52 = vadd.f32 %v3656_v14, %v6762_v32  ;;  %v5888_v51 = vld [vmem:[%s8800_s0 + $0x6b0] ss:$12 sps:$4 sm:$0xff]  }
 0x22b   :  { %4496 = vst.msk [vmem:[%s8801_s2 + $0xd8] sm:$0xff] %vm4468_vm1, %v3665_v34  ;;  %3099 = vmatmul.mubr.bf16.gmra.mrb[244].mxu0 %v5877_v48  ;;  %5413 = vmatmul.mubr.msk.bf16.gmra.mrb[244].mxu1 %vm2235_vm0, %v5878_v46  ;;  %v5887_v46 = vld [vmem:[%s8800_s0 + $0x5e8] ss:$12 sps:$4 sm:$0xff]   ;;  %v5891_v34 = vld [vmem:[%s8800_s0 + $0x604] ss:$12 sps:$4 sm:$0xff]  }
 0x22c   :  { %4494 = vst.msk [vmem:[%s8801_s2 + $0xc8] sm:$0xff] %vm4468_vm1, %v3657_v52  ;;  %3106 = vmatprep.mubr.bf16.mxu0 %v5879_v53  ;;  %5416 = vmatprep.mubr.msk.bf16.mxu1 %vm2235_vm0, %v5881_v2 }
 0x22e   :  { %v7370_v21 = vpop.f32.mrb[140].mxu0  ;;  %v5310_v20 = vpop.f32.mrb[140].mxu1 }
 0x22f   :  { %v3678_v32 = vadd.f32 %v5310_v20, %v6818_v15  ;;  %v2894_v54 = vpop.f32.mrb[141].mxu0  ;;  %v3669_v36 = vpop.f32.mrb[141].mxu1  ;;  %v5886_v15 = vld [vmem:[%s8800_s0 + $0x698] ss:$12 sps:$4 sm:$0xff]  }
 0x230   :  { %v3670_v38 = vadd.f32 %v3669_v36, %v6796_v4  ;;  %v7380_v24 = vpop.f32.mrb[142].mxu0  ;;  %v5311_v40 = vpop.f32.mrb[142].mxu1  ;;  %v5889_v36 = vld [vmem:[%s8800_s0 + $0x600] ss:$12 sps:$4 sm:$0xff]  }
 0x231   :  { %4499 = vst.msk [vmem:[%s8801_s2 + $0xf0] sm:$0xff] %vm4468_vm1, %v3678_v32  ;;  %v3681_v0 = vadd.f32 %v5311_v40, %v6828_v29  ;;  %v2897_v30 = vpop.f32.mrb[143].mxu0  ;;  %v3672_v4 = vpop.f32.mrb[143].mxu1 }
 0x232   :  { %4497 = vst.msk [vmem:[%s8801_s2 + $0xe0] sm:$0xff] %vm4468_vm1, %v3670_v38  ;;  %v3673_v22 = vadd.f32 %v3672_v4, %v6806_v5 }
 0x233   :  { %4500 = vst.msk [vmem:[%s8801_s2 + $0xf8] sm:$0xff] %vm4468_vm1, %v3681_v0  ;;  %3107 = vmatmul.mubr.bf16.gmra.mrb[248].mxu0 %v5882_v62  ;;  %5417 = vmatmul.mubr.msk.bf16.gmra.mrb[248].mxu1 %vm2235_vm0, %v5883_v59  ;;  %v5893_v62 = vld [vmem:[%s8800_s0 + $0x6e0] ss:$12 sps:$4 sm:$0xff]  }
 0x234   :  { %4498 = vst.msk [vmem:[%s8801_s2 + $0xe8] sm:$0xff] %vm4468_vm1, %v3673_v22  ;;  %3114 = vmatprep.mubr.bf16.mxu0 %v5884_v10  ;;  %5420 = vmatprep.mubr.msk.bf16.mxu1 %vm2235_vm0, %v5886_v15  ;;  %v5896_v10 = vld [vmem:[%s8800_s0 + $0x61c] ss:$12 sps:$4 sm:$0xff]  }
 0x236   :  { %v7408_v29 = vpop.f32.mrb[144].mxu0  ;;  %v5314_v50 = vpop.f32.mrb[144].mxu1 }
 0x237   :  { %v3694_v5 = vadd.f32 %v5314_v50, %v6862_v11  ;;  %v2902_v6 = vpop.f32.mrb[145].mxu0  ;;  %v3685_v48 = vpop.f32.mrb[145].mxu1  ;;  %v5892_v11 = vld [vmem:[%s8800_s0 + $0x6c8] ss:$12 sps:$4 sm:$0xff]  }
 0x238   :  { %v3686_v41 = vadd.f32 %v3685_v48, %v6840_v23  ;;  %v7418_v53 = vpop.f32.mrb[146].mxu0  ;;  %v5315_v2 = vpop.f32.mrb[146].mxu1  ;;  %v5898_v6 = vld [vmem:[%s8800_s0 + $0x710] ss:$12 sps:$4 sm:$0xff]  }
 0x239   :  { %4503 = vst.msk [vmem:[%s8801_s2 + $0x110] sm:$0xff] %vm4468_vm1, %v3694_v5  ;;  %v3697_v8 = vadd.f32 %v5315_v2, %v6872_v57  ;;  %v2905_v14 = vpop.f32.mrb[147].mxu0  ;;  %v3688_v23 = vpop.f32.mrb[147].mxu1  ;;  %v5894_v5 = vld [vmem:[%s8800_s0 + $0x618] ss:$12 sps:$4 sm:$0xff]  }
 0x23a   :  { %4501 = vst.msk [vmem:[%s8801_s2 + $0x100] sm:$0xff] %vm4468_vm1, %v3686_v41  ;;  %v3689_v52 = vadd.f32 %v3688_v23, %v6850_v3  ;;  %v5901_v41 = vld [vmem:[%s8800_s0 + $0x634] ss:$12 sps:$4 sm:$0xff]  }
 0x23b   :  { %4504 = vst.msk [vmem:[%s8801_s2 + $0x118] sm:$0xff] %vm4468_vm1, %v3697_v8  ;;  %3115 = vmatmul.mubr.bf16.gmra.mrb[252].mxu0 %v5887_v46  ;;  %5421 = vmatmul.mubr.msk.bf16.gmra.mrb[252].mxu1 %vm2235_vm0, %v5888_v51 }
 0x23c   :  { %4502 = vst.msk [vmem:[%s8801_s2 + $0x108] sm:$0xff] %vm4468_vm1, %v3689_v52  ;;  %3122 = vmatprep.mubr.bf16.mxu0 %v5891_v34  ;;  %5424 = vmatprep.mubr.msk.bf16.mxu1 %vm2235_vm0, %v5892_v11  ;;  %v5899_v52 = vld [vmem:[%s8800_s0 + $0x630] ss:$12 sps:$4 sm:$0xff]  }
 0x23e   :  { %v7446_v57 = vpop.f32.mrb[148].mxu0  ;;  %v5318_v20 = vpop.f32.mrb[148].mxu1 }
 0x23f   :  { %v3710_v3 = vadd.f32 %v5318_v20, %v6906_v27  ;;  %v2910_v32 = vpop.f32.mrb[149].mxu0  ;;  %v3701_v54 = vpop.f32.mrb[149].mxu1  ;;  %v5897_v27 = vld [vmem:[%s8800_s0 + $0x6f8] ss:$12 sps:$4 sm:$0xff]   ;;  %v5903_v20 = vld [vmem:[%s8800_s0 + $0x740] ss:$12 sps:$4 sm:$0xff]  }
 0x240   :  { %v3702_v59 = vadd.f32 %v3701_v54, %v6884_v35  ;;  %v7456_v38 = vpop.f32.mrb[150].mxu0  ;;  %v5319_v40 = vpop.f32.mrb[150].mxu1 }
 0x241   :  { %4507 = vst.msk [vmem:[%s8801_s2 + $0x130] sm:$0xff] %vm4468_vm1, %v3710_v3  ;;  %v3713_v15 = vadd.f32 %v5319_v40, %v6916_v61  ;;  %v2913_v0 = vpop.f32.mrb[151].mxu0  ;;  %v3704_v35 = vpop.f32.mrb[151].mxu1 }
 0x242   :  { %4505 = vst.msk [vmem:[%s8801_s2 + $0x120] sm:$0xff] %vm4468_vm1, %v3702_v59  ;;  %v3705_v30 = vadd.f32 %v3704_v35, %v6894_v39  ;;  %v5904_v0 = vld [vmem:[%s8800_s0 + $0x648] ss:$12 sps:$4 sm:$0xff]   ;;  %v5908_v35 = vld [vmem:[%s8800_s0 + $0x770] ss:$12 sps:$4 sm:$0xff]  }
 0x243   :  { %4508 = vst.msk [vmem:[%s8801_s2 + $0x138] sm:$0xff] %vm4468_vm1, %v3713_v15  ;;  %3123 = vmatmul.mubr.bf16.gmra.mrb[0].mxu0 %v5889_v36  ;;  %5425 = vmatmul.mubr.msk.bf16.gmra.mrb[0].mxu1 %vm2235_vm0, %v5893_v62  ;;  %v5906_v36 = vld [vmem:[%s8800_s0 + $0x64c] ss:$12 sps:$4 sm:$0xff]  }
 0x244   :  { %4506 = vst.msk [vmem:[%s8801_s2 + $0x128] sm:$0xff] %vm4468_vm1, %v3705_v30  ;;  %3130 = vmatprep.mubr.bf16.mxu0 %v5896_v10  ;;  %5428 = vmatprep.mubr.msk.bf16.mxu1 %vm2235_vm0, %v5897_v27 }
 0x246   :  { %v7484_v61 = vpop.f32.mrb[152].mxu0  ;;  %v5322_v4 = vpop.f32.mrb[152].mxu1 }
 0x247   :  { %v3726_v39 = vadd.f32 %v5322_v4, %v6950_v55  ;;  %v2918_v22 = vpop.f32.mrb[153].mxu0  ;;  %v3717_v50 = vpop.f32.mrb[153].mxu1  ;;  %v5902_v55 = vld [vmem:[%s8800_s0 + $0x728] ss:$12 sps:$4 sm:$0xff]  }
 0x248   :  { %v3718_v48 = vadd.f32 %v3717_v50, %v6928_v63  ;;  %v7494_v46 = vpop.f32.mrb[154].mxu0  ;;  %v5323_v51 = vpop.f32.mrb[154].mxu1  ;;  %v5911_v22 = vld [vmem:[%s8800_s0 + $0x664] ss:$12 sps:$4 sm:$0xff]  }
 0x249   :  { %4511 = vst.msk [vmem:[%s8801_s2 + $0x150] sm:$0xff] %vm4468_vm1, %v3726_v39  ;;  %v3729_v2 = vadd.f32 %v5323_v51, %v6960_v17  ;;  %v2921_v34 = vpop.f32.mrb[155].mxu0  ;;  %v3720_v63 = vpop.f32.mrb[155].mxu1 }
 0x24a   :  { %4509 = vst.msk [vmem:[%s8801_s2 + $0x140] sm:$0xff] %vm4468_vm1, %v3718_v48  ;;  %v3721_v11 = vadd.f32 %v3720_v63, %v6938_v49  ;;  %v5913_v34 = vld [vmem:[%s8800_s0 + $0x7a0] ss:$12 sps:$4 sm:$0xff]  }
 0x24b   :  { %4512 = vst.msk [vmem:[%s8801_s2 + $0x158] sm:$0xff] %vm4468_vm1, %v3729_v2  ;;  %3131 = vmatmul.mubr.bf16.gmra.mrb[4].mxu0 %v5894_v5  ;;  %5429 = vmatmul.mubr.msk.bf16.gmra.mrb[4].mxu1 %vm2235_vm0, %v5898_v6  ;;  %v5909_v2 = vld [vmem:[%s8800_s0 + $0x660] ss:$12 sps:$4 sm:$0xff]  }
 0x24c   :  { %4510 = vst.msk [vmem:[%s8801_s2 + $0x148] sm:$0xff] %vm4468_vm1, %v3721_v11  ;;  %3138 = vmatprep.mubr.bf16.mxu0 %v5901_v41  ;;  %5432 = vmatprep.mubr.msk.bf16.mxu1 %vm2235_vm0, %v5902_v55  ;;  %v8863_v63 = vld [vmem:[#allocation54_spill] sm:$0xff] }
 0x24e   :  { %v7522_v17 = vpop.f32.mrb[156].mxu0  ;;  %v5326_v8 = vpop.f32.mrb[156].mxu1 }
 0x24f   :  { %v3742_v49 = vadd.f32 %v5326_v8, %v6994_v25  ;;  %v2926_v14 = vpop.f32.mrb[157].mxu0  ;;  %v3733_v23 = vpop.f32.mrb[157].mxu1  ;;  %v5907_v25 = vld [vmem:[%s8800_s0 + $0x758] ss:$12 sps:$4 sm:$0xff]  }
 0x250   :  { %v3734_v3 = vadd.f32 %v3733_v23, %v6972_v31  ;;  %v7532_v32 = vpop.f32.mrb[158].mxu0  ;;  %v5327_v54 = vpop.f32.mrb[158].mxu1  ;;  %v5916_v14 = vld [vmem:[%s8800_s0 + $0x67c] ss:$12 sps:$4 sm:$0xff]   ;;  %v5917_v23 = vld [vmem:[%s8800_s0 + $0x7b8] ss:$12 sps:$4 sm:$0xff]  }
 0x251   :  { %4515 = vst.msk [vmem:[%s8801_s2 + $0x170] sm:$0xff] %vm4468_vm1, %v3742_v49  ;;  %v3745_v62 = vadd.f32 %v5327_v54, %v7004_v45  ;;  %v2929_v59 = vpop.f32.mrb[159].mxu0  ;;  %v3736_v31 = vpop.f32.mrb[159].mxu1 }
 0x252   :  { %4513 = vst.msk [vmem:[%s8801_s2 + $0x160] sm:$0xff] %vm4468_vm1, %v3734_v3  ;;  %v3737_v40 = vadd.f32 %v3736_v31, %v6982_v9 }
 0x253   :  { %4516 = vst.msk [vmem:[%s8801_s2 + $0x178] sm:$0xff] %vm4468_vm1, %v3745_v62  ;;  %3139 = vmatmul.mubr.bf16.gmra.mrb[8].mxu0 %v5899_v52  ;;  %5433 = vmatmul.mubr.msk.bf16.gmra.mrb[8].mxu1 %vm2235_vm0, %v5903_v20  ;;  %v8864_v52 = vld [vmem:[#allocation60_spill] sm:$0xff] }
 0x254   :  { %4514 = vst.msk [vmem:[%s8801_s2 + $0x168] sm:$0xff] %vm4468_vm1, %v3737_v40  ;;  %3146 = vmatprep.mubr.bf16.mxu0 %v5906_v36  ;;  %5436 = vmatprep.mubr.msk.bf16.mxu1 %vm2235_vm0, %v5907_v25  ;;  %v8865_v36 = vld [vmem:[#allocation56_spill] sm:$0xff] }
 0x256   :  { %v7560_v45 = vpop.f32.mrb[160].mxu0  ;;  %v5330_v10 = vpop.f32.mrb[160].mxu1 }
 0x257   :  { %v3758_v9 = vadd.f32 %v5330_v10, %v7038_v1  ;;  %v2934_v27 = vpop.f32.mrb[161].mxu0  ;;  %v3749_v15 = vpop.f32.mrb[161].mxu1  ;;  %v5912_v1 = vld [vmem:[%s8800_s0 + $0x788] ss:$12 sps:$4 sm:$0xff]  }
 0x258   :  { %v3750_v30 = vadd.f32 %v3749_v15, %v7016_v7  ;;  %v7570_v4 = vpop.f32.mrb[162].mxu0  ;;  %v5331_v39 = vpop.f32.mrb[162].mxu1  ;;  %v5918_v27 = vld [vmem:[%s8800_s0 + $0x7d0] ss:$12 sps:$4 sm:$0xff]  }
 0x259   :  { %4519 = vst.msk [vmem:[%s8801_s2 + $0x190] sm:$0xff] %vm4468_vm1, %v3758_v9  ;;  %v3761_v50 = vadd.f32 %v5331_v39, %v7048_v19  ;;  %v2937_v5 = vpop.f32.mrb[163].mxu0  ;;  %v3752_v7 = vpop.f32.mrb[163].mxu1  ;;  %v5914_v9 = vld [vmem:[%s8800_s0 + $0x678] ss:$12 sps:$4 sm:$0xff]  }
 0x25a   :  { %4517 = vst.msk [vmem:[%s8801_s2 + $0x180] sm:$0xff] %vm4468_vm1, %v3750_v30  ;;  %v3753_v6 = vadd.f32 %v3752_v7, %v7026_v37  ;;  %v8862_v37 = vld [vmem:[#allocation58_spill] sm:$0xff] }
 0x25b   :  { %4520 = vst.msk [vmem:[%s8801_s2 + $0x198] sm:$0xff] %vm4468_vm1, %v3761_v50  ;;  %3147 = vmatmul.mubr.bf16.gmra.mrb[12].mxu0 %v5904_v0  ;;  %5437 = vmatmul.mubr.msk.bf16.gmra.mrb[12].mxu1 %vm2235_vm0, %v5908_v35  ;;  %v5921_v30 = vld [vmem:[%s8800_s0 + $0x694] ss:$12 sps:$4 sm:$0xff]  }
 0x25c   :  { %4518 = vst.msk [vmem:[%s8801_s2 + $0x188] sm:$0xff] %vm4468_vm1, %v3753_v6  ;;  %3154 = vmatprep.mubr.bf16.mxu0 %v5911_v22  ;;  %5440 = vmatprep.mubr.msk.bf16.mxu1 %vm2235_vm0, %v5912_v1  ;;  %v5919_v6 = vld [vmem:[%s8800_s0 + $0x690] ss:$12 sps:$4 sm:$0xff]  }
 0x25e   :  { %v7598_v19 = vpop.f32.mrb[164].mxu0  ;;  %v5334_v48 = vpop.f32.mrb[164].mxu1 }
 0x25f   :  { %v3774_v51 = vadd.f32 %v5334_v48, %v8862_v37  ;;  %v2942_v41 = vpop.f32.mrb[165].mxu0  ;;  %v3765_v55 = vpop.f32.mrb[165].mxu1  ;;  %v5923_v48 = vld [vmem:[%s8800_s0 + $0x800] ss:$12 sps:$4 sm:$0xff]  }
 0x260   :  { %v3766_v11 = vadd.f32 %v3765_v55, %v8863_v63  ;;  %v7608_v8 = vpop.f32.mrb[166].mxu0  ;;  %v5335_v49 = vpop.f32.mrb[166].mxu1  ;;  %v5926_v55 = vld [vmem:[%s8800_s0 + $0x6ac] ss:$12 sps:$4 sm:$0xff]  }
 0x261   :  { %4523 = vst.msk [vmem:[%s8801_s2 + $0x1b0] sm:$0xff] %vm4468_vm1, %v3774_v51  ;;  %v3777_v20 = vadd.f32 %v5335_v49, %v8864_v52  ;;  %v2945_v3 = vpop.f32.mrb[167].mxu0  ;;  %v3768_v54 = vpop.f32.mrb[167].mxu1  ;;  %v5928_v52 = vld [vmem:[%s8800_s0 + $0x830] ss:$12 sps:$4 sm:$0xff]  }
 0x262   :  { %4521 = vst.msk [vmem:[%s8801_s2 + $0x1a0] sm:$0xff] %vm4468_vm1, %v3766_v11  ;;  %v3769_v25 = vadd.f32 %v3768_v54, %v8865_v36  ;;  %v5931_v36 = vld [vmem:[%s8800_s0 + $0x6c4] ss:$12 sps:$4 sm:$0xff]  }
 0x263   :  { %4524 = vst.msk [vmem:[%s8801_s2 + $0x1b8] sm:$0xff] %vm4468_vm1, %v3777_v20  ;;  %3155 = vmatmul.mubr.bf16.gmra.mrb[16].mxu0 %v5909_v2  ;;  %5441 = vmatmul.mubr.msk.bf16.gmra.mrb[16].mxu1 %vm2235_vm0, %v5913_v34 }
 0x264   :  { %4522 = vst.msk [vmem:[%s8801_s2 + $0x1a8] sm:$0xff] %vm4468_vm1, %v3769_v25  ;;  %3162 = vmatprep.mubr.bf16.mxu0 %v5916_v14  ;;  %5444 = vmatprep.mubr.msk.bf16.mxu1 %vm2235_vm0, %v5917_v23  ;;  %v5924_v23 = vld [vmem:[%s8800_s0 + $0x6a8] ss:$12 sps:$4 sm:$0xff]  }
 0x266   :  { %v7636_v62 = vpop.f32.mrb[168].mxu0  ;;  %v5338_v59 = vpop.f32.mrb[168].mxu1 }
 0x267   :  { %v3790_v31 = vadd.f32 %v5338_v59, %v7142_v58  ;;  %v2950_v40 = vpop.f32.mrb[169].mxu0  ;;  %v3781_v10 = vpop.f32.mrb[169].mxu1  ;;  %v5922_v58 = vld [vmem:[%s8800_s0 + $0x7e8] ss:$12 sps:$4 sm:$0xff]  }
 0x268   :  { %v3782_v15 = vadd.f32 %v3781_v10, %v7104_v13  ;;  %v7646_v0 = vpop.f32.mrb[170].mxu0  ;;  %v5339_v35 = vpop.f32.mrb[170].mxu1 }
 0x269   :  { %4527 = vst.msk [vmem:[%s8801_s2 + $0x1d0] sm:$0xff] %vm4468_vm1, %v3790_v31  ;;  %v3793_v39 = vadd.f32 %v5339_v35, %v7152_v33  ;;  %v2953_v22 = vpop.f32.mrb[171].mxu0  ;;  %v3784_v13 = vpop.f32.mrb[171].mxu1 }
 0x26a   :  { %4525 = vst.msk [vmem:[%s8801_s2 + $0x1c0] sm:$0xff] %vm4468_vm1, %v3782_v15  ;;  %v3785_v1 = vadd.f32 %v3784_v13, %v7114_v42  ;;  %v5933_v15 = vld [vmem:[%s8800_s0 + $0x860] ss:$12 sps:$4 sm:$0xff]  }
 0x26b   :  { %4528 = vst.msk [vmem:[%s8801_s2 + $0x1d8] sm:$0xff] %vm4468_vm1, %v3793_v39  ;;  %3163 = vmatmul.mubr.bf16.gmra.mrb[20].mxu0 %v5914_v9  ;;  %5445 = vmatmul.mubr.msk.bf16.gmra.mrb[20].mxu1 %vm2235_vm0, %v5918_v27  ;;  %v5929_v27 = vld [vmem:[%s8800_s0 + $0x6c0] ss:$12 sps:$4 sm:$0xff]   ;;  %v5936_v39 = vld [vmem:[%s8800_s0 + $0x6dc] ss:$12 sps:$4 sm:$0xff]  }
 0x26c   :  { %4526 = vst.msk [vmem:[%s8801_s2 + $0x1c8] sm:$0xff] %vm4468_vm1, %v3785_v1  ;;  %3170 = vmatprep.mubr.bf16.mxu0 %v5921_v30  ;;  %5448 = vmatprep.mubr.msk.bf16.mxu1 %vm2235_vm0, %v5922_v58 }
 0x26e   :  { %v7674_v33 = vpop.f32.mrb[172].mxu0  ;;  %v5342_v50 = vpop.f32.mrb[172].mxu1 }
 0x26f   :  { %v3806_v42 = vadd.f32 %v5342_v50, %v7218_v44  ;;  %v2958_v5 = vpop.f32.mrb[173].mxu0  ;;  %v3797_v7 = vpop.f32.mrb[173].mxu1  ;;  %v5927_v44 = vld [vmem:[%s8800_s0 + $0x818] ss:$12 sps:$4 sm:$0xff]  }
 0x270   :  { %v3798_v37 = vadd.f32 %v3797_v7, %v7180_v18  ;;  %v7684_v51 = vpop.f32.mrb[174].mxu0  ;;  %v5343_v41 = vpop.f32.mrb[174].mxu1  ;;  %v5934_v7 = vld [vmem:[%s8800_s0 + $0x6d8] ss:$12 sps:$4 sm:$0xff]  }
 0x271   :  { %4531 = vst.msk [vmem:[%s8801_s2 + $0x1f0] sm:$0xff] %vm4468_vm1, %v3806_v42  ;;  %v3809_v2 = vadd.f32 %v5343_v41, %v7228_v43  ;;  %v2961_v34 = vpop.f32.mrb[175].mxu0  ;;  %v3800_v18 = vpop.f32.mrb[175].mxu1 }
 0x272   :  { %4529 = vst.msk [vmem:[%s8801_s2 + $0x1e0] sm:$0xff] %vm4468_vm1, %v3798_v37  ;;  %v3801_v63 = vadd.f32 %v3800_v18, %v7190_v28 }
 0x273   :  { %4532 = vst.msk [vmem:[%s8801_s2 + $0x1f8] sm:$0xff] %vm4468_vm1, %v3809_v2  ;;  %3171 = vmatmul.mubr.bf16.gmra.mrb[24].mxu0 %v5919_v6  ;;  %5449 = vmatmul.mubr.msk.bf16.gmra.mrb[24].mxu1 %vm2235_vm0, %v5923_v48  ;;  %v5938_v6 = vld [vmem:[%s8800_s0 + $0x890] ss:$12 sps:$4 sm:$0xff]  }
 0x274   :  { %4530 = vst.msk [vmem:[%s8801_s2 + $0x1e8] sm:$0xff] %vm4468_vm1, %v3801_v63  ;;  %3178 = vmatprep.mubr.bf16.mxu0 %v5926_v55  ;;  %5452 = vmatprep.mubr.msk.bf16.mxu1 %vm2235_vm0, %v5927_v44  ;;  %v5941_v55 = vld [vmem:[%s8800_s0 + $0x6f4] ss:$12 sps:$4 sm:$0xff]  }
 0x276   :  { %v7712_v43 = vpop.f32.mrb[176].mxu0  ;;  %v5346_v11 = vpop.f32.mrb[176].mxu1 }
 0x277   :  { %v3822_v28 = vadd.f32 %v5346_v11, %v7294_v60  ;;  %v2966_v49 = vpop.f32.mrb[177].mxu0  ;;  %v3813_v14 = vpop.f32.mrb[177].mxu1  ;;  %v5932_v60 = vld [vmem:[%s8800_s0 + $0x848] ss:$12 sps:$4 sm:$0xff]  }
 0x278   :  { %v3814_v20 = vadd.f32 %v3813_v14, %v7256_v16  ;;  %v7722_v3 = vpop.f32.mrb[178].mxu0  ;;  %v5347_v54 = vpop.f32.mrb[178].mxu1  ;;  %v5943_v49 = vld [vmem:[%s8800_s0 + $0x8c0] ss:$12 sps:$4 sm:$0xff]  }
 0x279   :  { %4535 = vst.msk [vmem:[%s8801_s2 + $0x210] sm:$0xff] %vm4468_vm1, %v3822_v28  ;;  %v3825_v25 = vadd.f32 %v5347_v54, %v7304_v12  ;;  %v2969_v59 = vpop.f32.mrb[179].mxu0  ;;  %v3816_v16 = vpop.f32.mrb[179].mxu1  ;;  %v5939_v28 = vld [vmem:[%s8800_s0 + $0x6f0] ss:$12 sps:$4 sm:$0xff]  }
 0x27a   :  { %4533 = vst.msk [vmem:[%s8801_s2 + $0x200] sm:$0xff] %vm4468_vm1, %v3814_v20  ;;  %v3817_v31 = vadd.f32 %v3816_v16, %v7266_v47  ;;  %v5946_v20 = vld [vmem:[%s8800_s0 + $0x70c] ss:$12 sps:$4 sm:$0xff]  }
 0x27b   :  { %4536 = vst.msk [vmem:[%s8801_s2 + $0x218] sm:$0xff] %vm4468_vm1, %v3825_v25  ;;  %3179 = vmatmul.mubr.bf16.gmra.mrb[28].mxu0 %v5924_v23  ;;  %5453 = vmatmul.mubr.msk.bf16.gmra.mrb[28].mxu1 %vm2235_vm0, %v5928_v52 }
 0x27c   :  { %4534 = vst.msk [vmem:[%s8801_s2 + $0x208] sm:$0xff] %vm4468_vm1, %v3817_v31  ;;  %3186 = vmatprep.mubr.bf16.mxu0 %v5931_v36  ;;  %5456 = vmatprep.mubr.msk.bf16.mxu1 %vm2235_vm0, %v5932_v60  ;;  %v5944_v31 = vld [vmem:[%s8800_s0 + $0x708] ss:$12 sps:$4 sm:$0xff]  }
 0x27e   :  { %v7750_v12 = vpop.f32.mrb[180].mxu0  ;;  %v5350_v40 = vpop.f32.mrb[180].mxu1 }
 0x27f   :  { %v3838_v47 = vadd.f32 %v5350_v40, %v7370_v21  ;;  %v2974_v10 = vpop.f32.mrb[181].mxu0  ;;  %v3829_v9 = vpop.f32.mrb[181].mxu1  ;;  %v5937_v21 = vld [vmem:[%s8800_s0 + $0x878] ss:$12 sps:$4 sm:$0xff]   ;;  %v5948_v40 = vld [vmem:[%s8800_s0 + $0x8f0] ss:$12 sps:$4 sm:$0xff]  }
 0x280   :  { %v3830_v35 = vadd.f32 %v3829_v9, %v7332_v56  ;;  %v7760_v30 = vpop.f32.mrb[182].mxu0  ;;  %v5351_v58 = vpop.f32.mrb[182].mxu1 }
 0x281   :  { %4539 = vst.msk [vmem:[%s8801_s2 + $0x230] sm:$0xff] %vm4468_vm1, %v3838_v47  ;;  %v3841_v22 = vadd.f32 %v5351_v58, %v7380_v24  ;;  %v2977_v13 = vpop.f32.mrb[183].mxu0  ;;  %v3832_v56 = vpop.f32.mrb[183].mxu1 }
 0x282   :  { %4537 = vst.msk [vmem:[%s8801_s2 + $0x220] sm:$0xff] %vm4468_vm1, %v3830_v35  ;;  %v3833_v1 = vadd.f32 %v3832_v56, %v7342_v26  ;;  %v5949_v13 = vld [vmem:[%s8800_s0 + $0x720] ss:$12 sps:$4 sm:$0xff]  }
 0x283   :  { %4540 = vst.msk [vmem:[%s8801_s2 + $0x238] sm:$0xff] %vm4468_vm1, %v3841_v22  ;;  %3187 = vmatmul.mubr.bf16.gmra.mrb[32].mxu0 %v5929_v27  ;;  %5457 = vmatmul.mubr.msk.bf16.gmra.mrb[32].mxu1 %vm2235_vm0, %v5933_v15  ;;  %v5951_v27 = vld [vmem:[%s8800_s0 + $0x724] ss:$12 sps:$4 sm:$0xff]   ;;  %v5953_v56 = vld [vmem:[%s8800_s0 + $0x920] ss:$12 sps:$4 sm:$0xff]  }
 0x284   :  { %4538 = vst.msk [vmem:[%s8801_s2 + $0x228] sm:$0xff] %vm4468_vm1, %v3833_v1  ;;  %3194 = vmatprep.mubr.bf16.mxu0 %v5936_v39  ;;  %5460 = vmatprep.mubr.msk.bf16.mxu1 %vm2235_vm0, %v5937_v21 }
 0x286   :  { %v7788_v24 = vpop.f32.mrb[184].mxu0  ;;  %v5354_v50 = vpop.f32.mrb[184].mxu1 }
 0x287   :  { %v3854_v26 = vadd.f32 %v5354_v50, %v7446_v57  ;;  %v2982_v42 = vpop.f32.mrb[185].mxu0  ;;  %v3845_v5 = vpop.f32.mrb[185].mxu1  ;;  %v5942_v57 = vld [vmem:[%s8800_s0 + $0x8a8] ss:$12 sps:$4 sm:$0xff]  }
 0x288   :  { %v3846_v48 = vadd.f32 %v3845_v5, %v7408_v29  ;;  %v7798_v37 = vpop.f32.mrb[186].mxu0  ;;  %v5355_v41 = vpop.f32.mrb[186].mxu1  ;;  %v5956_v42 = vld [vmem:[%s8800_s0 + $0x73c] ss:$12 sps:$4 sm:$0xff]  }
 0x289   :  { %4543 = vst.msk [vmem:[%s8801_s2 + $0x250] sm:$0xff] %vm4468_vm1, %v3854_v26  ;;  %v3857_v44 = vadd.f32 %v5355_v41, %v7456_v38  ;;  %v2985_v2 = vpop.f32.mrb[187].mxu0  ;;  %v3848_v29 = vpop.f32.mrb[187].mxu1 }
 0x28a   :  { %4541 = vst.msk [vmem:[%s8801_s2 + $0x240] sm:$0xff] %vm4468_vm1, %v3846_v48  ;;  %v3849_v34 = vadd.f32 %v3848_v29, %v7418_v53 }
 0x28b   :  { %4544 = vst.msk [vmem:[%s8801_s2 + $0x258] sm:$0xff] %vm4468_vm1, %v3857_v44  ;;  %3195 = vmatmul.mubr.bf16.gmra.mrb[36].mxu0 %v5934_v7  ;;  %5461 = vmatmul.mubr.msk.bf16.gmra.mrb[36].mxu1 %vm2235_vm0, %v5938_v6  ;;  %v5958_v44 = vld [vmem:[%s8800_s0 + $0x950] ss:$12 sps:$4 sm:$0xff]  }
 0x28c   :  { %4542 = vst.msk [vmem:[%s8801_s2 + $0x248] sm:$0xff] %vm4468_vm1, %v3849_v34  ;;  %3202 = vmatprep.mubr.bf16.mxu0 %v5941_v55  ;;  %5464 = vmatprep.mubr.msk.bf16.mxu1 %vm2235_vm0, %v5942_v57  ;;  %v5954_v57 = vld [vmem:[%s8800_s0 + $0x738] ss:$12 sps:$4 sm:$0xff]  }
 0x28e   :  { %v7826_v38 = vpop.f32.mrb[188].mxu0  ;;  %v5358_v18 = vpop.f32.mrb[188].mxu1 }
 0x28f   :  { %v3870_v53 = vadd.f32 %v5358_v18, %v7522_v17  ;;  %v2990_v63 = vpop.f32.mrb[189].mxu0  ;;  %v3861_v11 = vpop.f32.mrb[189].mxu1  ;;  %v5947_v17 = vld [vmem:[%s8800_s0 + $0x8d8] ss:$12 sps:$4 sm:$0xff]   ;;  %v5961_v18 = vld [vmem:[%s8800_s0 + $0x754] ss:$12 sps:$4 sm:$0xff]  }
 0x290   :  { %v3862_v14 = vadd.f32 %v3861_v11, %v7484_v61  ;;  %v7836_v23 = vpop.f32.mrb[190].mxu0  ;;  %v5359_v52 = vpop.f32.mrb[190].mxu1 }
 0x291   :  { %4547 = vst.msk [vmem:[%s8801_s2 + $0x270] sm:$0xff] %vm4468_vm1, %v3870_v53  ;;  %v3873_v54 = vadd.f32 %v5359_v52, %v7532_v32  ;;  %v2993_v36 = vpop.f32.mrb[191].mxu0  ;;  %v3864_v61 = vpop.f32.mrb[191].mxu1  ;;  %v5959_v52 = vld [vmem:[%s8800_s0 + $0x750] ss:$12 sps:$4 sm:$0xff]  }
 0x292   :  { %4545 = vst.msk [vmem:[%s8801_s2 + $0x260] sm:$0xff] %vm4468_vm1, %v3862_v14  ;;  %v3865_v60 = vadd.f32 %v3864_v61, %v7494_v46  ;;  %v5966_v61 = vld [vmem:[%s8800_s0 + $0x76c] ss:$12 sps:$4 sm:$0xff]  }
 0x293   :  { %4548 = vst.msk [vmem:[%s8801_s2 + $0x278] sm:$0xff] %vm4468_vm1, %v3873_v54  ;;  %3203 = vmatmul.mubr.bf16.gmra.mrb[40].mxu0 %v5939_v28  ;;  %5465 = vmatmul.mubr.msk.bf16.gmra.mrb[40].mxu1 %vm2235_vm0, %v5943_v49 }
 0x294   :  { %4546 = vst.msk [vmem:[%s8801_s2 + $0x268] sm:$0xff] %vm4468_vm1, %v3865_v60  ;;  %3210 = vmatprep.mubr.bf16.mxu0 %v5946_v20  ;;  %5468 = vmatprep.mubr.msk.bf16.mxu1 %vm2235_vm0, %v5947_v17  ;;  %v5963_v20 = vld [vmem:[%s8800_s0 + $0x980] ss:$12 sps:$4 sm:$0xff]  }
 0x296   :  { %v7864_v32 = vpop.f32.mrb[192].mxu0  ;;  %v5362_v25 = vpop.f32.mrb[192].mxu1 }
 0x297   :  { %v3886_v46 = vadd.f32 %v5362_v25, %v7598_v19  ;;  %v2998_v59 = vpop.f32.mrb[193].mxu0  ;;  %v3877_v16 = vpop.f32.mrb[193].mxu1  ;;  %v5952_v19 = vld [vmem:[%s8800_s0 + $0x908] ss:$12 sps:$4 sm:$0xff]  }
 0x298   :  { %v3878_v47 = vadd.f32 %v3877_v16, %v7560_v45  ;;  %v7874_v10 = vpop.f32.mrb[194].mxu0  ;;  %v5363_v9 = vpop.f32.mrb[194].mxu1 }
 0x299   :  { %4551 = vst.msk [vmem:[%s8801_s2 + $0x290] sm:$0xff] %vm4468_vm1, %v3886_v46  ;;  %v3889_v15 = vadd.f32 %v5363_v9, %v7608_v8  ;;  %v3001_v35 = vpop.f32.mrb[195].mxu0  ;;  %v3880_v45 = vpop.f32.mrb[195].mxu1 }
 0x29a   :  { %4549 = vst.msk [vmem:[%s8801_s2 + $0x280] sm:$0xff] %vm4468_vm1, %v3878_v47  ;;  %v3881_v58 = vadd.f32 %v3880_v45, %v7570_v4  ;;  %v5968_v47 = vld [vmem:[%s8800_s0 + $0x9b0] ss:$12 sps:$4 sm:$0xff]   ;;  %v5972_v35 = vld [vmem:[%s8800_s0 + $0x9c8] ss:$12 sps:$4 sm:$0xff]  }
 0x29b   :  { %4552 = vst.msk [vmem:[%s8801_s2 + $0x298] sm:$0xff] %vm4468_vm1, %v3889_v15  ;;  %3211 = vmatmul.mubr.bf16.gmra.mrb[44].mxu0 %v5944_v31  ;;  %5469 = vmatmul.mubr.msk.bf16.gmra.mrb[44].mxu1 %vm2235_vm0, %v5948_v40  ;;  %v5964_v40 = vld [vmem:[%s8800_s0 + $0x768] ss:$12 sps:$4 sm:$0xff]   ;;  %v5971_v15 = vld [vmem:[%s8800_s0 + $0x784] ss:$12 sps:$4 sm:$0xff]  }
 0x29c   :  { %4550 = vst.msk [vmem:[%s8801_s2 + $0x288] sm:$0xff] %vm4468_vm1, %v3881_v58  ;;  %3218 = vmatprep.mubr.bf16.mxu0 %v5951_v27  ;;  %5472 = vmatprep.mubr.msk.bf16.mxu1 %vm2235_vm0, %v5952_v19 }
 0x29e   :  { %v7902_v8 = vpop.f32.mrb[196].mxu0  ;;  %v5366_v39 = vpop.f32.mrb[196].mxu1 }
 0x29f   :  { %v3902_v4 = vadd.f32 %v5366_v39, %v7674_v33  ;;  %v3006_v21 = vpop.f32.mrb[197].mxu0  ;;  %v3893_v22 = vpop.f32.mrb[197].mxu1  ;;  %v5957_v33 = vld [vmem:[%s8800_s0 + $0x938] ss:$12 sps:$4 sm:$0xff]  }
 0x2a0   :  { %v3894_v1 = vadd.f32 %v3893_v22, %v7636_v62  ;;  %v7912_v50 = vpop.f32.mrb[198].mxu0  ;;  %v5367_v26 = vpop.f32.mrb[198].mxu1 }
 0x2a1   :  { %4555 = vst.msk [vmem:[%s8801_s2 + $0x2b0] sm:$0xff] %vm4468_vm1, %v3902_v4  ;;  %v3905_v5 = vadd.f32 %v5367_v26, %v7684_v51  ;;  %v3009_v7 = vpop.f32.mrb[199].mxu0  ;;  %v3896_v62 = vpop.f32.mrb[199].mxu1 }
 0x2a2   :  { %4553 = vst.msk [vmem:[%s8801_s2 + $0x2a0] sm:$0xff] %vm4468_vm1, %v3894_v1  ;;  %v3897_v6 = vadd.f32 %v3896_v62, %v7646_v0 }
 0x2a3   :  { %4556 = vst.msk [vmem:[%s8801_s2 + $0x2b8] sm:$0xff] %vm4468_vm1, %v3905_v5  ;;  %3219 = vmatmul.mubr.bf16.gmra.mrb[48].mxu0 %v5949_v13  ;;  %5473 = vmatmul.mubr.msk.bf16.gmra.mrb[48].mxu1 %vm2235_vm0, %v5953_v56  ;;  %v5969_v13 = vld [vmem:[%s8800_s0 + $0x780] ss:$12 sps:$4 sm:$0xff]  }
 0x2a4   :  { %4554 = vst.msk [vmem:[%s8801_s2 + $0x2a8] sm:$0xff] %vm4468_vm1, %v3897_v6  ;;  %3226 = vmatprep.mubr.bf16.mxu0 %v5956_v42  ;;  %5476 = vmatprep.mubr.msk.bf16.mxu1 %vm2235_vm0, %v5957_v33  ;;  %v5973_v56 = vld [vmem:[%s8800_s0 + $0x9e0] ss:$12 sps:$4 sm:$0xff]   ;;  %v5976_v42 = vld [vmem:[%s8800_s0 + $0x79c] ss:$12 sps:$4 sm:$0xff]  }
 0x2a5   :  { %v5977_v33 = vld [vmem:[%s8800_s0 + $0x9f8] ss:$12 sps:$4 sm:$0xff]  }
 0x2a6   :  { %v7940_v51 = vpop.f32.mrb[200].mxu0  ;;  %v5370_v48 = vpop.f32.mrb[200].mxu1 }
 0x2a7   :  { %v3918_v0 = vadd.f32 %v5370_v48, %v7750_v12  ;;  %v3014_v41 = vpop.f32.mrb[201].mxu0  ;;  %v3909_v55 = vpop.f32.mrb[201].mxu1  ;;  %v5962_v12 = vld [vmem:[%s8800_s0 + $0x968] ss:$12 sps:$4 sm:$0xff]  }
 0x2a8   :  { %v3910_v2 = vadd.f32 %v3909_v55, %v7712_v43  ;;  %v7950_v29 = vpop.f32.mrb[202].mxu0  ;;  %v5371_v34 = vpop.f32.mrb[202].mxu1 }
 0x2a9   :  { %4559 = vst.msk [vmem:[%s8801_s2 + $0x2d0] sm:$0xff] %vm4468_vm1, %v3918_v0  ;;  %v3921_v53 = vadd.f32 %v5371_v34, %v7760_v30  ;;  %v3017_v63 = vpop.f32.mrb[203].mxu0  ;;  %v3912_v43 = vpop.f32.mrb[203].mxu1 }
 0x2aa   :  { %4557 = vst.msk [vmem:[%s8801_s2 + $0x2c0] sm:$0xff] %vm4468_vm1, %v3910_v2  ;;  %v3913_v11 = vadd.f32 %v3912_v43, %v7722_v3 }
 0x2ab   :  { %4560 = vst.msk [vmem:[%s8801_s2 + $0x2d8] sm:$0xff] %vm4468_vm1, %v3921_v53  ;;  %3227 = vmatmul.mubr.bf16.gmra.mrb[52].mxu0 %v5954_v57  ;;  %5477 = vmatmul.mubr.msk.bf16.gmra.mrb[52].mxu1 %vm2235_vm0, %v5958_v44  ;;  %v5974_v57 = vld [vmem:[%s8800_s0 + $0x798] ss:$12 sps:$4 sm:$0xff]   ;;  %v5978_v44 = vld [vmem:[%s8800_s0 + $0xa10] ss:$12 sps:$4 sm:$0xff]  }
 0x2ac   :  { %4558 = vst.msk [vmem:[%s8801_s2 + $0x2c8] sm:$0xff] %vm4468_vm1, %v3913_v11  ;;  %3234 = vmatprep.mubr.bf16.mxu0 %v5961_v18  ;;  %5480 = vmatprep.mubr.msk.bf16.mxu1 %vm2235_vm0, %v5962_v12  ;;  %v5981_v18 = vld [vmem:[%s8800_s0 + $0x7b4] ss:$12 sps:$4 sm:$0xff]  }
 0x2ad   :  { %v5982_v12 = vld [vmem:[%s8800_s0 + $0xa28] ss:$12 sps:$4 sm:$0xff]  }
 0x2ae   :  { %v3020_v30 = vpop.f32.mrb[204].mxu0  ;;  %v5374_v28 = vpop.f32.mrb[204].mxu1 }
 0x2af   :  { %v3934_v3 = vadd.f32 %v5374_v28, %v7826_v38  ;;  %v3022_v49 = vpop.f32.mrb[205].mxu0  ;;  %v3925_v14 = vpop.f32.mrb[205].mxu1  ;;  %v5967_v38 = vld [vmem:[%s8800_s0 + $0x998] ss:$12 sps:$4 sm:$0xff]  }
 0x2b0   :  { %v3926_v17 = vadd.f32 %v3925_v14, %v7788_v24  ;;  %v3023_v54 = vpop.f32.mrb[206].mxu0  ;;  %v5375_v36 = vpop.f32.mrb[206].mxu1 }
 0x2b1   :  { %4563 = vst.msk [vmem:[%s8801_s2 + $0x2f0] sm:$0xff] %vm4468_vm1, %v3934_v3  ;;  %v3937_v60 = vadd.f32 %v5375_v36, %v7836_v23  ;;  %v3025_v25 = vpop.f32.mrb[207].mxu0  ;;  %v3928_v46 = vpop.f32.mrb[207].mxu1 }
 0x2b2   :  { %4561 = vst.msk [vmem:[%s8801_s2 + $0x2e0] sm:$0xff] %vm4468_vm1, %v3926_v17  ;;  %v3929_v24 = vadd.f32 %v3928_v46, %v7798_v37 }
 0x2b3   :  { %4564 = vst.msk [vmem:[%s8801_s2 + $0x2f8] sm:$0xff] %vm4468_vm1, %v3937_v60  ;;  %3235 = vmatmul.mubr.bf16.gmra.mrb[56].mxu0 %v5959_v52  ;;  %5481 = vmatmul.mubr.msk.bf16.gmra.mrb[56].mxu1 %vm2235_vm0, %v5963_v20  ;;  %v5979_v52 = vld [vmem:[%s8800_s0 + $0x7b0] ss:$12 sps:$4 sm:$0xff]   ;;  %v5983_v20 = vld [vmem:[%s8800_s0 + $0xa40] ss:$12 sps:$4 sm:$0xff]  }
 0x2b4   :  { %4562 = vst.msk [vmem:[%s8801_s2 + $0x2e8] sm:$0xff] %vm4468_vm1, %v3929_v24  ;;  %3242 = vmatprep.mubr.bf16.mxu0 %v5966_v61  ;;  %5484 = vmatprep.mubr.msk.bf16.mxu1 %vm2235_vm0, %v5967_v38  ;;  %v5986_v61 = vld [vmem:[%s8800_s0 + $0x7cc] ss:$12 sps:$4 sm:$0xff]  }
 0x2b5   :  { %v5987_v38 = vld [vmem:[%s8800_s0 + $0xa58] ss:$12 sps:$4 sm:$0xff]  }
 0x2b6   :  { %v3028_v23 = vpop.f32.mrb[208].mxu0  ;;  %v5378_v59 = vpop.f32.mrb[208].mxu1 }
 0x2b7   :  { %v3950_v37 = vadd.f32 %v5378_v59, %v7902_v8  ;;  %v3030_v16 = vpop.f32.mrb[209].mxu0  ;;  %v3941_v31 = vpop.f32.mrb[209].mxu1 }
 0x2b8   :  { %v3942_v9 = vadd.f32 %v3941_v31, %v7864_v32  ;;  %v3031_v27 = vpop.f32.mrb[210].mxu0  ;;  %v5379_v19 = vpop.f32.mrb[210].mxu1  ;;  %v5984_v31 = vld [vmem:[%s8800_s0 + $0x7c8] ss:$12 sps:$4 sm:$0xff]  }
 0x2b9   :  { %4567 = vst.msk [vmem:[%s8801_s2 + $0x310] sm:$0xff] %vm4468_vm1, %v3950_v37  ;;  %v3953_v45 = vadd.f32 %v5379_v19, %v7912_v50  ;;  %v3033_v58 = vpop.f32.mrb[211].mxu0  ;;  %v3944_v8 = vpop.f32.mrb[211].mxu1  ;;  %v5991_v19 = vld [vmem:[%s8800_s0 + $0x7e4] ss:$12 sps:$4 sm:$0xff]  }
 0x2ba   :  { %4565 = vst.msk [vmem:[%s8801_s2 + $0x300] sm:$0xff] %vm4468_vm1, %v3942_v9  ;;  %v3945_v32 = vadd.f32 %v3944_v8, %v7874_v10 }
 0x2bb   :  { %4568 = vst.msk [vmem:[%s8801_s2 + $0x318] sm:$0xff] %vm4468_vm1, %v3953_v45  ;;  %3243 = vmatmul.mubr.bf16.gmra.mrb[60].mxu0 %v5964_v40  ;;  %5485 = vmatmul.mubr.msk.bf16.gmra.mrb[60].mxu1 %vm2235_vm0, %v5968_v47  ;;  %v5988_v40 = vld [vmem:[%s8800_s0 + $0xa70] ss:$12 sps:$4 sm:$0xff]  }
 0x2bc   :  { %4566 = vst.msk [vmem:[%s8801_s2 + $0x308] sm:$0xff] %vm4468_vm1, %v3945_v32  ;;  %3250 = vmatprep.mubr.bf16.mxu0 %v5971_v15  ;;  %5488 = vmatprep.mubr.msk.bf16.mxu1 %vm2235_vm0, %v5972_v35  ;;  %v5992_v15 = vld [vmem:[%s8800_s0 + $0xa88] ss:$12 sps:$4 sm:$0xff]  }
 0x2be   :  { %v3036_v39 = vpop.f32.mrb[212].mxu0  ;;  %v5382_v4 = vpop.f32.mrb[212].mxu1 }
 0x2bf   :  { %v3966_v21 = vadd.f32 %v5382_v4, %v3020_v30  ;;  %v3038_v10 = vpop.f32.mrb[213].mxu0  ;;  %v3957_v22 = vpop.f32.mrb[213].mxu1 }
 0x2c0   :  { %v3958_v1 = vadd.f32 %v3957_v22, %v7940_v51  ;;  %v3039_v50 = vpop.f32.mrb[214].mxu0  ;;  %v5383_v26 = vpop.f32.mrb[214].mxu1  ;;  %v5993_v22 = vld [vmem:[%s8800_s0 + $0xaa0] ss:$12 sps:$4 sm:$0xff]  }
 0x2c1   :  { %4571 = vst.msk [vmem:[%s8801_s2 + $0x330] sm:$0xff] %vm4468_vm1, %v3966_v21  ;;  %v3969_v5 = vadd.f32 %v5383_v26, %v3023_v54  ;;  %v3041_v7 = vpop.f32.mrb[215].mxu0  ;;  %v3960_v62 = vpop.f32.mrb[215].mxu1  ;;  %v5989_v21 = vld [vmem:[%s8800_s0 + $0x7e0] ss:$12 sps:$4 sm:$0xff]  }
 0x2c2   :  { %4569 = vst.msk [vmem:[%s8801_s2 + $0x320] sm:$0xff] %vm4468_vm1, %v3958_v1  ;;  %v3961_v6 = vadd.f32 %v3960_v62, %v7950_v29  ;;  %v5996_v1 = vld [vmem:[%s8800_s0 + $0x7fc] ss:$12 sps:$4 sm:$0xff]  }
 0x2c3   :  { %4572 = vst.msk [vmem:[%s8801_s2 + $0x338] sm:$0xff] %vm4468_vm1, %v3969_v5  ;;  %3251 = vmatmul.mubr.bf16.gmra.mrb[64].mxu0 %v5969_v13  ;;  %5489 = vmatmul.mubr.msk.bf16.gmra.mrb[64].mxu1 %vm2235_vm0, %v5973_v56 }
 0x2c4   :  { %4570 = vst.msk [vmem:[%s8801_s2 + $0x328] sm:$0xff] %vm4468_vm1, %v3961_v6  ;;  %3258 = vmatprep.mubr.bf16.mxu0 %v5976_v42  ;;  %5492 = vmatprep.mubr.msk.bf16.mxu1 %vm2235_vm0, %v5977_v33  ;;  %v5994_v6 = vld [vmem:[%s8800_s0 + $0x7f8] ss:$12 sps:$4 sm:$0xff]  }
 0x2c6   :  { %v3044_v51 = vpop.f32.mrb[216].mxu0  ;;  %v5386_v48 = vpop.f32.mrb[216].mxu1 }
 0x2c7   :  { %v3982_v0 = vadd.f32 %v5386_v48, %v3036_v39  ;;  %v3046_v41 = vpop.f32.mrb[217].mxu0  ;;  %v3973_v55 = vpop.f32.mrb[217].mxu1 }
 0x2c8   :  { %v3974_v2 = vadd.f32 %v3973_v55, %v3028_v23  ;;  %v3047_v29 = vpop.f32.mrb[218].mxu0  ;;  %v5387_v34 = vpop.f32.mrb[218].mxu1 }
 0x2c9   :  { %4575 = vst.msk [vmem:[%s8801_s2 + $0x350] sm:$0xff] %vm4468_vm1, %v3982_v0  ;;  %v3985_v53 = vadd.f32 %v5387_v34, %v3039_v50  ;;  %v3049_v63 = vpop.f32.mrb[219].mxu0  ;;  %v3976_v43 = vpop.f32.mrb[219].mxu1 }
 0x2ca   :  { %4573 = vst.msk [vmem:[%s8801_s2 + $0x340] sm:$0xff] %vm4468_vm1, %v3974_v2  ;;  %v3977_v11 = vadd.f32 %v3976_v43, %v3031_v27 }
 0x2cb   :  { %4576 = vst.msk [vmem:[%s8801_s2 + $0x358] sm:$0xff] %vm4468_vm1, %v3985_v53  ;;  %3259 = vmatmul.mubr.bf16.gmra.mrb[68].mxu0 %v5974_v57  ;;  %5493 = vmatmul.mubr.msk.bf16.gmra.mrb[68].mxu1 %vm2235_vm0, %v5978_v44 }
 0x2cc   :  { %4574 = vst.msk [vmem:[%s8801_s2 + $0x348] sm:$0xff] %vm4468_vm1, %v3977_v11  ;;  %3266 = vmatprep.mubr.bf16.mxu0 %v5981_v18  ;;  %5496 = vmatprep.mubr.msk.bf16.mxu1 %vm2235_vm0, %v5982_v12 }
 0x2ce   :  { %v3052_v30 = vpop.f32.mrb[220].mxu0  ;;  %v5390_v28 = vpop.f32.mrb[220].mxu1 }
 0x2cf   :  { %v3998_v3 = vadd.f32 %v5390_v28, %v3052_v30  ;;  %v3054_v49 = vpop.f32.mrb[221].mxu0  ;;  %v3989_v14 = vpop.f32.mrb[221].mxu1 }
 0x2d0   :  { %v3990_v17 = vadd.f32 %v3989_v14, %v3044_v51  ;;  %v3055_v54 = vpop.f32.mrb[222].mxu0  ;;  %v5391_v36 = vpop.f32.mrb[222].mxu1 }
 0x2d1   :  { %4579 = vst.msk [vmem:[%s8801_s2 + $0x370] sm:$0xff] %vm4468_vm1, %v3998_v3  ;;  %v4001_v60 = vadd.f32 %v5391_v36, %v3055_v54  ;;  %v3057_v25 = vpop.f32.mrb[223].mxu0  ;;  %v3992_v46 = vpop.f32.mrb[223].mxu1 }
 0x2d2   :  { %4577 = vst.msk [vmem:[%s8801_s2 + $0x360] sm:$0xff] %vm4468_vm1, %v3990_v17  ;;  %v3993_v24 = vadd.f32 %v3992_v46, %v3047_v29 }
 0x2d3   :  { %4580 = vst.msk [vmem:[%s8801_s2 + $0x378] sm:$0xff] %vm4468_vm1, %v4001_v60  ;;  %3267 = vmatmul.mubr.bf16.gmra.mrb[72].mxu0 %v5979_v52  ;;  %5497 = vmatmul.mubr.msk.bf16.gmra.mrb[72].mxu1 %vm2235_vm0, %v5983_v20 }
 0x2d4   :  { %4578 = vst.msk [vmem:[%s8801_s2 + $0x368] sm:$0xff] %vm4468_vm1, %v3993_v24  ;;  %3274 = vmatprep.mubr.bf16.mxu0 %v5986_v61  ;;  %5500 = vmatprep.mubr.msk.bf16.mxu1 %vm2235_vm0, %v5987_v38 }
 0x2d6   :  { %v3060_v23 = vpop.f32.mrb[224].mxu0  ;;  %v5394_v59 = vpop.f32.mrb[224].mxu1 }
 0x2d7   :  { %v3062_v37 = vpop.f32.mrb[225].mxu0  ;;  %v4005_v16 = vpop.f32.mrb[225].mxu1 }
 0x2d8   :  { %v4006_v47 = vadd.f32 %v4005_v16, %v3060_v23  ;;  %v3063_v9 = vpop.f32.mrb[226].mxu0  ;;  %v5395_v27 = vpop.f32.mrb[226].mxu1 }
 0x2d9   :  { %v3065_v35 = vpop.f32.mrb[227].mxu0  ;;  %v4008_v45 = vpop.f32.mrb[227].mxu1 }
 0x2da   :  { %4581 = vst.msk [vmem:[%s8801_s2 + $0x380] sm:$0xff] %vm4468_vm1, %v4006_v47  ;;  %v4009_v58 = vadd.f32 %v4008_v45, %v3063_v9 }
 0x2db   :  { %3275 = vmatmul.mubr.bf16.gmra.mrb[76].mxu0 %v5984_v31  ;;  %5501 = vmatmul.mubr.msk.bf16.gmra.mrb[76].mxu1 %vm2235_vm0, %v5988_v40 }
 0x2dc   :  { %4582 = vst.msk [vmem:[%s8801_s2 + $0x388] sm:$0xff] %vm4468_vm1, %v4009_v58  ;;  %3282 = vmatprep.mubr.bf16.mxu0 %v5991_v19  ;;  %5504 = vmatprep.mubr.msk.bf16.mxu1 %vm2235_vm0, %v5992_v15 }
 0x2de   :  { %v3068_v8 = vpop.f32.mrb[228].mxu0  ;;  %v5398_v32 = vpop.f32.mrb[228].mxu1 }
 0x2df   :  { %v4014_v39 = vadd.f32 %v5394_v59, %v3068_v8  ;;  %v3070_v4 = vpop.f32.mrb[229].mxu0  ;;  %v4021_v10 = vpop.f32.mrb[229].mxu1 }
 0x2e0   :  { %v3071_v13 = vpop.f32.mrb[230].mxu0  ;;  %v5399_v56 = vpop.f32.mrb[230].mxu1 }
 0x2e1   :  { %4583 = vst.msk [vmem:[%s8801_s2 + $0x390] sm:$0xff] %vm4468_vm1, %v4014_v39  ;;  %v4017_v50 = vadd.f32 %v5395_v27, %v3071_v13  ;;  %v3073_v26 = vpop.f32.mrb[231].mxu0  ;;  %v4024_v42 = vpop.f32.mrb[231].mxu1 }
 0x2e3   :  { %4584 = vst.msk [vmem:[%s8801_s2 + $0x398] sm:$0xff] %vm4468_vm1, %v4017_v50  ;;  %3283 = vmatmul.mubr.bf16.gmra.mrb[80].mxu0 %v5989_v21  ;;  %5505 = vmatmul.mubr.msk.bf16.gmra.mrb[80].mxu1 %vm2235_vm0, %v5993_v22 }
 0x2e4   :  { %3290 = vmatprep.mubr.bf16.mxu0 %v5996_v1 }
 0x2e6   :  { %v3076_v33 = vpop.f32.mrb[232].mxu0  ;;  %v5402_v5 = vpop.f32.mrb[232].mxu1 }
 0x2e7   :  { %v4022_v7 = vadd.f32 %v4021_v10, %v3076_v33  ;;  %v3078_v62 = vpop.f32.mrb[233].mxu0  ;;  %v4037_v51 = vpop.f32.mrb[233].mxu1 }
 0x2e8   :  { %v3079_v48 = vpop.f32.mrb[234].mxu0  ;;  %v5403_v0 = vpop.f32.mrb[234].mxu1 }
 0x2e9   :  { %4585 = vst.msk [vmem:[%s8801_s2 + $0x3a0] sm:$0xff] %vm4468_vm1, %v4022_v7  ;;  %v4025_v41 = vadd.f32 %v4024_v42, %v3079_v48  ;;  %v3081_v55 = vpop.f32.mrb[235].mxu0  ;;  %v4040_v57 = vpop.f32.mrb[235].mxu1 }
 0x2eb   :  { %4586 = vst.msk [vmem:[%s8801_s2 + $0x3a8] sm:$0xff] %vm4468_vm1, %v4025_v41  ;;  %3291 = vmatmul.mubr.bf16.gmra.mrb[84].mxu0 %v5994_v6 }
 0x2ee   :  { %v3084_v44 = vpop.f32.mrb[236].mxu0  ;;  %v5406_v2 = vpop.f32.mrb[236].mxu1 }
 0x2ef   :  { %v4030_v29 = vadd.f32 %v5398_v32, %v3084_v44  ;;  %v3086_v34 = vpop.f32.mrb[237].mxu0  ;;  %v4053_v18 = vpop.f32.mrb[237].mxu1 }
 0x2f0   :  { %v3087_v12 = vpop.f32.mrb[238].mxu0  ;;  %v5407_v53 = vpop.f32.mrb[238].mxu1 }
 0x2f1   :  { %4587 = vst.msk [vmem:[%s8801_s2 + $0x3b0] sm:$0xff] %vm4468_vm1, %v4030_v29  ;;  %v4033_v63 = vadd.f32 %v5399_v56, %v3087_v12  ;;  %v3089_v43 = vpop.f32.mrb[239].mxu0  ;;  %v4056_v11 = vpop.f32.mrb[239].mxu1 }
 0x2f3   :  { %4588 = vst.msk [vmem:[%s8801_s2 + $0x3b8] sm:$0xff] %vm4468_vm1, %v4033_v63 }
 0x2f6   :  { %v3092_v30 = vpop.f32.mrb[240].mxu0  ;;  %v5410_v28 = vpop.f32.mrb[240].mxu1 }
 0x2f7   :  { %v4038_v3 = vadd.f32 %v4037_v51, %v3092_v30  ;;  %v3094_v49 = vpop.f32.mrb[241].mxu0  ;;  %v4069_v14 = vpop.f32.mrb[241].mxu1 }
 0x2f8   :  { %v3095_v52 = vpop.f32.mrb[242].mxu0  ;;  %v5411_v20 = vpop.f32.mrb[242].mxu1 }
 0x2f9   :  { %4589 = vst.msk [vmem:[%s8801_s2 + $0x3c0] sm:$0xff] %vm4468_vm1, %v4038_v3  ;;  %v4041_v17 = vadd.f32 %v4040_v57, %v3095_v52  ;;  %v3097_v54 = vpop.f32.mrb[243].mxu0  ;;  %v4072_v36 = vpop.f32.mrb[243].mxu1 }
 0x2fb   :  { %4590 = vst.msk [vmem:[%s8801_s2 + $0x3c8] sm:$0xff] %vm4468_vm1, %v4041_v17 }
 0x2fe   :  { %v3100_v61 = vpop.f32.mrb[244].mxu0  ;;  %v8205_v38 = vpop.f32.mrb[244].mxu1 }
 0x2ff   :  { %v4046_v60 = vadd.f32 %v5402_v5, %v3100_v61  ;;  %v3102_v25 = vpop.f32.mrb[245].mxu0  ;;  %v4085_v46 = vpop.f32.mrb[245].mxu1 }
 0x300   :  { %v3103_v24 = vpop.f32.mrb[246].mxu0  ;;  %v8207_v23 = vpop.f32.mrb[246].mxu1 }
 0x301   :  { %4591 = vst.msk [vmem:[%s8801_s2 + $0x3d0] sm:$0xff] %vm4468_vm1, %v4046_v60  ;;  %v4049_v59 = vadd.f32 %v5403_v0, %v3103_v24  ;;  %v3105_v37 = vpop.f32.mrb[247].mxu0  ;;  %v4088_v16 = vpop.f32.mrb[247].mxu1 }
 0x303   :  { %4592 = vst.msk [vmem:[%s8801_s2 + $0x3d8] sm:$0xff] %vm4468_vm1, %v4049_v59 }
 0x306   :  { %v3108_v31 = vpop.f32.mrb[248].mxu0  ;;  %v8217_v40 = vpop.f32.mrb[248].mxu1 }
 0x307   :  { %v4054_v47 = vadd.f32 %v4053_v18, %v3108_v31  ;;  %v3110_v9 = vpop.f32.mrb[249].mxu0  ;;  %v8219_v27 = vpop.f32.mrb[249].mxu1 }
 0x308   :  { %v3111_v19 = vpop.f32.mrb[250].mxu0  ;;  %v8221_v15 = vpop.f32.mrb[250].mxu1 }
 0x309   :  { %4593 = vst.msk [vmem:[%s8801_s2 + $0x3e0] sm:$0xff] %vm4468_vm1, %v4054_v47  ;;  %v4057_v35 = vadd.f32 %v4056_v11, %v3111_v19  ;;  %v3113_v45 = vpop.f32.mrb[251].mxu0  ;;  %v8227_v58 = vpop.f32.mrb[251].mxu1 }
 0x30b   :  { %4594 = vst.msk [vmem:[%s8801_s2 + $0x3e8] sm:$0xff] %vm4468_vm1, %v4057_v35 }
 0x30e   :  { %v3116_v8 = vpop.f32.mrb[252].mxu0  ;;  %v8233_v32 = vpop.f32.mrb[252].mxu1 }
 0x30f   :  { %v4062_v39 = vadd.f32 %v5406_v2, %v3116_v8  ;;  %v3118_v4 = vpop.f32.mrb[253].mxu0  ;;  %v8235_v21 = vpop.f32.mrb[253].mxu1 }
 0x310   :  { %v3119_v10 = vpop.f32.mrb[254].mxu0  ;;  %v8237_v22 = vpop.f32.mrb[254].mxu1 }
 0x311   :  { %4595 = vst.msk [vmem:[%s8801_s2 + $0x3f0] sm:$0xff] %vm4468_vm1, %v4062_v39  ;;  %v4065_v13 = vadd.f32 %v5407_v53, %v3119_v10  ;;  %v3121_v56 = vpop.f32.mrb[255].mxu0  ;;  %v8243_v1 = vpop.f32.mrb[255].mxu1 }
 0x313   :  { %4596 = vst.msk [vmem:[%s8801_s2 + $0x3f8] sm:$0xff] %vm4468_vm1, %v4065_v13 }
 0x316   :  { %v3124_v50 = vpop.f32.mrb[0].mxu0  ;;  %v8249_v26 = vpop.f32.mrb[0].mxu1 }
 0x317   :  { %v4070_v42 = vadd.f32 %v4069_v14, %v3124_v50  ;;  %v3126_v33 = vpop.f32.mrb[1].mxu0  ;;  %v8251_v5 = vpop.f32.mrb[1].mxu1 }
 0x318   :  { %v3127_v7 = vpop.f32.mrb[2].mxu0  ;;  %v8253_v62 = vpop.f32.mrb[2].mxu1 }
 0x319   :  { %4597 = vst.msk [vmem:[%s8801_s2 + $0x400] sm:$0xff] %vm4468_vm1, %v4070_v42  ;;  %v4073_v6 = vadd.f32 %v4072_v36, %v3127_v7  ;;  %v3129_v51 = vpop.f32.mrb[3].mxu0  ;;  %v8259_v48 = vpop.f32.mrb[3].mxu1 }
 0x31b   :  { %4598 = vst.msk [vmem:[%s8801_s2 + $0x408] sm:$0xff] %vm4468_vm1, %v4073_v6 }
 0x31e   :  { %v3132_v0 = vpop.f32.mrb[4].mxu0  ;;  %v8265_v41 = vpop.f32.mrb[4].mxu1 }
 0x31f   :  { %v4078_v55 = vadd.f32 %v5410_v28, %v3132_v0  ;;  %v3134_v57 = vpop.f32.mrb[5].mxu0  ;;  %v8267_v44 = vpop.f32.mrb[5].mxu1 }
 0x320   :  { %v3135_v2 = vpop.f32.mrb[6].mxu0  ;;  %v8269_v29 = vpop.f32.mrb[6].mxu1 }
 0x321   :  { %4599 = vst.msk [vmem:[%s8801_s2 + $0x410] sm:$0xff] %vm4468_vm1, %v4078_v55  ;;  %v4081_v34 = vadd.f32 %v5411_v20, %v3135_v2  ;;  %v3137_v18 = vpop.f32.mrb[7].mxu0  ;;  %v8275_v12 = vpop.f32.mrb[7].mxu1 }
 0x323   :  { %4600 = vst.msk [vmem:[%s8801_s2 + $0x418] sm:$0xff] %vm4468_vm1, %v4081_v34 }
 0x326   :  { %v3140_v53 = vpop.f32.mrb[8].mxu0  ;;  %v8281_v63 = vpop.f32.mrb[8].mxu1 }
 0x327   :  { %v4086_v43 = vadd.f32 %v4085_v46, %v3140_v53  ;;  %v3142_v11 = vpop.f32.mrb[9].mxu0  ;;  %v8283_v30 = vpop.f32.mrb[9].mxu1  ;;  %v8866_v53 = vld [vmem:[#allocation4_spill] sm:$0xff] }
 0x328   :  { %v3143_v28 = vpop.f32.mrb[10].mxu0  ;;  %v8285_v3 = vpop.f32.mrb[10].mxu1 }
 0x329   :  { %4601 = vst.msk [vmem:[%s8801_s2 + $0x420] sm:$0xff] %vm4468_vm1, %v4086_v43  ;;  %v4089_v49 = vadd.f32 %v4088_v16, %v3143_v28  ;;  %v3145_v14 = vpop.f32.mrb[11].mxu0  ;;  %v8291_v52 = vpop.f32.mrb[11].mxu1 }
 0x32b   :  { %4602 = vst.msk [vmem:[%s8801_s2 + $0x428] sm:$0xff] %vm4468_vm1, %v4089_v49  ;;  %v8867_v49 = vld [vmem:[#allocation2_spill] sm:$0xff] }
 0x32e   :  { %v3148_v20 = vpop.f32.mrb[12].mxu0  ;;  %v8297_v17 = vpop.f32.mrb[12].mxu1 }
 0x32f   :  { %v4094_v54 = vadd.f32 %v8205_v38, %v3148_v20  ;;  %v3150_v36 = vpop.f32.mrb[13].mxu0  ;;  %v8300_v61 = vpop.f32.mrb[13].mxu1 }
 0x330   :  { %v3151_v60 = vpop.f32.mrb[14].mxu0  ;;  %v8302_v25 = vpop.f32.mrb[14].mxu1 }
 0x331   :  { %4603 = vst.msk [vmem:[%s8801_s2 + $0x430] sm:$0xff] %vm4468_vm1, %v4094_v54  ;;  %v4097_v46 = vadd.f32 %v8207_v23, %v3151_v60  ;;  %v3153_v24 = vpop.f32.mrb[15].mxu0  ;;  %v8309_v59 = vpop.f32.mrb[15].mxu1  ;;  %v8868_v54 = vld [vmem:[#allocation5_spill] sm:$0xff] }
 0x332   :  { %v8869_v24 = vld [vmem:[#allocation3_spill] sm:$0xff] }
 0x333   :  { %4604 = vst.msk [vmem:[%s8801_s2 + $0x438] sm:$0xff] %vm4468_vm1, %v4097_v46 }
 0x336   :  { %v3156_v38 = vpop.f32.mrb[16].mxu0  ;;  %v8315_v37 = vpop.f32.mrb[16].mxu1 }
 0x337   :  { %v4102_v16 = vadd.f32 %v8219_v27, %v3156_v38  ;;  %v3158_v31 = vpop.f32.mrb[17].mxu0  ;;  %v8318_v47 = vpop.f32.mrb[17].mxu1 }
 0x338   :  { %v3159_v9 = vpop.f32.mrb[18].mxu0  ;;  %v8320_v19 = vpop.f32.mrb[18].mxu1 }
 0x339   :  { %4605 = vst.msk [vmem:[%s8801_s2 + $0x440] sm:$0xff] %vm4468_vm1, %v4102_v16  ;;  %v4105_v23 = vadd.f32 %v8227_v58, %v3159_v9  ;;  %v3161_v35 = vpop.f32.mrb[19].mxu0  ;;  %v8327_v45 = vpop.f32.mrb[19].mxu1  ;;  %v8870_v9 = vld [vmem:[#allocation8_spill] sm:$0xff] }
 0x33b   :  { %4606 = vst.msk [vmem:[%s8801_s2 + $0x448] sm:$0xff] %vm4468_vm1, %v4105_v23 }
 0x33e   :  { %v3164_v27 = vpop.f32.mrb[20].mxu0  ;;  %v8333_v8 = vpop.f32.mrb[20].mxu1 }
 0x33f   :  { %v4110_v39 = vadd.f32 %v8217_v40, %v3164_v27  ;;  %v3166_v4 = vpop.f32.mrb[21].mxu0  ;;  %v8336_v10 = vpop.f32.mrb[21].mxu1 }
 0x340   :  { %v3167_v13 = vpop.f32.mrb[22].mxu0  ;;  %v8338_v56 = vpop.f32.mrb[22].mxu1 }
 0x341   :  { %4607 = vst.msk [vmem:[%s8801_s2 + $0x450] sm:$0xff] %vm4468_vm1, %v4110_v39  ;;  %v4113_v58 = vadd.f32 %v8221_v15, %v3167_v13  ;;  %v3169_v50 = vpop.f32.mrb[23].mxu0  ;;  %v8345_v42 = vpop.f32.mrb[23].mxu1  ;;  %v8871_v39 = vld [vmem:[#allocation6_spill] sm:$0xff] }
 0x342   :  { %v8872_v50 = vld [vmem:[#allocation9_spill] sm:$0xff] }
 0x343   :  { %4608 = vst.msk [vmem:[%s8801_s2 + $0x458] sm:$0xff] %vm4468_vm1, %v4113_v58 }
 0x346   :  { %v3172_v40 = vpop.f32.mrb[24].mxu0  ;;  %v8351_v33 = vpop.f32.mrb[24].mxu1 }
 0x347   :  { %v4118_v7 = vadd.f32 %v8235_v21, %v3172_v40  ;;  %v3174_v6 = vpop.f32.mrb[25].mxu0  ;;  %v8354_v51 = vpop.f32.mrb[25].mxu1 }
 0x348   :  { %v3175_v0 = vpop.f32.mrb[26].mxu0  ;;  %v8356_v55 = vpop.f32.mrb[26].mxu1 }
 0x349   :  { %4609 = vst.msk [vmem:[%s8801_s2 + $0x460] sm:$0xff] %vm4468_vm1, %v4118_v7  ;;  %v4121_v15 = vadd.f32 %v8243_v1, %v3175_v0  ;;  %v3177_v57 = vpop.f32.mrb[27].mxu0  ;;  %v8363_v2 = vpop.f32.mrb[27].mxu1  ;;  %v8873_v0 = vld [vmem:[#allocation7_spill] sm:$0xff] }
 0x34b   :  { %4610 = vst.msk [vmem:[%s8801_s2 + $0x468] sm:$0xff] %vm4468_vm1, %v4121_v15 }
 0x34e   :  { %v3180_v21 = vpop.f32.mrb[28].mxu0  ;;  %v5454_v34 = vpop.f32.mrb[28].mxu1 }
 0x34f   :  { %v4126_v18 = vadd.f32 %v8233_v32, %v3180_v21  ;;  %v4254_v43 = vadd.f32 %v5454_v34, %v8866_v53  ;;  %v3182_v11 = vpop.f32.mrb[29].mxu0  ;;  %v4245_v28 = vpop.f32.mrb[29].mxu1  ;;  %v8874_v34 = vld [vmem:[#allocation12_spill] sm:$0xff] }
 0x350   :  { %v4246_v14 = vadd.f32 %v4245_v28, %v8867_v49  ;;  %v3183_v20 = vpop.f32.mrb[30].mxu0  ;;  %v5455_v1 = vpop.f32.mrb[30].mxu1  ;;  %v8875_v11 = vld [vmem:[#allocation10_spill] sm:$0xff] }
 0x351   :  { %4611 = vst.msk [vmem:[%s8801_s2 + $0x470] sm:$0xff] %vm4468_vm1, %v4126_v18  ;;  %4643 = vst.msk [vmem:[%s8801_s2 + $0x570] sm:$0xff] %vm4468_vm1, %v4254_v43  ;;  %v4129_v32 = vadd.f32 %v8237_v22, %v3183_v20  ;;  %v4257_v36 = vadd.f32 %v5455_v1, %v8868_v54  ;;  %v3185_v60 = vpop.f32.mrb[31].mxu0  ;;  %v4248_v46 = vpop.f32.mrb[31].mxu1  ;;  %v8876_v20 = vld [vmem:[#allocation13_spill] sm:$0xff] }
 0x352   :  { %4641 = vst.msk [vmem:[%s8801_s2 + $0x560] sm:$0xff] %vm4468_vm1, %v4246_v14  ;;  %v4249_v38 = vadd.f32 %v4248_v46, %v8869_v24 }
 0x353   :  { %4612 = vst.msk [vmem:[%s8801_s2 + $0x478] sm:$0xff] %vm4468_vm1, %v4129_v32  ;;  %4644 = vst.msk [vmem:[%s8801_s2 + $0x578] sm:$0xff] %vm4468_vm1, %v4257_v36  ;;  %v8877_v36 = vld [vmem:[#allocation11_spill] sm:$0xff] }
 0x354   :  { %4642 = vst.msk [vmem:[%s8801_s2 + $0x568] sm:$0xff] %vm4468_vm1, %v4249_v38  ;;  %v8878_v38 = vld [vmem:[#allocation16_spill] sm:$0xff] }
 0x356   :  { %v3188_v22 = vpop.f32.mrb[32].mxu0  ;;  %v5458_v16 = vpop.f32.mrb[32].mxu1 }
 0x357   :  { %v4134_v31 = vadd.f32 %v8251_v5, %v3188_v22  ;;  %v4270_v23 = vadd.f32 %v5458_v16, %v8870_v9  ;;  %v3190_v35 = vpop.f32.mrb[33].mxu0  ;;  %v4261_v27 = vpop.f32.mrb[33].mxu1  ;;  %v8879_v9 = vld [vmem:[#allocation14_spill] sm:$0xff] }
 0x358   :  { %v4262_v4 = vadd.f32 %v4261_v27, %v8871_v39  ;;  %v3191_v13 = vpop.f32.mrb[34].mxu0  ;;  %v5459_v58 = vpop.f32.mrb[34].mxu1  ;;  %v8880_v39 = vld [vmem:[#allocation17_spill] sm:$0xff] }
 0x359   :  { %4613 = vst.msk [vmem:[%s8801_s2 + $0x480] sm:$0xff] %vm4468_vm1, %v4134_v31  ;;  %4647 = vst.msk [vmem:[%s8801_s2 + $0x590] sm:$0xff] %vm4468_vm1, %v4270_v23  ;;  %v4137_v5 = vadd.f32 %v8259_v48, %v3191_v13  ;;  %v4273_v40 = vadd.f32 %v5459_v58, %v8872_v50  ;;  %v3193_v7 = vpop.f32.mrb[35].mxu0  ;;  %v4264_v6 = vpop.f32.mrb[35].mxu1 }
 0x35a   :  { %4645 = vst.msk [vmem:[%s8801_s2 + $0x580] sm:$0xff] %vm4468_vm1, %v4262_v4  ;;  %v4265_v15 = vadd.f32 %v4264_v6, %v8873_v0  ;;  %v8882_v6 = vld [vmem:[#allocation20_spill] sm:$0xff] }
 0x35b   :  { %4614 = vst.msk [vmem:[%s8801_s2 + $0x488] sm:$0xff] %vm4468_vm1, %v4137_v5  ;;  %4648 = vst.msk [vmem:[%s8801_s2 + $0x598] sm:$0xff] %vm4468_vm1, %v4273_v40  ;;  %v8881_v5 = vld [vmem:[#allocation15_spill] sm:$0xff] }
 0x35c   :  { %4646 = vst.msk [vmem:[%s8801_s2 + $0x588] sm:$0xff] %vm4468_vm1, %v4265_v15 }
 0x35e   :  { %v3196_v48 = vpop.f32.mrb[36].mxu0  ;;  %v5462_v57 = vpop.f32.mrb[36].mxu1 }
 0x35f   :  { %v4142_v21 = vadd.f32 %v8249_v26, %v3196_v48  ;;  %v4286_v18 = vadd.f32 %v5462_v57, %v8874_v34  ;;  %v3198_v53 = vpop.f32.mrb[37].mxu0  ;;  %v4277_v43 = vpop.f32.mrb[37].mxu1  ;;  %v8883_v57 = vld [vmem:[#allocation18_spill] sm:$0xff] }
 0x360   :  { %v4278_v28 = vadd.f32 %v4277_v43, %v8875_v11  ;;  %v3199_v49 = vpop.f32.mrb[38].mxu0  ;;  %v5463_v14 = vpop.f32.mrb[38].mxu1  ;;  %v8884_v53 = vld [vmem:[#allocation21_spill] sm:$0xff] }
 0x361   :  { %4615 = vst.msk [vmem:[%s8801_s2 + $0x490] sm:$0xff] %vm4468_vm1, %v4142_v21  ;;  %4651 = vst.msk [vmem:[%s8801_s2 + $0x5b0] sm:$0xff] %vm4468_vm1, %v4286_v18  ;;  %v4145_v26 = vadd.f32 %v8253_v62, %v3199_v49  ;;  %v4289_v1 = vadd.f32 %v5463_v14, %v8876_v20  ;;  %v3201_v32 = vpop.f32.mrb[39].mxu0  ;;  %v4280_v54 = vpop.f32.mrb[39].mxu1  ;;  %v8885_v49 = vld [vmem:[#allocation19_spill] sm:$0xff] }
 0x362   :  { %4649 = vst.msk [vmem:[%s8801_s2 + $0x5a0] sm:$0xff] %vm4468_vm1, %v4278_v28  ;;  %v4281_v60 = vadd.f32 %v4280_v54, %v8877_v36 }
 0x363   :  { %4616 = vst.msk [vmem:[%s8801_s2 + $0x498] sm:$0xff] %vm4468_vm1, %v4145_v26  ;;  %4652 = vst.msk [vmem:[%s8801_s2 + $0x5b8] sm:$0xff] %vm4468_vm1, %v4289_v1  ;;  %v8886_v1 = vld [vmem:[#allocation24_spill] sm:$0xff] }
 0x364   :  { %4650 = vst.msk [vmem:[%s8801_s2 + $0x5a8] sm:$0xff] %vm4468_vm1, %v4281_v60  ;;  %v8887_v60 = vld [vmem:[#allocation22_spill] sm:$0xff] }
 0x366   :  { %v3204_v62 = vpop.f32.mrb[40].mxu0  ;;  %v5466_v46 = vpop.f32.mrb[40].mxu1 }
 0x367   :  { %v4150_v24 = vadd.f32 %v8267_v44, %v3204_v62  ;;  %v4302_v22 = vadd.f32 %v5466_v46, %v8878_v38  ;;  %v3206_v16 = vpop.f32.mrb[41].mxu0  ;;  %v4293_v31 = vpop.f32.mrb[41].mxu1  ;;  %v8888_v38 = vld [vmem:[#allocation25_spill] sm:$0xff] }
 0x368   :  { %v4294_v23 = vadd.f32 %v4293_v31, %v8879_v9  ;;  %v3207_v35 = vpop.f32.mrb[42].mxu0  ;;  %v5467_v27 = vpop.f32.mrb[42].mxu1  ;;  %v8889_v9 = vld [vmem:[#allocation23_spill] sm:$0xff] }
 0x369   :  { %4617 = vst.msk [vmem:[%s8801_s2 + $0x4a0] sm:$0xff] %vm4468_vm1, %v4150_v24  ;;  %4655 = vst.msk [vmem:[%s8801_s2 + $0x5d0] sm:$0xff] %vm4468_vm1, %v4302_v22  ;;  %v4153_v44 = vadd.f32 %v8275_v12, %v3207_v35  ;;  %v4305_v4 = vadd.f32 %v5467_v27, %v8880_v39  ;;  %v3209_v13 = vpop.f32.mrb[43].mxu0  ;;  %v4296_v58 = vpop.f32.mrb[43].mxu1 }
 0x36a   :  { %4653 = vst.msk [vmem:[%s8801_s2 + $0x5c0] sm:$0xff] %vm4468_vm1, %v4294_v23  ;;  %v4297_v50 = vadd.f32 %v4296_v58, %v8881_v5  ;;  %v8891_v58 = vld [vmem:[#allocation26_spill] sm:$0xff] }
 0x36b   :  { %4618 = vst.msk [vmem:[%s8801_s2 + $0x4a8] sm:$0xff] %vm4468_vm1, %v4153_v44  ;;  %4656 = vst.msk [vmem:[%s8801_s2 + $0x5d8] sm:$0xff] %vm4468_vm1, %v4305_v4  ;;  %v8890_v44 = vld [vmem:[#allocation28_spill] sm:$0xff] }
 0x36c   :  { %4654 = vst.msk [vmem:[%s8801_s2 + $0x5c8] sm:$0xff] %vm4468_vm1, %v4297_v50 }
 0x36e   :  { %v3212_v12 = vpop.f32.mrb[44].mxu0  ;;  %v5470_v40 = vpop.f32.mrb[44].mxu1 }
 0x36f   :  { %v4158_v7 = vadd.f32 %v8265_v41, %v3212_v12  ;;  %v4318_v0 = vadd.f32 %v5470_v40, %v8882_v6  ;;  %v3214_v15 = vpop.f32.mrb[45].mxu0  ;;  %v4309_v48 = vpop.f32.mrb[45].mxu1  ;;  %v8892_v40 = vld [vmem:[#allocation29_spill] sm:$0xff] }
 0x370   :  { %v4310_v21 = vadd.f32 %v4309_v48, %v8883_v57  ;;  %v3215_v34 = vpop.f32.mrb[46].mxu0  ;;  %v5471_v18 = vpop.f32.mrb[46].mxu1  ;;  %v8893_v15 = vld [vmem:[#allocation27_spill] sm:$0xff] }
 0x371   :  { %4619 = vst.msk [vmem:[%s8801_s2 + $0x4b0] sm:$0xff] %vm4468_vm1, %v4158_v7  ;;  %4659 = vst.msk [vmem:[%s8801_s2 + $0x5f0] sm:$0xff] %vm4468_vm1, %v4318_v0  ;;  %v4161_v41 = vadd.f32 %v8269_v29, %v3215_v34  ;;  %v4321_v43 = vadd.f32 %v5471_v18, %v8884_v53  ;;  %v3217_v11 = vpop.f32.mrb[47].mxu0  ;;  %v4312_v28 = vpop.f32.mrb[47].mxu1  ;;  %v8894_v34 = vld [vmem:[#allocation32_spill] sm:$0xff] }
 0x372   :  { %4657 = vst.msk [vmem:[%s8801_s2 + $0x5e0] sm:$0xff] %vm4468_vm1, %v4310_v21  ;;  %v4313_v14 = vadd.f32 %v4312_v28, %v8885_v49 }
 0x373   :  { %4620 = vst.msk [vmem:[%s8801_s2 + $0x4b8] sm:$0xff] %vm4468_vm1, %v4161_v41  ;;  %4660 = vst.msk [vmem:[%s8801_s2 + $0x5f8] sm:$0xff] %vm4468_vm1, %v4321_v43  ;;  %v8895_v43 = vld [vmem:[#allocation30_spill] sm:$0xff] }
 0x374   :  { %4658 = vst.msk [vmem:[%s8801_s2 + $0x5e8] sm:$0xff] %vm4468_vm1, %v4313_v14  ;;  %v8896_v14 = vld [vmem:[#allocation33_spill] sm:$0xff] }
 0x376   :  { %v3220_v29 = vpop.f32.mrb[48].mxu0  ;;  %v5474_v26 = vpop.f32.mrb[48].mxu1 }
 0x377   :  { %v4166_v20 = vadd.f32 %v8283_v30, %v3220_v29  ;;  %v4334_v32 = vadd.f32 %v5474_v26, %v8886_v1  ;;  %v3222_v54 = vpop.f32.mrb[49].mxu0  ;;  %v4325_v36 = vpop.f32.mrb[49].mxu1  ;;  %v8897_v1 = vld [vmem:[#allocation31_spill] sm:$0xff] }
 0x378   :  { %v4326_v62 = vadd.f32 %v4325_v36, %v8887_v60  ;;  %v3223_v46 = vpop.f32.mrb[50].mxu0  ;;  %v5475_v24 = vpop.f32.mrb[50].mxu1  ;;  %v8898_v60 = vld [vmem:[#allocation36_spill] sm:$0xff] }
 0x379   :  { %4621 = vst.msk [vmem:[%s8801_s2 + $0x4c0] sm:$0xff] %vm4468_vm1, %v4166_v20  ;;  %4663 = vst.msk [vmem:[%s8801_s2 + $0x610] sm:$0xff] %vm4468_vm1, %v4334_v32  ;;  %v4169_v30 = vadd.f32 %v8291_v52, %v3223_v46  ;;  %v4337_v22 = vadd.f32 %v5475_v24, %v8888_v38  ;;  %v3225_v16 = vpop.f32.mrb[51].mxu0  ;;  %v4328_v31 = vpop.f32.mrb[51].mxu1 }
 0x37a   :  { %4661 = vst.msk [vmem:[%s8801_s2 + $0x600] sm:$0xff] %vm4468_vm1, %v4326_v62  ;;  %v4329_v23 = vadd.f32 %v4328_v31, %v8889_v9  ;;  %v8900_v31 = vld [vmem:[#allocation37_spill] sm:$0xff] }
 0x37b   :  { %4622 = vst.msk [vmem:[%s8801_s2 + $0x4c8] sm:$0xff] %vm4468_vm1, %v4169_v30  ;;  %4664 = vst.msk [vmem:[%s8801_s2 + $0x618] sm:$0xff] %vm4468_vm1, %v4337_v22  ;;  %v8899_v30 = vld [vmem:[#allocation34_spill] sm:$0xff] }
 0x37c   :  { %4662 = vst.msk [vmem:[%s8801_s2 + $0x608] sm:$0xff] %vm4468_vm1, %v4329_v23 }
 0x37e   :  { %v3228_v52 = vpop.f32.mrb[52].mxu0  ;;  %v5478_v35 = vpop.f32.mrb[52].mxu1 }
 0x37f   :  { %v4174_v27 = vadd.f32 %v8281_v63, %v3228_v52  ;;  %v4350_v39 = vadd.f32 %v5478_v35, %v8890_v44  ;;  %v3230_v4 = vpop.f32.mrb[53].mxu0  ;;  %v4341_v13 = vpop.f32.mrb[53].mxu1  ;;  %v8901_v35 = vld [vmem:[#allocation35_spill] sm:$0xff] }
 0x380   :  { %v4342_v5 = vadd.f32 %v4341_v13, %v8891_v58  ;;  %v3231_v50 = vpop.f32.mrb[54].mxu0  ;;  %v5479_v12 = vpop.f32.mrb[54].mxu1  ;;  %v8902_v4 = vld [vmem:[#allocation40_spill] sm:$0xff] }
 0x381   :  { %4623 = vst.msk [vmem:[%s8801_s2 + $0x4d0] sm:$0xff] %vm4468_vm1, %v4174_v27  ;;  %4667 = vst.msk [vmem:[%s8801_s2 + $0x630] sm:$0xff] %vm4468_vm1, %v4350_v39  ;;  %v4177_v63 = vadd.f32 %v8285_v3, %v3231_v50  ;;  %v4353_v7 = vadd.f32 %v5479_v12, %v8892_v40  ;;  %v3233_v6 = vpop.f32.mrb[55].mxu0  ;;  %v4344_v0 = vpop.f32.mrb[55].mxu1  ;;  %v8903_v50 = vld [vmem:[#allocation38_spill] sm:$0xff] }
 0x382   :  { %4665 = vst.msk [vmem:[%s8801_s2 + $0x620] sm:$0xff] %vm4468_vm1, %v4342_v5  ;;  %v4345_v48 = vadd.f32 %v4344_v0, %v8893_v15 }
 0x383   :  { %4624 = vst.msk [vmem:[%s8801_s2 + $0x4d8] sm:$0xff] %vm4468_vm1, %v4177_v63  ;;  %4668 = vst.msk [vmem:[%s8801_s2 + $0x638] sm:$0xff] %vm4468_vm1, %v4353_v7  ;;  %v8904_v7 = vld [vmem:[#allocation41_spill] sm:$0xff] }
 0x384   :  { %4666 = vst.msk [vmem:[%s8801_s2 + $0x628] sm:$0xff] %vm4468_vm1, %v4345_v48  ;;  %v8905_v48 = vld [vmem:[#allocation39_spill] sm:$0xff] }
 0x386   :  { %v3236_v3 = vpop.f32.mrb[56].mxu0  ;;  %v5482_v57 = vpop.f32.mrb[56].mxu1 }
 0x387   :  { %v4182_v21 = vadd.f32 %v8300_v61, %v3236_v3  ;;  %v4366_v18 = vadd.f32 %v5482_v57, %v8894_v34  ;;  %v3238_v41 = vpop.f32.mrb[57].mxu0  ;;  %v4357_v53 = vpop.f32.mrb[57].mxu1  ;;  %v8906_v34 = vld [vmem:[#allocation44_spill] sm:$0xff] }
 0x388   :  { %v4358_v11 = vadd.f32 %v4357_v53, %v8895_v43  ;;  %v3239_v28 = vpop.f32.mrb[58].mxu0  ;;  %v5483_v49 = vpop.f32.mrb[58].mxu1  ;;  %v8907_v43 = vld [vmem:[#allocation42_spill] sm:$0xff] }
 0x389   :  { %4625 = vst.msk [vmem:[%s8801_s2 + $0x4e0] sm:$0xff] %vm4468_vm1, %v4182_v21  ;;  %4671 = vst.msk [vmem:[%s8801_s2 + $0x650] sm:$0xff] %vm4468_vm1, %v4366_v18  ;;  %v4185_v61 = vadd.f32 %v8309_v59, %v3239_v28  ;;  %v4369_v29 = vadd.f32 %v5483_v49, %v8896_v14  ;;  %v3241_v26 = vpop.f32.mrb[59].mxu0  ;;  %v4360_v20 = vpop.f32.mrb[59].mxu1 }
 0x38a   :  { %4669 = vst.msk [vmem:[%s8801_s2 + $0x640] sm:$0xff] %vm4468_vm1, %v4358_v11  ;;  %v4361_v32 = vadd.f32 %v4360_v20, %v8897_v1  ;;  %v8909_v20 = vld [vmem:[#allocation43_spill] sm:$0xff] }
 0x38b   :  { %4626 = vst.msk [vmem:[%s8801_s2 + $0x4e8] sm:$0xff] %vm4468_vm1, %v4185_v61  ;;  %4672 = vst.msk [vmem:[%s8801_s2 + $0x658] sm:$0xff] %vm4468_vm1, %v4369_v29  ;;  %v8908_v61 = vld [vmem:[#allocation45_spill] sm:$0xff] }
 0x38c   :  { %4670 = vst.msk [vmem:[%s8801_s2 + $0x648] sm:$0xff] %vm4468_vm1, %v4361_v32 }
 0x38e   :  { %v3244_v59 = vpop.f32.mrb[60].mxu0  ;;  %v5486_v54 = vpop.f32.mrb[60].mxu1 }
 0x38f   :  { %v4190_v36 = vadd.f32 %v8297_v17, %v3244_v59  ;;  %v4382_v62 = vadd.f32 %v5486_v54, %v8898_v60  ;;  %v3246_v46 = vpop.f32.mrb[61].mxu0  ;;  %v4373_v24 = vpop.f32.mrb[61].mxu1  ;;  %v8910_v54 = vld [vmem:[#allocation48_spill] sm:$0xff] }
 0x390   :  { %v4374_v38 = vadd.f32 %v4373_v24, %v8899_v30  ;;  %v3247_v22 = vpop.f32.mrb[62].mxu0  ;;  %v5487_v16 = vpop.f32.mrb[62].mxu1  ;;  %v8911_v46 = vld [vmem:[#allocation46_spill] sm:$0xff] }
 0x391   :  { %4627 = vst.msk [vmem:[%s8801_s2 + $0x4f0] sm:$0xff] %vm4468_vm1, %v4190_v36  ;;  %4675 = vst.msk [vmem:[%s8801_s2 + $0x670] sm:$0xff] %vm4468_vm1, %v4382_v62  ;;  %v4193_v17 = vadd.f32 %v8302_v25, %v3247_v22  ;;  %v4385_v9 = vadd.f32 %v5487_v16, %v8900_v31  ;;  %v3249_v23 = vpop.f32.mrb[63].mxu0  ;;  %v4376_v52 = vpop.f32.mrb[63].mxu1  ;;  %v8912_v22 = vld [vmem:[#allocation49_spill] sm:$0xff] }
 0x392   :  { %4673 = vst.msk [vmem:[%s8801_s2 + $0x660] sm:$0xff] %vm4468_vm1, %v4374_v38  ;;  %v4377_v27 = vadd.f32 %v4376_v52, %v8901_v35 }
 0x393   :  { %4628 = vst.msk [vmem:[%s8801_s2 + $0x4f8] sm:$0xff] %vm4468_vm1, %v4193_v17  ;;  %4676 = vst.msk [vmem:[%s8801_s2 + $0x678] sm:$0xff] %vm4468_vm1, %v4385_v9  ;;  %v8913_v9 = vld [vmem:[#allocation47_spill] sm:$0xff] }
 0x394   :  { %4674 = vst.msk [vmem:[%s8801_s2 + $0x668] sm:$0xff] %vm4468_vm1, %v4377_v27  ;;  %v8914_v27 = vld [vmem:[#allocation52_spill] sm:$0xff] }
 0x396   :  { %v3252_v25 = vpop.f32.mrb[64].mxu0  ;;  %v5490_v44 = vpop.f32.mrb[64].mxu1 }
 0x397   :  { %v4198_v39 = vadd.f32 %v8318_v47, %v3252_v25  ;;  %v4398_v13 = vadd.f32 %v5490_v44, %v8902_v4  ;;  %v3254_v58 = vpop.f32.mrb[65].mxu0  ;;  %v4389_v5 = vpop.f32.mrb[65].mxu1  ;;  %v8915_v4 = vld [vmem:[#allocation50_spill] sm:$0xff] }
 0x398   :  { %v4390_v12 = vadd.f32 %v4389_v5, %v8903_v50  ;;  %v3255_v63 = vpop.f32.mrb[66].mxu0  ;;  %v5491_v40 = vpop.f32.mrb[66].mxu1  ;;  %v8916_v50 = vld [vmem:[#allocation53_spill] sm:$0xff] }
 0x399   :  { %4629 = vst.msk [vmem:[%s8801_s2 + $0x500] sm:$0xff] %vm4468_vm1, %v4198_v39  ;;  %4679 = vst.msk [vmem:[%s8801_s2 + $0x690] sm:$0xff] %vm4468_vm1, %v4398_v13  ;;  %v4201_v47 = vadd.f32 %v8327_v45, %v3255_v63  ;;  %v4401_v6 = vadd.f32 %v5491_v40, %v8904_v7  ;;  %v3257_v0 = vpop.f32.mrb[67].mxu0  ;;  %v4392_v15 = vpop.f32.mrb[67].mxu1 }
 0x39a   :  { %4677 = vst.msk [vmem:[%s8801_s2 + $0x680] sm:$0xff] %vm4468_vm1, %v4390_v12  ;;  %v4393_v3 = vadd.f32 %v4392_v15, %v8905_v48  ;;  %v8918_v15 = vld [vmem:[#allocation59_spill] sm:$0xff] }
 0x39b   :  { %4630 = vst.msk [vmem:[%s8801_s2 + $0x508] sm:$0xff] %vm4468_vm1, %v4201_v47  ;;  %4680 = vst.msk [vmem:[%s8801_s2 + $0x698] sm:$0xff] %vm4468_vm1, %v4401_v6  ;;  %v8917_v47 = vld [vmem:[#allocation51_spill] sm:$0xff] }
 0x39c   :  { %4678 = vst.msk [vmem:[%s8801_s2 + $0x688] sm:$0xff] %vm4468_vm1, %v4393_v3 }
 0x39e   :  { %v3260_v45 = vpop.f32.mrb[68].mxu0  ;;  %v5494_v57 = vpop.f32.mrb[68].mxu1 }
 0x39f   :  { %v4206_v21 = vadd.f32 %v8315_v37, %v3260_v45  ;;  %v4414_v18 = vadd.f32 %v5494_v57, %v8906_v34  ;;  %v3262_v41 = vpop.f32.mrb[69].mxu0  ;;  %v4405_v53 = vpop.f32.mrb[69].mxu1  ;;  %v8919_v57 = vld [vmem:[#allocation55_spill] sm:$0xff] }
 0x3a0   :  { %v4406_v11 = vadd.f32 %v4405_v53, %v8907_v43  ;;  %v3263_v28 = vpop.f32.mrb[70].mxu0  ;;  %v5495_v49 = vpop.f32.mrb[70].mxu1  ;;  %v8920_v41 = vld [vmem:[#allocation61_spill] sm:$0xff] }
 0x3a1   :  { %4631 = vst.msk [vmem:[%s8801_s2 + $0x510] sm:$0xff] %vm4468_vm1, %v4206_v21  ;;  %4683 = vst.msk [vmem:[%s8801_s2 + $0x6b0] sm:$0xff] %vm4468_vm1, %v4414_v18  ;;  %v4209_v37 = vadd.f32 %v8320_v19, %v3263_v28  ;;  %v4417_v14 = vadd.f32 %v5495_v49, %v8908_v61  ;;  %v3265_v29 = vpop.f32.mrb[71].mxu0  ;;  %v4408_v26 = vpop.f32.mrb[71].mxu1  ;;  %v8921_v28 = vld [vmem:[#allocation57_spill] sm:$0xff] }
 0x3a2   :  { %4681 = vst.msk [vmem:[%s8801_s2 + $0x6a0] sm:$0xff] %vm4468_vm1, %v4406_v11  ;;  %v4409_v1 = vadd.f32 %v4408_v26, %v8909_v20 }
 0x3a3   :  { %4632 = vst.msk [vmem:[%s8801_s2 + $0x518] sm:$0xff] %vm4468_vm1, %v4209_v37  ;;  %4684 = vst.msk [vmem:[%s8801_s2 + $0x6b8] sm:$0xff] %vm4468_vm1, %v4417_v14 }
 0x3a4   :  { %4682 = vst.msk [vmem:[%s8801_s2 + $0x6a8] sm:$0xff] %vm4468_vm1, %v4409_v1 }
 0x3a6   :  { %v3268_v19 = vpop.f32.mrb[72].mxu0  ;;  %v5498_v32 = vpop.f32.mrb[72].mxu1 }
 0x3a7   :  { %v4214_v59 = vadd.f32 %v8336_v10, %v3268_v19  ;;  %v4430_v36 = vadd.f32 %v5498_v32, %v8910_v54  ;;  %v3270_v60 = vpop.f32.mrb[73].mxu0  ;;  %v4421_v62 = vpop.f32.mrb[73].mxu1 }
 0x3a8   :  { %v4422_v24 = vadd.f32 %v4421_v62, %v8911_v46  ;;  %v3271_v30 = vpop.f32.mrb[74].mxu0  ;;  %v5499_v38 = vpop.f32.mrb[74].mxu1 }
 0x3a9   :  { %4633 = vst.msk [vmem:[%s8801_s2 + $0x520] sm:$0xff] %vm4468_vm1, %v4214_v59  ;;  %4687 = vst.msk [vmem:[%s8801_s2 + $0x6d0] sm:$0xff] %vm4468_vm1, %v4430_v36  ;;  %v4217_v10 = vadd.f32 %v8345_v42, %v3271_v30  ;;  %v4433_v16 = vadd.f32 %v5499_v38, %v8912_v22  ;;  %v3273_v17 = vpop.f32.mrb[75].mxu0  ;;  %v4424_v31 = vpop.f32.mrb[75].mxu1 }
 0x3aa   :  { %4685 = vst.msk [vmem:[%s8801_s2 + $0x6c0] sm:$0xff] %vm4468_vm1, %v4422_v24  ;;  %v4425_v23 = vadd.f32 %v4424_v31, %v8913_v9 }
 0x3ab   :  { %4634 = vst.msk [vmem:[%s8801_s2 + $0x528] sm:$0xff] %vm4468_vm1, %v4217_v10  ;;  %4688 = vst.msk [vmem:[%s8801_s2 + $0x6d8] sm:$0xff] %vm4468_vm1, %v4433_v16 }
 0x3ac   :  { %4686 = vst.msk [vmem:[%s8801_s2 + $0x6c8] sm:$0xff] %vm4468_vm1, %v4425_v23 }
 0x3ae   :  { %v3276_v42 = vpop.f32.mrb[76].mxu0  ;;  %v5502_v52 = vpop.f32.mrb[76].mxu1 }
 0x3af   :  { %v4222_v35 = vadd.f32 %v8333_v8, %v3276_v42  ;;  %v4446_v25 = vadd.f32 %v5502_v52, %v8914_v27  ;;  %v3278_v44 = vpop.f32.mrb[77].mxu0  ;;  %v4437_v39 = vpop.f32.mrb[77].mxu1 }
 0x3b0   :  { %v4438_v13 = vadd.f32 %v4437_v39, %v8915_v4  ;;  %v3279_v58 = vpop.f32.mrb[78].mxu0  ;;  %v5503_v5 = vpop.f32.mrb[78].mxu1 }
 0x3b1   :  { %4635 = vst.msk [vmem:[%s8801_s2 + $0x530] sm:$0xff] %vm4468_vm1, %v4222_v35  ;;  %4691 = vst.msk [vmem:[%s8801_s2 + $0x6f0] sm:$0xff] %vm4468_vm1, %v4446_v25  ;;  %v4225_v8 = vadd.f32 %v8338_v56, %v3279_v58  ;;  %v4449_v12 = vadd.f32 %v5503_v5, %v8916_v50  ;;  %v3281_v63 = vpop.f32.mrb[79].mxu0  ;;  %v4440_v40 = vpop.f32.mrb[79].mxu1 }
 0x3b2   :  { %4689 = vst.msk [vmem:[%s8801_s2 + $0x6e0] sm:$0xff] %vm4468_vm1, %v4438_v13  ;;  %v4441_v7 = vadd.f32 %v4440_v40, %v8917_v47 }
 0x3b3   :  { %4636 = vst.msk [vmem:[%s8801_s2 + $0x538] sm:$0xff] %vm4468_vm1, %v4225_v8  ;;  %4692 = vst.msk [vmem:[%s8801_s2 + $0x6f8] sm:$0xff] %vm4468_vm1, %v4449_v12 }
 0x3b4   :  { %4690 = vst.msk [vmem:[%s8801_s2 + $0x6e8] sm:$0xff] %vm4468_vm1, %v4441_v7 }
 0x3b6   :  { %v3284_v56 = vpop.f32.mrb[80].mxu0  ;;  %v5506_v6 = vpop.f32.mrb[80].mxu1 }
 0x3b7   :  { %v4230_v0 = vadd.f32 %v8354_v51, %v3284_v56  ;;  %v4462_v48 = vadd.f32 %v5506_v6, %v8918_v15  ;;  %v3286_v3 = vpop.f32.mrb[81].mxu0  ;;  %v4453_v45 = vpop.f32.mrb[81].mxu1 }
 0x3b8   :  { %v4454_v21 = vadd.f32 %v4453_v45, %v8919_v57  ;;  %v3287_v34 = vpop.f32.mrb[82].mxu0  ;;  %v5507_v18 = vpop.f32.mrb[82].mxu1 }
 0x3b9   :  { %4637 = vst.msk [vmem:[%s8801_s2 + $0x540] sm:$0xff] %vm4468_vm1, %v4230_v0  ;;  %4695 = vst.msk [vmem:[%s8801_s2 + $0x710] sm:$0xff] %vm4468_vm1, %v4462_v48  ;;  %v4233_v51 = vadd.f32 %v8363_v2, %v3287_v34  ;;  %v4465_v53 = vadd.f32 %v5507_v18, %v8920_v41  ;;  %v3289_v43 = vpop.f32.mrb[83].mxu0  ;;  %v4456_v11 = vpop.f32.mrb[83].mxu1 }
 0x3ba   :  { %4693 = vst.msk [vmem:[%s8801_s2 + $0x700] sm:$0xff] %vm4468_vm1, %v4454_v21  ;;  %v4457_v49 = vadd.f32 %v4456_v11, %v8921_v28 }
 0x3bb   :  { %4638 = vst.msk [vmem:[%s8801_s2 + $0x548] sm:$0xff] %vm4468_vm1, %v4233_v51  ;;  %4696 = vst.msk [vmem:[%s8801_s2 + $0x718] sm:$0xff] %vm4468_vm1, %v4465_v53 }
 0x3bc   :  { %4694 = vst.msk [vmem:[%s8801_s2 + $0x708] sm:$0xff] %vm4468_vm1, %v4457_v49 }
 0x3be   :  { %v3292_v2 = vpop.f32.mrb[84].mxu0 }
 0x3bf   :  { %v4238_v37 = vadd.f32 %v8351_v33, %v3292_v2  ;;  %v3294_v61 = vpop.f32.mrb[85].mxu0 }
 0x3c0   :  { %v3295_v14 = vpop.f32.mrb[86].mxu0 }
 0x3c1   :  { %4639 = vst.msk [vmem:[%s8801_s2 + $0x550] sm:$0xff] %vm4468_vm1, %v4238_v37  ;;  %v4241_v29 = vadd.f32 %v8356_v55, %v3295_v14  ;;  %v3297_v26 = vpop.f32.mrb[87].mxu0 }
 0x3c3   :  { %4640 = vst.msk [vmem:[%s8801_s2 + $0x558] sm:$0xff] %vm4468_vm1, %v4241_v29 }

</bundles_post_ra>
